<compile_context>
chip_gen: v5e
topology: v5e:2x2
jax: 0.10.0
libtpu: 0.0.40
codegen_flags: <defaults>
</compile_context>

<pallas_src>
import functools

import jax
import jax.numpy as jnp
import numpy as np
from jax.experimental import pallas as pl
from jax.experimental.pallas import tpu as pltpu

K = 7        # conv kernel size
PAD = 3      # padding for kernel_size=7
LANES = 128  # TPU vreg lane width


def _spatial_attention_kernel(w_ref, mask_ref, x_ref, o_ref, fmap_ref, *, width):
    # w_ref   : (2*K*K,) f32 SMEM -- conv weight flattened [ic, kh, kw]; the
    #           mean-channel (ic=0) taps are pre-scaled by 1/C in the wrapper.
    # mask_ref: (K+1, HWP) f32    -- rows 0..K-1: column-validity mask per kw.
    # x_ref   : (NB, C, HWP)      -- NB batch elements, spatial dims flattened
    #                                (HWP = H*W padded up to a multiple of 128).
    # o_ref   : (NB, C, HWP)
    # fmap_ref: (2*NB, 2*halo+HWP) f32 VMEM scratch -- flat channel-sum / max
    #           maps with zeroed halos (halo = PAD*W + PAD).
    nb, _, hwp = x_ref.shape
    halo = PAD * width + PAD

    x = x_ref[...]                                           # native dtype
    sum_map = jnp.sum(x.astype(jnp.float32), axis=1)         # (NB, HWP) channel sum
    max_map = jnp.max(x, axis=1).astype(jnp.float32)         # (NB, HWP) channel max

    # Stage the two maps with zeroed halos: any vertically out-of-image tap
    # then reads zeros, reproducing Conv2d's zero padding along H.
    fmap_ref[:, 0:halo] = jnp.zeros((2 * nb, halo), jnp.float32)
    fmap_ref[:, halo + hwp:2 * halo + hwp] = jnp.zeros((2 * nb, halo), jnp.float32)
    fmap_ref[0:nb, halo:halo + hwp] = sum_map
    fmap_ref[nb:2 * nb, halo:halo + hwp] = max_map

    # 7x7 conv (2 in -> 1 out channel) as lane-dense shifted-window accumulates.
    # Horizontal zero padding is handled by the per-kw column masks (hoisted
    # out of the kh loop: every tap with the same kw shares the same mask).
    acc = jnp.zeros((nb, hwp), jnp.float32)
    for kw in range(K):
        col_mask = mask_ref[kw:kw + 1, :]                    # (1, HWP)
        col_acc = jnp.zeros((nb, hwp), jnp.float32)
        for kh in range(K):
            s = (kh - PAD) * width + (kw - PAD)              # flat tap offset
            lo = halo + s                                    # always in-bounds
            sum_win = fmap_ref[0:nb, lo:lo + hwp]            # (NB, HWP)
            max_win = fmap_ref[nb:2 * nb, lo:lo + hwp]       # (NB, HWP)
            w_mean = w_ref[kh * K + kw]                      # scalar from SMEM
            w_max = w_ref[K * K + kh * K + kw]               # scalar from SMEM
            col_acc = col_acc + (w_mean * sum_win + w_max * max_win)
        acc = acc + col_mask * col_acc

    attn = jax.nn.sigmoid(acc)                               # (NB, HWP) f32
    o_ref[...] = (x * attn[:, None, :].astype(x.dtype)).astype(o_ref.dtype)


def _column_masks(w, hwp):
    """(K+1, HWP) f32; row kw is 1 where the horizontal tap (kw-PAD) stays in-row."""
    col = np.arange(hwp) % w
    rows = [((col + kw - PAD >= 0) & (col + kw - PAD < w)).astype(np.float32)
            for kw in range(K)]
    rows.append(np.zeros((hwp,), np.float32))                # pad to 8 sublanes
    return np.stack(rows, axis=0)


def spatial_attention(x, weight, *, batch_block=None):
    """x: (N, C, H, W), weight: (1, 2, K, K) -> (N, C, H, W)."""
    n, c, h, w = x.shape
    hw = h * w
    hwp = ((hw + LANES - 1) // LANES) * LANES                # lane-dense spatial size
    halo = PAD * w + PAD

    # Fold the 1/C of the channel mean into the mean-channel conv weights.
    w2 = weight.astype(jnp.float32).reshape(2, K, K)
    w_flat = w2.at[0].multiply(1.0 / c).reshape(-1)          # (2*K*K,)

    masks = jnp.asarray(_column_masks(w, hwp))               # (K+1, HWP)

    xf = x.reshape(n, c, hw)
    if hwp != hw:
        xf = jnp.pad(xf, ((0, 0), (0, 0), (0, hwp - hw)))

    # Fold several batch elements into one block to amortize per-step pipeline
    # overhead while keeping the (double-buffered) block well inside VMEM.
    if batch_block is None:
        per_batch = c * hwp * x.dtype.itemsize
        batch_block = n if n * per_batch <= (2 << 20) else 1
    nb = batch_block if n % batch_block == 0 else 1

    out = pl.pallas_call(
        functools.partial(_spatial_attention_kernel, width=w),
        out_shape=jax.ShapeDtypeStruct((n, c, hwp), x.dtype),
        grid=(n // nb,),
        in_specs=[
            pl.BlockSpec(memory_space=pltpu.MemorySpace.SMEM),   # conv weights
            pl.BlockSpec((K + 1, hwp), lambda i: (0, 0)),        # column masks
            pl.BlockSpec((nb, c, hwp), lambda i: (i, 0, 0)),     # x, NB batches
        ],
        out_specs=pl.BlockSpec((nb, c, hwp), lambda i: (i, 0, 0)),
        scratch_shapes=[pltpu.VMEM((2 * nb, 2 * halo + hwp), jnp.float32)],
        compiler_params=pltpu.CompilerParams(dimension_semantics=("parallel",)),
    )(w_flat, masks, xf)

    return out[:, :, :hw].reshape(n, c, h, w)


def reference(x, weight):
    """Pure-JAX reference matching the PyTorch module."""
    mean_map = jnp.mean(x, axis=1, keepdims=True)
    max_map = jnp.max(x, axis=1, keepdims=True)
    cat = jnp.concatenate([mean_map, max_map], axis=1)       # (N, 2, H, W)
    conv = jax.lax.conv_general_dilated(
        cat, weight, window_strides=(1, 1),
        padding=[(PAD, PAD), (PAD, PAD)],
        dimension_numbers=("NCHW", "OIHW", "NCHW"),
        precision=jax.lax.Precision.HIGHEST)
    return x * jax.nn.sigmoid(conv)


if __name__ == "__main__":
    key = jax.random.PRNGKey(0)
    kx, kw_key = jax.random.split(key)

    N, C, H, W = 2, 4, 16, 16
    x = jax.random.normal(kx, (N, C, H, W), dtype=jnp.float32)

    # Deterministic Conv2d(2, 1, 7, bias=False) weight init (kaiming-uniform bound).
    fan_in = 2 * K * K
    bound = 1.0 / np.sqrt(fan_in)
    weight = jax.random.uniform(kw_key, (1, 2, K, K), jnp.float32, -bound, bound)

    out = spatial_attention(x, weight)
    out = jax.block_until_ready(out)

    ref = reference(x, weight)
    np.testing.assert_allclose(np.asarray(out), np.asarray(ref), atol=1e-4, rtol=1e-4)
    print("KERNEL_OK")
</pallas_src>

<mosaic_0001>
module attributes {stable_mosaic.version = 11 : i64} {
  func.func @_spatial_attention_kernel(%arg0: i32, %arg1: memref<98xf32, #tpu.memory_space<smem>>, %arg2: memref<8x256xf32, #tpu.memory_space<vmem>>, %arg3: memref<2x4x256xf32, #tpu.memory_space<vmem>>, %arg4: memref<2x4x256xf32, #tpu.memory_space<vmem>>, %arg5: memref<4x358xf32, #tpu.memory_space<vmem>>) attributes {dimension_semantics = [#tpu.dimension_semantics<parallel>], iteration_bounds = array<i64: 1>, scalar_prefetch = 0 : i64, scratch_operands = 1 : i64, tpu.core_type = #tpu.core_type<tc>, window_params = [{transform_indices = @transform_0, window_bounds = array<i64: 98>}, {pipeline_mode = #tpu.pipeline_mode<synchronous>, transform_indices = @transform_1, window_bounds = array<i64: 8, 256>}, {transform_indices = @transform_2, window_bounds = array<i64: 2, 4, 256>}, {transform_indices = @transform_3, window_bounds = array<i64: 2, 4, 256>}]} {
    %c0 = arith.constant 0 : index
    %c0_0 = arith.constant 0 : index
    %c0_1 = arith.constant 0 : index
    %0 = vector.load %arg3[%c0, %c0_0, %c0_1] : memref<2x4x256xf32, #tpu.memory_space<vmem>>, vector<2x4x256xf32>
    %cst = arith.constant dense<0.000000e+00> : vector<2x256xf32>
    %1 = vector.multi_reduction <add>, %0, %cst [1] : vector<2x4x256xf32> to vector<2x256xf32>
    %cst_2 = arith.constant dense<0xFF800000> : vector<2x256xf32>
    %2 = vector.multi_reduction <maximumf>, %0, %cst_2 [1] : vector<2x4x256xf32> to vector<2x256xf32>
    %cst_3 = arith.constant 0.000000e+00 : f32
    %3 = vector.broadcast %cst_3 : f32 to vector<4x51xf32>
    %c0_4 = arith.constant 0 : index
    %c0_5 = arith.constant 0 : index
    %4 = vector.load %arg5[%c0_4, %c0_5] : memref<4x358xf32, #tpu.memory_space<vmem>>, vector<4x51xf32>
    tpu.vector_store %arg5[%c0_4, %c0_5], %3 {strides = array<i32>} : memref<4x358xf32, #tpu.memory_space<vmem>>, vector<4x51xf32>,
    %cst_6 = arith.constant 0.000000e+00 : f32
    %5 = vector.broadcast %cst_6 : f32 to vector<4x51xf32>
    %c0_7 = arith.constant 0 : index
    %c307 = arith.constant 307 : index
    %6 = vector.load %arg5[%c0_7, %c307] : memref<4x358xf32, #tpu.memory_space<vmem>>, vector<4x51xf32>
    tpu.vector_store %arg5[%c0_7, %c307], %5 {strides = array<i32>} : memref<4x358xf32, #tpu.memory_space<vmem>>, vector<4x51xf32>,
    %c0_8 = arith.constant 0 : index
    %c51 = arith.constant 51 : index
    %7 = vector.load %arg5[%c0_8, %c51] : memref<4x358xf32, #tpu.memory_space<vmem>>, vector<2x256xf32>
    tpu.vector_store %arg5[%c0_8, %c51], %1 {strides = array<i32>} : memref<4x358xf32, #tpu.memory_space<vmem>>, vector<2x256xf32>,
    %c2 = arith.constant 2 : index
    %c51_9 = arith.constant 51 : index
    %8 = vector.load %arg5[%c2, %c51_9] : memref<4x358xf32, #tpu.memory_space<vmem>>, vector<2x256xf32>
    tpu.vector_store %arg5[%c2, %c51_9], %2 {strides = array<i32>} : memref<4x358xf32, #tpu.memory_space<vmem>>, vector<2x256xf32>,
    %cst_10 = arith.constant 0.000000e+00 : f32
    %9 = vector.broadcast %cst_10 : f32 to vector<2x256xf32>
    %c0_11 = arith.constant 0 : index
    %c0_12 = arith.constant 0 : index
    %10 = vector.load %arg2[%c0_11, %c0_12] : memref<8x256xf32, #tpu.memory_space<vmem>>, vector<1x256xf32>
    %cst_13 = arith.constant 0.000000e+00 : f32
    %11 = vector.broadcast %cst_13 : f32 to vector<2x256xf32>
    %c0_14 = arith.constant 0 : index
    %c0_15 = arith.constant 0 : index
    %12 = vector.load %arg5[%c0_14, %c0_15] : memref<4x358xf32, #tpu.memory_space<vmem>>, vector<2x256xf32>
    %c2_16 = arith.constant 2 : index
    %c0_17 = arith.constant 0 : index
    %13 = vector.load %arg5[%c2_16, %c0_17] : memref<4x358xf32, #tpu.memory_space<vmem>>, vector<2x256xf32>
    %c0_18 = arith.constant 0 : index
    %14 = memref.load %arg1[%c0_18] : memref<98xf32, #tpu.memory_space<smem>>
    %c49 = arith.constant 49 : index
    %15 = memref.load %arg1[%c49] : memref<98xf32, #tpu.memory_space<smem>>
    %16 = vector.broadcast %14 : f32 to vector<2x256xf32>
    %17 = arith.mulf %16, %12 : vector<2x256xf32>
    %18 = vector.broadcast %15 : f32 to vector<2x256xf32>
    %19 = arith.mulf %18, %13 : vector<2x256xf32>
    %20 = arith.addf %17, %19 : vector<2x256xf32>
    %21 = arith.addf %11, %20 : vector<2x256xf32>
    %c0_19 = arith.constant 0 : index
    %c16 = arith.constant 16 : index
    %22 = vector.load %arg5[%c0_19, %c16] : memref<4x358xf32, #tpu.memory_space<vmem>>, vector<2x256xf32>
    %c2_20 = arith.constant 2 : index
    %c16_21 = arith.constant 16 : index
    %23 = vector.load %arg5[%c2_20, %c16_21] : memref<4x358xf32, #tpu.memory_space<vmem>>, vector<2x256xf32>
    %c7 = arith.constant 7 : index
    %24 = memref.load %arg1[%c7] : memref<98xf32, #tpu.memory_space<smem>>
    %c56 = arith.constant 56 : index
    %25 = memref.load %arg1[%c56] : memref<98xf32, #tpu.memory_space<smem>>
    %26 = vector.broadcast %24 : f32 to vector<2x256xf32>
    %27 = arith.mulf %26, %22 : vector<2x256xf32>
    %28 = vector.broadcast %25 : f32 to vector<2x256xf32>
    %29 = arith.mulf %28, %23 : vector<2x256xf32>
    %30 = arith.addf %27, %29 : vector<2x256xf32>
    %31 = arith.addf %21, %30 : vector<2x256xf32>
    %c0_22 = arith.constant 0 : index
    %c32 = arith.constant 32 : index
    %32 = vector.load %arg5[%c0_22, %c32] : memref<4x358xf32, #tpu.memory_space<vmem>>, vector<2x256xf32>
    %c2_23 = arith.constant 2 : index
    %c32_24 = arith.constant 32 : index
    %33 = vector.load %arg5[%c2_23, %c32_24] : memref<4x358xf32, #tpu.memory_space<vmem>>, vector<2x256xf32>
    %c14 = arith.constant 14 : index
    %34 = memref.load %arg1[%c14] : memref<98xf32, #tpu.memory_space<smem>>
    %c63 = arith.constant 63 : index
    %35 = memref.load %arg1[%c63] : memref<98xf32, #tpu.memory_space<smem>>
    %36 = vector.broadcast %34 : f32 to vector<2x256xf32>
    %37 = arith.mulf %36, %32 : vector<2x256xf32>
    %38 = vector.broadcast %35 : f32 to vector<2x256xf32>
    %39 = arith.mulf %38, %33 : vector<2x256xf32>
    %40 = arith.addf %37, %39 : vector<2x256xf32>
    %41 = arith.addf %31, %40 : vector<2x256xf32>
    %c0_25 = arith.constant 0 : index
    %c48 = arith.constant 48 : index
    %42 = vector.load %arg5[%c0_25, %c48] : memref<4x358xf32, #tpu.memory_space<vmem>>, vector<2x256xf32>
    %c2_26 = arith.constant 2 : index
    %c48_27 = arith.constant 48 : index
    %43 = vector.load %arg5[%c2_26, %c48_27] : memref<4x358xf32, #tpu.memory_space<vmem>>, vector<2x256xf32>
    %c21 = arith.constant 21 : index
    %44 = memref.load %arg1[%c21] : memref<98xf32, #tpu.memory_space<smem>>
    %c70 = arith.constant 70 : index
    %45 = memref.load %arg1[%c70] : memref<98xf32, #tpu.memory_space<smem>>
    %46 = vector.broadcast %44 : f32 to vector<2x256xf32>
    %47 = arith.mulf %46, %42 : vector<2x256xf32>
    %48 = vector.broadcast %45 : f32 to vector<2x256xf32>
    %49 = arith.mulf %48, %43 : vector<2x256xf32>
    %50 = arith.addf %47, %49 : vector<2x256xf32>
    %51 = arith.addf %41, %50 : vector<2x256xf32>
    %c0_28 = arith.constant 0 : index
    %c64 = arith.constant 64 : index
    %52 = vector.load %arg5[%c0_28, %c64] : memref<4x358xf32, #tpu.memory_space<vmem>>, vector<2x256xf32>
    %c2_29 = arith.constant 2 : index
    %c64_30 = arith.constant 64 : index
    %53 = vector.load %arg5[%c2_29, %c64_30] : memref<4x358xf32, #tpu.memory_space<vmem>>, vector<2x256xf32>
    %c28 = arith.constant 28 : index
    %54 = memref.load %arg1[%c28] : memref<98xf32, #tpu.memory_space<smem>>
    %c77 = arith.constant 77 : index
    %55 = memref.load %arg1[%c77] : memref<98xf32, #tpu.memory_space<smem>>
    %56 = vector.broadcast %54 : f32 to vector<2x256xf32>
    %57 = arith.mulf %56, %52 : vector<2x256xf32>
    %58 = vector.broadcast %55 : f32 to vector<2x256xf32>
    %59 = arith.mulf %58, %53 : vector<2x256xf32>
    %60 = arith.addf %57, %59 : vector<2x256xf32>
    %61 = arith.addf %51, %60 : vector<2x256xf32>
    %c0_31 = arith.constant 0 : index
    %c80 = arith.constant 80 : index
    %62 = vector.load %arg5[%c0_31, %c80] : memref<4x358xf32, #tpu.memory_space<vmem>>, vector<2x256xf32>
    %c2_32 = arith.constant 2 : index
    %c80_33 = arith.constant 80 : index
    %63 = vector.load %arg5[%c2_32, %c80_33] : memref<4x358xf32, #tpu.memory_space<vmem>>, vector<2x256xf32>
    %c35 = arith.constant 35 : index
    %64 = memref.load %arg1[%c35] : memref<98xf32, #tpu.memory_space<smem>>
    %c84 = arith.constant 84 : index
    %65 = memref.load %arg1[%c84] : memref<98xf32, #tpu.memory_space<smem>>
    %66 = vector.broadcast %64 : f32 to vector<2x256xf32>
    %67 = arith.mulf %66, %62 : vector<2x256xf32>
    %68 = vector.broadcast %65 : f32 to vector<2x256xf32>
    %69 = arith.mulf %68, %63 : vector<2x256xf32>
    %70 = arith.addf %67, %69 : vector<2x256xf32>
    %71 = arith.addf %61, %70 : vector<2x256xf32>
    %c0_34 = arith.constant 0 : index
    %c96 = arith.constant 96 : index
    %72 = vector.load %arg5[%c0_34, %c96] : memref<4x358xf32, #tpu.memory_space<vmem>>, vector<2x256xf32>
    %c2_35 = arith.constant 2 : index
    %c96_36 = arith.constant 96 : index
    %73 = vector.load %arg5[%c2_35, %c96_36] : memref<4x358xf32, #tpu.memory_space<vmem>>, vector<2x256xf32>
    %c42 = arith.constant 42 : index
    %74 = memref.load %arg1[%c42] : memref<98xf32, #tpu.memory_space<smem>>
    %c91 = arith.constant 91 : index
    %75 = memref.load %arg1[%c91] : memref<98xf32, #tpu.memory_space<smem>>
    %76 = vector.broadcast %74 : f32 to vector<2x256xf32>
    %77 = arith.mulf %76, %72 : vector<2x256xf32>
    %78 = vector.broadcast %75 : f32 to vector<2x256xf32>
    %79 = arith.mulf %78, %73 : vector<2x256xf32>
    %80 = arith.addf %77, %79 : vector<2x256xf32>
    %81 = arith.addf %71, %80 : vector<2x256xf32>
    %82 = vector.broadcast %10 : vector<1x256xf32> to vector<2x256xf32>
    %83 = arith.mulf %82, %81 : vector<2x256xf32>
    %84 = arith.addf %9, %83 : vector<2x256xf32>
    %c1 = arith.constant 1 : index
    %c0_37 = arith.constant 0 : index
    %85 = vector.load %arg2[%c1, %c0_37] : memref<8x256xf32, #tpu.memory_space<vmem>>, vector<1x256xf32>
    %cst_38 = arith.constant 0.000000e+00 : f32
    %86 = vector.broadcast %cst_38 : f32 to vector<2x256xf32>
    %c0_39 = arith.constant 0 : index
    %c1_40 = arith.constant 1 : index
    %87 = vector.load %arg5[%c0_39, %c1_40] : memref<4x358xf32, #tpu.memory_space<vmem>>, vector<2x256xf32>
    %c2_41 = arith.constant 2 : index
    %c1_42 = arith.constant 1 : index
    %88 = vector.load %arg5[%c2_41, %c1_42] : memref<4x358xf32, #tpu.memory_space<vmem>>, vector<2x256xf32>
    %c1_43 = arith.constant 1 : index
    %89 = memref.load %arg1[%c1_43] : memref<98xf32, #tpu.memory_space<smem>>
    %c50 = arith.constant 50 : index
    %90 = memref.load %arg1[%c50] : memref<98xf32, #tpu.memory_space<smem>>
    %91 = vector.broadcast %89 : f32 to vector<2x256xf32>
    %92 = arith.mulf %91, %87 : vector<2x256xf32>
    %93 = vector.broadcast %90 : f32 to vector<2x256xf32>
    %94 = arith.mulf %93, %88 : vector<2x256xf32>
    %95 = arith.addf %92, %94 : vector<2x256xf32>
    %96 = arith.addf %86, %95 : vector<2x256xf32>
    %c0_44 = arith.constant 0 : index
    %c17 = arith.constant 17 : index
    %97 = vector.load %arg5[%c0_44, %c17] : memref<4x358xf32, #tpu.memory_space<vmem>>, vector<2x256xf32>
    %c2_45 = arith.constant 2 : index
    %c17_46 = arith.constant 17 : index
    %98 = vector.load %arg5[%c2_45, %c17_46] : memref<4x358xf32, #tpu.memory_space<vmem>>, vector<2x256xf32>
    %c8 = arith.constant 8 : index
    %99 = memref.load %arg1[%c8] : memref<98xf32, #tpu.memory_space<smem>>
    %c57 = arith.constant 57 : index
    %100 = memref.load %arg1[%c57] : memref<98xf32, #tpu.memory_space<smem>>
    %101 = vector.broadcast %99 : f32 to vector<2x256xf32>
    %102 = arith.mulf %101, %97 : vector<2x256xf32>
    %103 = vector.broadcast %100 : f32 to vector<2x256xf32>
    %104 = arith.mulf %103, %98 : vector<2x256xf32>
    %105 = arith.addf %102, %104 : vector<2x256xf32>
    %106 = arith.addf %96, %105 : vector<2x256xf32>
    %c0_47 = arith.constant 0 : index
    %c33 = arith.constant 33 : index
    %107 = vector.load %arg5[%c0_47, %c33] : memref<4x358xf32, #tpu.memory_space<vmem>>, vector<2x256xf32>
    %c2_48 = arith.constant 2 : index
    %c33_49 = arith.constant 33 : index
    %108 = vector.load %arg5[%c2_48, %c33_49] : memref<4x358xf32, #tpu.memory_space<vmem>>, vector<2x256xf32>
    %c15 = arith.constant 15 : index
    %109 = memref.load %arg1[%c15] : memref<98xf32, #tpu.memory_space<smem>>
    %c64_50 = arith.constant 64 : index
    %110 = memref.load %arg1[%c64_50] : memref<98xf32, #tpu.memory_space<smem>>
    %111 = vector.broadcast %109 : f32 to vector<2x256xf32>
    %112 = arith.mulf %111, %107 : vector<2x256xf32>
    %113 = vector.broadcast %110 : f32 to vector<2x256xf32>
    %114 = arith.mulf %113, %108 : vector<2x256xf32>
    %115 = arith.addf %112, %114 : vector<2x256xf32>
    %116 = arith.addf %106, %115 : vector<2x256xf32>
    %c0_51 = arith.constant 0 : index
    %c49_52 = arith.constant 49 : index
    %117 = vector.load %arg5[%c0_51, %c49_52] : memref<4x358xf32, #tpu.memory_space<vmem>>, vector<2x256xf32>
    %c2_53 = arith.constant 2 : index
    %c49_54 = arith.constant 49 : index
    %118 = vector.load %arg5[%c2_53, %c49_54] : memref<4x358xf32, #tpu.memory_space<vmem>>, vector<2x256xf32>
    %c22 = arith.constant 22 : index
    %119 = memref.load %arg1[%c22] : memref<98xf32, #tpu.memory_space<smem>>
    %c71 = arith.constant 71 : index
    %120 = memref.load %arg1[%c71] : memref<98xf32, #tpu.memory_space<smem>>
    %121 = vector.broadcast %119 : f32 to vector<2x256xf32>
    %122 = arith.mulf %121, %117 : vector<2x256xf32>
    %123 = vector.broadcast %120 : f32 to vector<2x256xf32>
    %124 = arith.mulf %123, %118 : vector<2x256xf32>
    %125 = arith.addf %122, %124 : vector<2x256xf32>
    %126 = arith.addf %116, %125 : vector<2x256xf32>
    %c0_55 = arith.constant 0 : index
    %c65 = arith.constant 65 : index
    %127 = vector.load %arg5[%c0_55, %c65] : memref<4x358xf32, #tpu.memory_space<vmem>>, vector<2x256xf32>
    %c2_56 = arith.constant 2 : index
    %c65_57 = arith.constant 65 : index
    %128 = vector.load %arg5[%c2_56, %c65_57] : memref<4x358xf32, #tpu.memory_space<vmem>>, vector<2x256xf32>
    %c29 = arith.constant 29 : index
    %129 = memref.load %arg1[%c29] : memref<98xf32, #tpu.memory_space<smem>>
    %c78 = arith.constant 78 : index
    %130 = memref.load %arg1[%c78] : memref<98xf32, #tpu.memory_space<smem>>
    %131 = vector.broadcast %129 : f32 to vector<2x256xf32>
    %132 = arith.mulf %131, %127 : vector<2x256xf32>
    %133 = vector.broadcast %130 : f32 to vector<2x256xf32>
    %134 = arith.mulf %133, %128 : vector<2x256xf32>
    %135 = arith.addf %132, %134 : vector<2x256xf32>
    %136 = arith.addf %126, %135 : vector<2x256xf32>
    %c0_58 = arith.constant 0 : index
    %c81 = arith.constant 81 : index
    %137 = vector.load %arg5[%c0_58, %c81] : memref<4x358xf32, #tpu.memory_space<vmem>>, vector<2x256xf32>
    %c2_59 = arith.constant 2 : index
    %c81_60 = arith.constant 81 : index
    %138 = vector.load %arg5[%c2_59, %c81_60] : memref<4x358xf32, #tpu.memory_space<vmem>>, vector<2x256xf32>
    %c36 = arith.constant 36 : index
    %139 = memref.load %arg1[%c36] : memref<98xf32, #tpu.memory_space<smem>>
    %c85 = arith.constant 85 : index
    %140 = memref.load %arg1[%c85] : memref<98xf32, #tpu.memory_space<smem>>
    %141 = vector.broadcast %139 : f32 to vector<2x256xf32>
    %142 = arith.mulf %141, %137 : vector<2x256xf32>
    %143 = vector.broadcast %140 : f32 to vector<2x256xf32>
    %144 = arith.mulf %143, %138 : vector<2x256xf32>
    %145 = arith.addf %142, %144 : vector<2x256xf32>
    %146 = arith.addf %136, %145 : vector<2x256xf32>
    %c0_61 = arith.constant 0 : index
    %c97 = arith.constant 97 : index
    %147 = vector.load %arg5[%c0_61, %c97] : memref<4x358xf32, #tpu.memory_space<vmem>>, vector<2x256xf32>
    %c2_62 = arith.constant 2 : index
    %c97_63 = arith.constant 97 : index
    %148 = vector.load %arg5[%c2_62, %c97_63] : memref<4x358xf32, #tpu.memory_space<vmem>>, vector<2x256xf32>
    %c43 = arith.constant 43 : index
    %149 = memref.load %arg1[%c43] : memref<98xf32, #tpu.memory_space<smem>>
    %c92 = arith.constant 92 : index
    %150 = memref.load %arg1[%c92] : memref<98xf32, #tpu.memory_space<smem>>
    %151 = vector.broadcast %149 : f32 to vector<2x256xf32>
    %152 = arith.mulf %151, %147 : vector<2x256xf32>
    %153 = vector.broadcast %150 : f32 to vector<2x256xf32>
    %154 = arith.mulf %153, %148 : vector<2x256xf32>
    %155 = arith.addf %152, %154 : vector<2x256xf32>
    %156 = arith.addf %146, %155 : vector<2x256xf32>
    %157 = vector.broadcast %85 : vector<1x256xf32> to vector<2x256xf32>
    %158 = arith.mulf %157, %156 : vector<2x256xf32>
    %159 = arith.addf %84, %158 : vector<2x256xf32>
    %c2_64 = arith.constant 2 : index
    %c0_65 = arith.constant 0 : index
    %160 = vector.load %arg2[%c2_64, %c0_65] : memref<8x256xf32, #tpu.memory_space<vmem>>, vector<1x256xf32>
    %cst_66 = arith.constant 0.000000e+00 : f32
    %161 = vector.broadcast %cst_66 : f32 to vector<2x256xf32>
    %c0_67 = arith.constant 0 : index
    %c2_68 = arith.constant 2 : index
    %162 = vector.load %arg5[%c0_67, %c2_68] : memref<4x358xf32, #tpu.memory_space<vmem>>, vector<2x256xf32>
    %c2_69 = arith.constant 2 : index
    %c2_70 = arith.constant 2 : index
    %163 = vector.load %arg5[%c2_69, %c2_70] : memref<4x358xf32, #tpu.memory_space<vmem>>, vector<2x256xf32>
    %c2_71 = arith.constant 2 : index
    %164 = memref.load %arg1[%c2_71] : memref<98xf32, #tpu.memory_space<smem>>
    %c51_72 = arith.constant 51 : index
    %165 = memref.load %arg1[%c51_72] : memref<98xf32, #tpu.memory_space<smem>>
    %166 = vector.broadcast %164 : f32 to vector<2x256xf32>
    %167 = arith.mulf %166, %162 : vector<2x256xf32>
    %168 = vector.broadcast %165 : f32 to vector<2x256xf32>
    %169 = arith.mulf %168, %163 : vector<2x256xf32>
    %170 = arith.addf %167, %169 : vector<2x256xf32>
    %171 = arith.addf %161, %170 : vector<2x256xf32>
    %c0_73 = arith.constant 0 : index
    %c18 = arith.constant 18 : index
    %172 = vector.load %arg5[%c0_73, %c18] : memref<4x358xf32, #tpu.memory_space<vmem>>, vector<2x256xf32>
    %c2_74 = arith.constant 2 : index
    %c18_75 = arith.constant 18 : index
    %173 = vector.load %arg5[%c2_74, %c18_75] : memref<4x358xf32, #tpu.memory_space<vmem>>, vector<2x256xf32>
    %c9 = arith.constant 9 : index
    %174 = memref.load %arg1[%c9] : memref<98xf32, #tpu.memory_space<smem>>
    %c58 = arith.constant 58 : index
    %175 = memref.load %arg1[%c58] : memref<98xf32, #tpu.memory_space<smem>>
    %176 = vector.broadcast %174 : f32 to vector<2x256xf32>
    %177 = arith.mulf %176, %172 : vector<2x256xf32>
    %178 = vector.broadcast %175 : f32 to vector<2x256xf32>
    %179 = arith.mulf %178, %173 : vector<2x256xf32>
    %180 = arith.addf %177, %179 : vector<2x256xf32>
    %181 = arith.addf %171, %180 : vector<2x256xf32>
    %c0_76 = arith.constant 0 : index
    %c34 = arith.constant 34 : index
    %182 = vector.load %arg5[%c0_76, %c34] : memref<4x358xf32, #tpu.memory_space<vmem>>, vector<2x256xf32>
    %c2_77 = arith.constant 2 : index
    %c34_78 = arith.constant 34 : index
    %183 = vector.load %arg5[%c2_77, %c34_78] : memref<4x358xf32, #tpu.memory_space<vmem>>, vector<2x256xf32>
    %c16_79 = arith.constant 16 : index
    %184 = memref.load %arg1[%c16_79] : memref<98xf32, #tpu.memory_space<smem>>
    %c65_80 = arith.constant 65 : index
    %185 = memref.load %arg1[%c65_80] : memref<98xf32, #tpu.memory_space<smem>>
    %186 = vector.broadcast %184 : f32 to vector<2x256xf32>
    %187 = arith.mulf %186, %182 : vector<2x256xf32>
    %188 = vector.broadcast %185 : f32 to vector<2x256xf32>
    %189 = arith.mulf %188, %183 : vector<2x256xf32>
    %190 = arith.addf %187, %189 : vector<2x256xf32>
    %191 = arith.addf %181, %190 : vector<2x256xf32>
    %c0_81 = arith.constant 0 : index
    %c50_82 = arith.constant 50 : index
    %192 = vector.load %arg5[%c0_81, %c50_82] : memref<4x358xf32, #tpu.memory_space<vmem>>, vector<2x256xf32>
    %c2_83 = arith.constant 2 : index
    %c50_84 = arith.constant 50 : index
    %193 = vector.load %arg5[%c2_83, %c50_84] : memref<4x358xf32, #tpu.memory_space<vmem>>, vector<2x256xf32>
    %c23 = arith.constant 23 : index
    %194 = memref.load %arg1[%c23] : memref<98xf32, #tpu.memory_space<smem>>
    %c72 = arith.constant 72 : index
    %195 = memref.load %arg1[%c72] : memref<98xf32, #tpu.memory_space<smem>>
    %196 = vector.broadcast %194 : f32 to vector<2x256xf32>
    %197 = arith.mulf %196, %192 : vector<2x256xf32>
    %198 = vector.broadcast %195 : f32 to vector<2x256xf32>
    %199 = arith.mulf %198, %193 : vector<2x256xf32>
    %200 = arith.addf %197, %199 : vector<2x256xf32>
    %201 = arith.addf %191, %200 : vector<2x256xf32>
    %c0_85 = arith.constant 0 : index
    %c66 = arith.constant 66 : index
    %202 = vector.load %arg5[%c0_85, %c66] : memref<4x358xf32, #tpu.memory_space<vmem>>, vector<2x256xf32>
    %c2_86 = arith.constant 2 : index
    %c66_87 = arith.constant 66 : index
    %203 = vector.load %arg5[%c2_86, %c66_87] : memref<4x358xf32, #tpu.memory_space<vmem>>, vector<2x256xf32>
    %c30 = arith.constant 30 : index
    %204 = memref.load %arg1[%c30] : memref<98xf32, #tpu.memory_space<smem>>
    %c79 = arith.constant 79 : index
    %205 = memref.load %arg1[%c79] : memref<98xf32, #tpu.memory_space<smem>>
    %206 = vector.broadcast %204 : f32 to vector<2x256xf32>
    %207 = arith.mulf %206, %202 : vector<2x256xf32>
    %208 = vector.broadcast %205 : f32 to vector<2x256xf32>
    %209 = arith.mulf %208, %203 : vector<2x256xf32>
    %210 = arith.addf %207, %209 : vector<2x256xf32>
    %211 = arith.addf %201, %210 : vector<2x256xf32>
    %c0_88 = arith.constant 0 : index
    %c82 = arith.constant 82 : index
    %212 = vector.load %arg5[%c0_88, %c82] : memref<4x358xf32, #tpu.memory_space<vmem>>, vector<2x256xf32>
    %c2_89 = arith.constant 2 : index
    %c82_90 = arith.constant 82 : index
    %213 = vector.load %arg5[%c2_89, %c82_90] : memref<4x358xf32, #tpu.memory_space<vmem>>, vector<2x256xf32>
    %c37 = arith.constant 37 : index
    %214 = memref.load %arg1[%c37] : memref<98xf32, #tpu.memory_space<smem>>
    %c86 = arith.constant 86 : index
    %215 = memref.load %arg1[%c86] : memref<98xf32, #tpu.memory_space<smem>>
    %216 = vector.broadcast %214 : f32 to vector<2x256xf32>
    %217 = arith.mulf %216, %212 : vector<2x256xf32>
    %218 = vector.broadcast %215 : f32 to vector<2x256xf32>
    %219 = arith.mulf %218, %213 : vector<2x256xf32>
    %220 = arith.addf %217, %219 : vector<2x256xf32>
    %221 = arith.addf %211, %220 : vector<2x256xf32>
    %c0_91 = arith.constant 0 : index
    %c98 = arith.constant 98 : index
    %222 = vector.load %arg5[%c0_91, %c98] : memref<4x358xf32, #tpu.memory_space<vmem>>, vector<2x256xf32>
    %c2_92 = arith.constant 2 : index
    %c98_93 = arith.constant 98 : index
    %223 = vector.load %arg5[%c2_92, %c98_93] : memref<4x358xf32, #tpu.memory_space<vmem>>, vector<2x256xf32>
    %c44 = arith.constant 44 : index
    %224 = memref.load %arg1[%c44] : memref<98xf32, #tpu.memory_space<smem>>
    %c93 = arith.constant 93 : index
    %225 = memref.load %arg1[%c93] : memref<98xf32, #tpu.memory_space<smem>>
    %226 = vector.broadcast %224 : f32 to vector<2x256xf32>
    %227 = arith.mulf %226, %222 : vector<2x256xf32>
    %228 = vector.broadcast %225 : f32 to vector<2x256xf32>
    %229 = arith.mulf %228, %223 : vector<2x256xf32>
    %230 = arith.addf %227, %229 : vector<2x256xf32>
    %231 = arith.addf %221, %230 : vector<2x256xf32>
    %232 = vector.broadcast %160 : vector<1x256xf32> to vector<2x256xf32>
    %233 = arith.mulf %232, %231 : vector<2x256xf32>
    %234 = arith.addf %159, %233 : vector<2x256xf32>
    %c3 = arith.constant 3 : index
    %c0_94 = arith.constant 0 : index
    %235 = vector.load %arg2[%c3, %c0_94] : memref<8x256xf32, #tpu.memory_space<vmem>>, vector<1x256xf32>
    %cst_95 = arith.constant 0.000000e+00 : f32
    %236 = vector.broadcast %cst_95 : f32 to vector<2x256xf32>
    %c0_96 = arith.constant 0 : index
    %c3_97 = arith.constant 3 : index
    %237 = vector.load %arg5[%c0_96, %c3_97] : memref<4x358xf32, #tpu.memory_space<vmem>>, vector<2x256xf32>
    %c2_98 = arith.constant 2 : index
    %c3_99 = arith.constant 3 : index
    %238 = vector.load %arg5[%c2_98, %c3_99] : memref<4x358xf32, #tpu.memory_space<vmem>>, vector<2x256xf32>
    %c3_100 = arith.constant 3 : index
    %239 = memref.load %arg1[%c3_100] : memref<98xf32, #tpu.memory_space<smem>>
    %c52 = arith.constant 52 : index
    %240 = memref.load %arg1[%c52] : memref<98xf32, #tpu.memory_space<smem>>
    %241 = vector.broadcast %239 : f32 to vector<2x256xf32>
    %242 = arith.mulf %241, %237 : vector<2x256xf32>
    %243 = vector.broadcast %240 : f32 to vector<2x256xf32>
    %244 = arith.mulf %243, %238 : vector<2x256xf32>
    %245 = arith.addf %242, %244 : vector<2x256xf32>
    %246 = arith.addf %236, %245 : vector<2x256xf32>
    %c0_101 = arith.constant 0 : index
    %c19 = arith.constant 19 : index
    %247 = vector.load %arg5[%c0_101, %c19] : memref<4x358xf32, #tpu.memory_space<vmem>>, vector<2x256xf32>
    %c2_102 = arith.constant 2 : index
    %c19_103 = arith.constant 19 : index
    %248 = vector.load %arg5[%c2_102, %c19_103] : memref<4x358xf32, #tpu.memory_space<vmem>>, vector<2x256xf32>
    %c10 = arith.constant 10 : index
    %249 = memref.load %arg1[%c10] : memref<98xf32, #tpu.memory_space<smem>>
    %c59 = arith.constant 59 : index
    %250 = memref.load %arg1[%c59] : memref<98xf32, #tpu.memory_space<smem>>
    %251 = vector.broadcast %249 : f32 to vector<2x256xf32>
    %252 = arith.mulf %251, %247 : vector<2x256xf32>
    %253 = vector.broadcast %250 : f32 to vector<2x256xf32>
    %254 = arith.mulf %253, %248 : vector<2x256xf32>
    %255 = arith.addf %252, %254 : vector<2x256xf32>
    %256 = arith.addf %246, %255 : vector<2x256xf32>
    %c0_104 = arith.constant 0 : index
    %c35_105 = arith.constant 35 : index
    %257 = vector.load %arg5[%c0_104, %c35_105] : memref<4x358xf32, #tpu.memory_space<vmem>>, vector<2x256xf32>
    %c2_106 = arith.constant 2 : index
    %c35_107 = arith.constant 35 : index
    %258 = vector.load %arg5[%c2_106, %c35_107] : memref<4x358xf32, #tpu.memory_space<vmem>>, vector<2x256xf32>
    %c17_108 = arith.constant 17 : index
    %259 = memref.load %arg1[%c17_108] : memref<98xf32, #tpu.memory_space<smem>>
    %c66_109 = arith.constant 66 : index
    %260 = memref.load %arg1[%c66_109] : memref<98xf32, #tpu.memory_space<smem>>
    %261 = vector.broadcast %259 : f32 to vector<2x256xf32>
    %262 = arith.mulf %261, %257 : vector<2x256xf32>
    %263 = vector.broadcast %260 : f32 to vector<2x256xf32>
    %264 = arith.mulf %263, %258 : vector<2x256xf32>
    %265 = arith.addf %262, %264 : vector<2x256xf32>
    %266 = arith.addf %256, %265 : vector<2x256xf32>
    %c0_110 = arith.constant 0 : index
    %c51_111 = arith.constant 51 : index
    %267 = vector.load %arg5[%c0_110, %c51_111] : memref<4x358xf32, #tpu.memory_space<vmem>>, vector<2x256xf32>
    %c2_112 = arith.constant 2 : index
    %c51_113 = arith.constant 51 : index
    %268 = vector.load %arg5[%c2_112, %c51_113] : memref<4x358xf32, #tpu.memory_space<vmem>>, vector<2x256xf32>
    %c24 = arith.constant 24 : index
    %269 = memref.load %arg1[%c24] : memref<98xf32, #tpu.memory_space<smem>>
    %c73 = arith.constant 73 : index
    %270 = memref.load %arg1[%c73] : memref<98xf32, #tpu.memory_space<smem>>
    %271 = vector.broadcast %269 : f32 to vector<2x256xf32>
    %272 = arith.mulf %271, %267 : vector<2x256xf32>
    %273 = vector.broadcast %270 : f32 to vector<2x256xf32>
    %274 = arith.mulf %273, %268 : vector<2x256xf32>
    %275 = arith.addf %272, %274 : vector<2x256xf32>
    %276 = arith.addf %266, %275 : vector<2x256xf32>
    %c0_114 = arith.constant 0 : index
    %c67 = arith.constant 67 : index
    %277 = vector.load %arg5[%c0_114, %c67] : memref<4x358xf32, #tpu.memory_space<vmem>>, vector<2x256xf32>
    %c2_115 = arith.constant 2 : index
    %c67_116 = arith.constant 67 : index
    %278 = vector.load %arg5[%c2_115, %c67_116] : memref<4x358xf32, #tpu.memory_space<vmem>>, vector<2x256xf32>
    %c31 = arith.constant 31 : index
    %279 = memref.load %arg1[%c31] : memref<98xf32, #tpu.memory_space<smem>>
    %c80_117 = arith.constant 80 : index
    %280 = memref.load %arg1[%c80_117] : memref<98xf32, #tpu.memory_space<smem>>
    %281 = vector.broadcast %279 : f32 to vector<2x256xf32>
    %282 = arith.mulf %281, %277 : vector<2x256xf32>
    %283 = vector.broadcast %280 : f32 to vector<2x256xf32>
    %284 = arith.mulf %283, %278 : vector<2x256xf32>
    %285 = arith.addf %282, %284 : vector<2x256xf32>
    %286 = arith.addf %276, %285 : vector<2x256xf32>
    %c0_118 = arith.constant 0 : index
    %c83 = arith.constant 83 : index
    %287 = vector.load %arg5[%c0_118, %c83] : memref<4x358xf32, #tpu.memory_space<vmem>>, vector<2x256xf32>
    %c2_119 = arith.constant 2 : index
    %c83_120 = arith.constant 83 : index
    %288 = vector.load %arg5[%c2_119, %c83_120] : memref<4x358xf32, #tpu.memory_space<vmem>>, vector<2x256xf32>
    %c38 = arith.constant 38 : index
    %289 = memref.load %arg1[%c38] : memref<98xf32, #tpu.memory_space<smem>>
    %c87 = arith.constant 87 : index
    %290 = memref.load %arg1[%c87] : memref<98xf32, #tpu.memory_space<smem>>
    %291 = vector.broadcast %289 : f32 to vector<2x256xf32>
    %292 = arith.mulf %291, %287 : vector<2x256xf32>
    %293 = vector.broadcast %290 : f32 to vector<2x256xf32>
    %294 = arith.mulf %293, %288 : vector<2x256xf32>
    %295 = arith.addf %292, %294 : vector<2x256xf32>
    %296 = arith.addf %286, %295 : vector<2x256xf32>
    %c0_121 = arith.constant 0 : index
    %c99 = arith.constant 99 : index
    %297 = vector.load %arg5[%c0_121, %c99] : memref<4x358xf32, #tpu.memory_space<vmem>>, vector<2x256xf32>
    %c2_122 = arith.constant 2 : index
    %c99_123 = arith.constant 99 : index
    %298 = vector.load %arg5[%c2_122, %c99_123] : memref<4x358xf32, #tpu.memory_space<vmem>>, vector<2x256xf32>
    %c45 = arith.constant 45 : index
    %299 = memref.load %arg1[%c45] : memref<98xf32, #tpu.memory_space<smem>>
    %c94 = arith.constant 94 : index
    %300 = memref.load %arg1[%c94] : memref<98xf32, #tpu.memory_space<smem>>
    %301 = vector.broadcast %299 : f32 to vector<2x256xf32>
    %302 = arith.mulf %301, %297 : vector<2x256xf32>
    %303 = vector.broadcast %300 : f32 to vector<2x256xf32>
    %304 = arith.mulf %303, %298 : vector<2x256xf32>
    %305 = arith.addf %302, %304 : vector<2x256xf32>
    %306 = arith.addf %296, %305 : vector<2x256xf32>
    %307 = vector.broadcast %235 : vector<1x256xf32> to vector<2x256xf32>
    %308 = arith.mulf %307, %306 : vector<2x256xf32>
    %309 = arith.addf %234, %308 : vector<2x256xf32>
    %c4 = arith.constant 4 : index
    %c0_124 = arith.constant 0 : index
    %310 = vector.load %arg2[%c4, %c0_124] : memref<8x256xf32, #tpu.memory_space<vmem>>, vector<1x256xf32>
    %cst_125 = arith.constant 0.000000e+00 : f32
    %311 = vector.broadcast %cst_125 : f32 to vector<2x256xf32>
    %c0_126 = arith.constant 0 : index
    %c4_127 = arith.constant 4 : index
    %312 = vector.load %arg5[%c0_126, %c4_127] : memref<4x358xf32, #tpu.memory_space<vmem>>, vector<2x256xf32>
    %c2_128 = arith.constant 2 : index
    %c4_129 = arith.constant 4 : index
    %313 = vector.load %arg5[%c2_128, %c4_129] : memref<4x358xf32, #tpu.memory_space<vmem>>, vector<2x256xf32>
    %c4_130 = arith.constant 4 : index
    %314 = memref.load %arg1[%c4_130] : memref<98xf32, #tpu.memory_space<smem>>
    %c53 = arith.constant 53 : index
    %315 = memref.load %arg1[%c53] : memref<98xf32, #tpu.memory_space<smem>>
    %316 = vector.broadcast %314 : f32 to vector<2x256xf32>
    %317 = arith.mulf %316, %312 : vector<2x256xf32>
    %318 = vector.broadcast %315 : f32 to vector<2x256xf32>
    %319 = arith.mulf %318, %313 : vector<2x256xf32>
    %320 = arith.addf %317, %319 : vector<2x256xf32>
    %321 = arith.addf %311, %320 : vector<2x256xf32>
    %c0_131 = arith.constant 0 : index
    %c20 = arith.constant 20 : index
    %322 = vector.load %arg5[%c0_131, %c20] : memref<4x358xf32, #tpu.memory_space<vmem>>, vector<2x256xf32>
    %c2_132 = arith.constant 2 : index
    %c20_133 = arith.constant 20 : index
    %323 = vector.load %arg5[%c2_132, %c20_133] : memref<4x358xf32, #tpu.memory_space<vmem>>, vector<2x256xf32>
    %c11 = arith.constant 11 : index
    %324 = memref.load %arg1[%c11] : memref<98xf32, #tpu.memory_space<smem>>
    %c60 = arith.constant 60 : index
    %325 = memref.load %arg1[%c60] : memref<98xf32, #tpu.memory_space<smem>>
    %326 = vector.broadcast %324 : f32 to vector<2x256xf32>
    %327 = arith.mulf %326, %322 : vector<2x256xf32>
    %328 = vector.broadcast %325 : f32 to vector<2x256xf32>
    %329 = arith.mulf %328, %323 : vector<2x256xf32>
    %330 = arith.addf %327, %329 : vector<2x256xf32>
    %331 = arith.addf %321, %330 : vector<2x256xf32>
    %c0_134 = arith.constant 0 : index
    %c36_135 = arith.constant 36 : index
    %332 = vector.load %arg5[%c0_134, %c36_135] : memref<4x358xf32, #tpu.memory_space<vmem>>, vector<2x256xf32>
    %c2_136 = arith.constant 2 : index
    %c36_137 = arith.constant 36 : index
    %333 = vector.load %arg5[%c2_136, %c36_137] : memref<4x358xf32, #tpu.memory_space<vmem>>, vector<2x256xf32>
    %c18_138 = arith.constant 18 : index
    %334 = memref.load %arg1[%c18_138] : memref<98xf32, #tpu.memory_space<smem>>
    %c67_139 = arith.constant 67 : index
    %335 = memref.load %arg1[%c67_139] : memref<98xf32, #tpu.memory_space<smem>>
    %336 = vector.broadcast %334 : f32 to vector<2x256xf32>
    %337 = arith.mulf %336, %332 : vector<2x256xf32>
    %338 = vector.broadcast %335 : f32 to vector<2x256xf32>
    %339 = arith.mulf %338, %333 : vector<2x256xf32>
    %340 = arith.addf %337, %339 : vector<2x256xf32>
    %341 = arith.addf %331, %340 : vector<2x256xf32>
    %c0_140 = arith.constant 0 : index
    %c52_141 = arith.constant 52 : index
    %342 = vector.load %arg5[%c0_140, %c52_141] : memref<4x358xf32, #tpu.memory_space<vmem>>, vector<2x256xf32>
    %c2_142 = arith.constant 2 : index
    %c52_143 = arith.constant 52 : index
    %343 = vector.load %arg5[%c2_142, %c52_143] : memref<4x358xf32, #tpu.memory_space<vmem>>, vector<2x256xf32>
    %c25 = arith.constant 25 : index
    %344 = memref.load %arg1[%c25] : memref<98xf32, #tpu.memory_space<smem>>
    %c74 = arith.constant 74 : index
    %345 = memref.load %arg1[%c74] : memref<98xf32, #tpu.memory_space<smem>>
    %346 = vector.broadcast %344 : f32 to vector<2x256xf32>
    %347 = arith.mulf %346, %342 : vector<2x256xf32>
    %348 = vector.broadcast %345 : f32 to vector<2x256xf32>
    %349 = arith.mulf %348, %343 : vector<2x256xf32>
    %350 = arith.addf %347, %349 : vector<2x256xf32>
    %351 = arith.addf %341, %350 : vector<2x256xf32>
    %c0_144 = arith.constant 0 : index
    %c68 = arith.constant 68 : index
    %352 = vector.load %arg5[%c0_144, %c68] : memref<4x358xf32, #tpu.memory_space<vmem>>, vector<2x256xf32>
    %c2_145 = arith.constant 2 : index
    %c68_146 = arith.constant 68 : index
    %353 = vector.load %arg5[%c2_145, %c68_146] : memref<4x358xf32, #tpu.memory_space<vmem>>, vector<2x256xf32>
    %c32_147 = arith.constant 32 : index
    %354 = memref.load %arg1[%c32_147] : memref<98xf32, #tpu.memory_space<smem>>
    %c81_148 = arith.constant 81 : index
    %355 = memref.load %arg1[%c81_148] : memref<98xf32, #tpu.memory_space<smem>>
    %356 = vector.broadcast %354 : f32 to vector<2x256xf32>
    %357 = arith.mulf %356, %352 : vector<2x256xf32>
    %358 = vector.broadcast %355 : f32 to vector<2x256xf32>
    %359 = arith.mulf %358, %353 : vector<2x256xf32>
    %360 = arith.addf %357, %359 : vector<2x256xf32>
    %361 = arith.addf %351, %360 : vector<2x256xf32>
    %c0_149 = arith.constant 0 : index
    %c84_150 = arith.constant 84 : index
    %362 = vector.load %arg5[%c0_149, %c84_150] : memref<4x358xf32, #tpu.memory_space<vmem>>, vector<2x256xf32>
    %c2_151 = arith.constant 2 : index
    %c84_152 = arith.constant 84 : index
    %363 = vector.load %arg5[%c2_151, %c84_152] : memref<4x358xf32, #tpu.memory_space<vmem>>, vector<2x256xf32>
    %c39 = arith.constant 39 : index
    %364 = memref.load %arg1[%c39] : memref<98xf32, #tpu.memory_space<smem>>
    %c88 = arith.constant 88 : index
    %365 = memref.load %arg1[%c88] : memref<98xf32, #tpu.memory_space<smem>>
    %366 = vector.broadcast %364 : f32 to vector<2x256xf32>
    %367 = arith.mulf %366, %362 : vector<2x256xf32>
    %368 = vector.broadcast %365 : f32 to vector<2x256xf32>
    %369 = arith.mulf %368, %363 : vector<2x256xf32>
    %370 = arith.addf %367, %369 : vector<2x256xf32>
    %371 = arith.addf %361, %370 : vector<2x256xf32>
    %c0_153 = arith.constant 0 : index
    %c100 = arith.constant 100 : index
    %372 = vector.load %arg5[%c0_153, %c100] : memref<4x358xf32, #tpu.memory_space<vmem>>, vector<2x256xf32>
    %c2_154 = arith.constant 2 : index
    %c100_155 = arith.constant 100 : index
    %373 = vector.load %arg5[%c2_154, %c100_155] : memref<4x358xf32, #tpu.memory_space<vmem>>, vector<2x256xf32>
    %c46 = arith.constant 46 : index
    %374 = memref.load %arg1[%c46] : memref<98xf32, #tpu.memory_space<smem>>
    %c95 = arith.constant 95 : index
    %375 = memref.load %arg1[%c95] : memref<98xf32, #tpu.memory_space<smem>>
    %376 = vector.broadcast %374 : f32 to vector<2x256xf32>
    %377 = arith.mulf %376, %372 : vector<2x256xf32>
    %378 = vector.broadcast %375 : f32 to vector<2x256xf32>
    %379 = arith.mulf %378, %373 : vector<2x256xf32>
    %380 = arith.addf %377, %379 : vector<2x256xf32>
    %381 = arith.addf %371, %380 : vector<2x256xf32>
    %382 = vector.broadcast %310 : vector<1x256xf32> to vector<2x256xf32>
    %383 = arith.mulf %382, %381 : vector<2x256xf32>
    %384 = arith.addf %309, %383 : vector<2x256xf32>
    %c5 = arith.constant 5 : index
    %c0_156 = arith.constant 0 : index
    %385 = vector.load %arg2[%c5, %c0_156] : memref<8x256xf32, #tpu.memory_space<vmem>>, vector<1x256xf32>
    %cst_157 = arith.constant 0.000000e+00 : f32
    %386 = vector.broadcast %cst_157 : f32 to vector<2x256xf32>
    %c0_158 = arith.constant 0 : index
    %c5_159 = arith.constant 5 : index
    %387 = vector.load %arg5[%c0_158, %c5_159] : memref<4x358xf32, #tpu.memory_space<vmem>>, vector<2x256xf32>
    %c2_160 = arith.constant 2 : index
    %c5_161 = arith.constant 5 : index
    %388 = vector.load %arg5[%c2_160, %c5_161] : memref<4x358xf32, #tpu.memory_space<vmem>>, vector<2x256xf32>
    %c5_162 = arith.constant 5 : index
    %389 = memref.load %arg1[%c5_162] : memref<98xf32, #tpu.memory_space<smem>>
    %c54 = arith.constant 54 : index
    %390 = memref.load %arg1[%c54] : memref<98xf32, #tpu.memory_space<smem>>
    %391 = vector.broadcast %389 : f32 to vector<2x256xf32>
    %392 = arith.mulf %391, %387 : vector<2x256xf32>
    %393 = vector.broadcast %390 : f32 to vector<2x256xf32>
    %394 = arith.mulf %393, %388 : vector<2x256xf32>
    %395 = arith.addf %392, %394 : vector<2x256xf32>
    %396 = arith.addf %386, %395 : vector<2x256xf32>
    %c0_163 = arith.constant 0 : index
    %c21_164 = arith.constant 21 : index
    %397 = vector.load %arg5[%c0_163, %c21_164] : memref<4x358xf32, #tpu.memory_space<vmem>>, vector<2x256xf32>
    %c2_165 = arith.constant 2 : index
    %c21_166 = arith.constant 21 : index
    %398 = vector.load %arg5[%c2_165, %c21_166] : memref<4x358xf32, #tpu.memory_space<vmem>>, vector<2x256xf32>
    %c12 = arith.constant 12 : index
    %399 = memref.load %arg1[%c12] : memref<98xf32, #tpu.memory_space<smem>>
    %c61 = arith.constant 61 : index
    %400 = memref.load %arg1[%c61] : memref<98xf32, #tpu.memory_space<smem>>
    %401 = vector.broadcast %399 : f32 to vector<2x256xf32>
    %402 = arith.mulf %401, %397 : vector<2x256xf32>
    %403 = vector.broadcast %400 : f32 to vector<2x256xf32>
    %404 = arith.mulf %403, %398 : vector<2x256xf32>
    %405 = arith.addf %402, %404 : vector<2x256xf32>
    %406 = arith.addf %396, %405 : vector<2x256xf32>
    %c0_167 = arith.constant 0 : index
    %c37_168 = arith.constant 37 : index
    %407 = vector.load %arg5[%c0_167, %c37_168] : memref<4x358xf32, #tpu.memory_space<vmem>>, vector<2x256xf32>
    %c2_169 = arith.constant 2 : index
    %c37_170 = arith.constant 37 : index
    %408 = vector.load %arg5[%c2_169, %c37_170] : memref<4x358xf32, #tpu.memory_space<vmem>>, vector<2x256xf32>
    %c19_171 = arith.constant 19 : index
    %409 = memref.load %arg1[%c19_171] : memref<98xf32, #tpu.memory_space<smem>>
    %c68_172 = arith.constant 68 : index
    %410 = memref.load %arg1[%c68_172] : memref<98xf32, #tpu.memory_space<smem>>
    %411 = vector.broadcast %409 : f32 to vector<2x256xf32>
    %412 = arith.mulf %411, %407 : vector<2x256xf32>
    %413 = vector.broadcast %410 : f32 to vector<2x256xf32>
    %414 = arith.mulf %413, %408 : vector<2x256xf32>
    %415 = arith.addf %412, %414 : vector<2x256xf32>
    %416 = arith.addf %406, %415 : vector<2x256xf32>
    %c0_173 = arith.constant 0 : index
    %c53_174 = arith.constant 53 : index
    %417 = vector.load %arg5[%c0_173, %c53_174] : memref<4x358xf32, #tpu.memory_space<vmem>>, vector<2x256xf32>
    %c2_175 = arith.constant 2 : index
    %c53_176 = arith.constant 53 : index
    %418 = vector.load %arg5[%c2_175, %c53_176] : memref<4x358xf32, #tpu.memory_space<vmem>>, vector<2x256xf32>
    %c26 = arith.constant 26 : index
    %419 = memref.load %arg1[%c26] : memref<98xf32, #tpu.memory_space<smem>>
    %c75 = arith.constant 75 : index
    %420 = memref.load %arg1[%c75] : memref<98xf32, #tpu.memory_space<smem>>
    %421 = vector.broadcast %419 : f32 to vector<2x256xf32>
    %422 = arith.mulf %421, %417 : vector<2x256xf32>
    %423 = vector.broadcast %420 : f32 to vector<2x256xf32>
    %424 = arith.mulf %423, %418 : vector<2x256xf32>
    %425 = arith.addf %422, %424 : vector<2x256xf32>
    %426 = arith.addf %416, %425 : vector<2x256xf32>
    %c0_177 = arith.constant 0 : index
    %c69 = arith.constant 69 : index
    %427 = vector.load %arg5[%c0_177, %c69] : memref<4x358xf32, #tpu.memory_space<vmem>>, vector<2x256xf32>
    %c2_178 = arith.constant 2 : index
    %c69_179 = arith.constant 69 : index
    %428 = vector.load %arg5[%c2_178, %c69_179] : memref<4x358xf32, #tpu.memory_space<vmem>>, vector<2x256xf32>
    %c33_180 = arith.constant 33 : index
    %429 = memref.load %arg1[%c33_180] : memref<98xf32, #tpu.memory_space<smem>>
    %c82_181 = arith.constant 82 : index
    %430 = memref.load %arg1[%c82_181] : memref<98xf32, #tpu.memory_space<smem>>
    %431 = vector.broadcast %429 : f32 to vector<2x256xf32>
    %432 = arith.mulf %431, %427 : vector<2x256xf32>
    %433 = vector.broadcast %430 : f32 to vector<2x256xf32>
    %434 = arith.mulf %433, %428 : vector<2x256xf32>
    %435 = arith.addf %432, %434 : vector<2x256xf32>
    %436 = arith.addf %426, %435 : vector<2x256xf32>
    %c0_182 = arith.constant 0 : index
    %c85_183 = arith.constant 85 : index
    %437 = vector.load %arg5[%c0_182, %c85_183] : memref<4x358xf32, #tpu.memory_space<vmem>>, vector<2x256xf32>
    %c2_184 = arith.constant 2 : index
    %c85_185 = arith.constant 85 : index
    %438 = vector.load %arg5[%c2_184, %c85_185] : memref<4x358xf32, #tpu.memory_space<vmem>>, vector<2x256xf32>
    %c40 = arith.constant 40 : index
    %439 = memref.load %arg1[%c40] : memref<98xf32, #tpu.memory_space<smem>>
    %c89 = arith.constant 89 : index
    %440 = memref.load %arg1[%c89] : memref<98xf32, #tpu.memory_space<smem>>
    %441 = vector.broadcast %439 : f32 to vector<2x256xf32>
    %442 = arith.mulf %441, %437 : vector<2x256xf32>
    %443 = vector.broadcast %440 : f32 to vector<2x256xf32>
    %444 = arith.mulf %443, %438 : vector<2x256xf32>
    %445 = arith.addf %442, %444 : vector<2x256xf32>
    %446 = arith.addf %436, %445 : vector<2x256xf32>
    %c0_186 = arith.constant 0 : index
    %c101 = arith.constant 101 : index
    %447 = vector.load %arg5[%c0_186, %c101] : memref<4x358xf32, #tpu.memory_space<vmem>>, vector<2x256xf32>
    %c2_187 = arith.constant 2 : index
    %c101_188 = arith.constant 101 : index
    %448 = vector.load %arg5[%c2_187, %c101_188] : memref<4x358xf32, #tpu.memory_space<vmem>>, vector<2x256xf32>
    %c47 = arith.constant 47 : index
    %449 = memref.load %arg1[%c47] : memref<98xf32, #tpu.memory_space<smem>>
    %c96_189 = arith.constant 96 : index
    %450 = memref.load %arg1[%c96_189] : memref<98xf32, #tpu.memory_space<smem>>
    %451 = vector.broadcast %449 : f32 to vector<2x256xf32>
    %452 = arith.mulf %451, %447 : vector<2x256xf32>
    %453 = vector.broadcast %450 : f32 to vector<2x256xf32>
    %454 = arith.mulf %453, %448 : vector<2x256xf32>
    %455 = arith.addf %452, %454 : vector<2x256xf32>
    %456 = arith.addf %446, %455 : vector<2x256xf32>
    %457 = vector.broadcast %385 : vector<1x256xf32> to vector<2x256xf32>
    %458 = arith.mulf %457, %456 : vector<2x256xf32>
    %459 = arith.addf %384, %458 : vector<2x256xf32>
    %c6 = arith.constant 6 : index
    %c0_190 = arith.constant 0 : index
    %460 = vector.load %arg2[%c6, %c0_190] : memref<8x256xf32, #tpu.memory_space<vmem>>, vector<1x256xf32>
    %cst_191 = arith.constant 0.000000e+00 : f32
    %461 = vector.broadcast %cst_191 : f32 to vector<2x256xf32>
    %c0_192 = arith.constant 0 : index
    %c6_193 = arith.constant 6 : index
    %462 = vector.load %arg5[%c0_192, %c6_193] : memref<4x358xf32, #tpu.memory_space<vmem>>, vector<2x256xf32>
    %c2_194 = arith.constant 2 : index
    %c6_195 = arith.constant 6 : index
    %463 = vector.load %arg5[%c2_194, %c6_195] : memref<4x358xf32, #tpu.memory_space<vmem>>, vector<2x256xf32>
    %c6_196 = arith.constant 6 : index
    %464 = memref.load %arg1[%c6_196] : memref<98xf32, #tpu.memory_space<smem>>
    %c55 = arith.constant 55 : index
    %465 = memref.load %arg1[%c55] : memref<98xf32, #tpu.memory_space<smem>>
    %466 = vector.broadcast %464 : f32 to vector<2x256xf32>
    %467 = arith.mulf %466, %462 : vector<2x256xf32>
    %468 = vector.broadcast %465 : f32 to vector<2x256xf32>
    %469 = arith.mulf %468, %463 : vector<2x256xf32>
    %470 = arith.addf %467, %469 : vector<2x256xf32>
    %471 = arith.addf %461, %470 : vector<2x256xf32>
    %c0_197 = arith.constant 0 : index
    %c22_198 = arith.constant 22 : index
    %472 = vector.load %arg5[%c0_197, %c22_198] : memref<4x358xf32, #tpu.memory_space<vmem>>, vector<2x256xf32>
    %c2_199 = arith.constant 2 : index
    %c22_200 = arith.constant 22 : index
    %473 = vector.load %arg5[%c2_199, %c22_200] : memref<4x358xf32, #tpu.memory_space<vmem>>, vector<2x256xf32>
    %c13 = arith.constant 13 : index
    %474 = memref.load %arg1[%c13] : memref<98xf32, #tpu.memory_space<smem>>
    %c62 = arith.constant 62 : index
    %475 = memref.load %arg1[%c62] : memref<98xf32, #tpu.memory_space<smem>>
    %476 = vector.broadcast %474 : f32 to vector<2x256xf32>
    %477 = arith.mulf %476, %472 : vector<2x256xf32>
    %478 = vector.broadcast %475 : f32 to vector<2x256xf32>
    %479 = arith.mulf %478, %473 : vector<2x256xf32>
    %480 = arith.addf %477, %479 : vector<2x256xf32>
    %481 = arith.addf %471, %480 : vector<2x256xf32>
    %c0_201 = arith.constant 0 : index
    %c38_202 = arith.constant 38 : index
    %482 = vector.load %arg5[%c0_201, %c38_202] : memref<4x358xf32, #tpu.memory_space<vmem>>, vector<2x256xf32>
    %c2_203 = arith.constant 2 : index
    %c38_204 = arith.constant 38 : index
    %483 = vector.load %arg5[%c2_203, %c38_204] : memref<4x358xf32, #tpu.memory_space<vmem>>, vector<2x256xf32>
    %c20_205 = arith.constant 20 : index
    %484 = memref.load %arg1[%c20_205] : memref<98xf32, #tpu.memory_space<smem>>
    %c69_206 = arith.constant 69 : index
    %485 = memref.load %arg1[%c69_206] : memref<98xf32, #tpu.memory_space<smem>>
    %486 = vector.broadcast %484 : f32 to vector<2x256xf32>
    %487 = arith.mulf %486, %482 : vector<2x256xf32>
    %488 = vector.broadcast %485 : f32 to vector<2x256xf32>
    %489 = arith.mulf %488, %483 : vector<2x256xf32>
    %490 = arith.addf %487, %489 : vector<2x256xf32>
    %491 = arith.addf %481, %490 : vector<2x256xf32>
    %c0_207 = arith.constant 0 : index
    %c54_208 = arith.constant 54 : index
    %492 = vector.load %arg5[%c0_207, %c54_208] : memref<4x358xf32, #tpu.memory_space<vmem>>, vector<2x256xf32>
    %c2_209 = arith.constant 2 : index
    %c54_210 = arith.constant 54 : index
    %493 = vector.load %arg5[%c2_209, %c54_210] : memref<4x358xf32, #tpu.memory_space<vmem>>, vector<2x256xf32>
    %c27 = arith.constant 27 : index
    %494 = memref.load %arg1[%c27] : memref<98xf32, #tpu.memory_space<smem>>
    %c76 = arith.constant 76 : index
    %495 = memref.load %arg1[%c76] : memref<98xf32, #tpu.memory_space<smem>>
    %496 = vector.broadcast %494 : f32 to vector<2x256xf32>
    %497 = arith.mulf %496, %492 : vector<2x256xf32>
    %498 = vector.broadcast %495 : f32 to vector<2x256xf32>
    %499 = arith.mulf %498, %493 : vector<2x256xf32>
    %500 = arith.addf %497, %499 : vector<2x256xf32>
    %501 = arith.addf %491, %500 : vector<2x256xf32>
    %c0_211 = arith.constant 0 : index
    %c70_212 = arith.constant 70 : index
    %502 = vector.load %arg5[%c0_211, %c70_212] : memref<4x358xf32, #tpu.memory_space<vmem>>, vector<2x256xf32>
    %c2_213 = arith.constant 2 : index
    %c70_214 = arith.constant 70 : index
    %503 = vector.load %arg5[%c2_213, %c70_214] : memref<4x358xf32, #tpu.memory_space<vmem>>, vector<2x256xf32>
    %c34_215 = arith.constant 34 : index
    %504 = memref.load %arg1[%c34_215] : memref<98xf32, #tpu.memory_space<smem>>
    %c83_216 = arith.constant 83 : index
    %505 = memref.load %arg1[%c83_216] : memref<98xf32, #tpu.memory_space<smem>>
    %506 = vector.broadcast %504 : f32 to vector<2x256xf32>
    %507 = arith.mulf %506, %502 : vector<2x256xf32>
    %508 = vector.broadcast %505 : f32 to vector<2x256xf32>
    %509 = arith.mulf %508, %503 : vector<2x256xf32>
    %510 = arith.addf %507, %509 : vector<2x256xf32>
    %511 = arith.addf %501, %510 : vector<2x256xf32>
    %c0_217 = arith.constant 0 : index
    %c86_218 = arith.constant 86 : index
    %512 = vector.load %arg5[%c0_217, %c86_218] : memref<4x358xf32, #tpu.memory_space<vmem>>, vector<2x256xf32>
    %c2_219 = arith.constant 2 : index
    %c86_220 = arith.constant 86 : index
    %513 = vector.load %arg5[%c2_219, %c86_220] : memref<4x358xf32, #tpu.memory_space<vmem>>, vector<2x256xf32>
    %c41 = arith.constant 41 : index
    %514 = memref.load %arg1[%c41] : memref<98xf32, #tpu.memory_space<smem>>
    %c90 = arith.constant 90 : index
    %515 = memref.load %arg1[%c90] : memref<98xf32, #tpu.memory_space<smem>>
    %516 = vector.broadcast %514 : f32 to vector<2x256xf32>
    %517 = arith.mulf %516, %512 : vector<2x256xf32>
    %518 = vector.broadcast %515 : f32 to vector<2x256xf32>
    %519 = arith.mulf %518, %513 : vector<2x256xf32>
    %520 = arith.addf %517, %519 : vector<2x256xf32>
    %521 = arith.addf %511, %520 : vector<2x256xf32>
    %c0_221 = arith.constant 0 : index
    %c102 = arith.constant 102 : index
    %522 = vector.load %arg5[%c0_221, %c102] : memref<4x358xf32, #tpu.memory_space<vmem>>, vector<2x256xf32>
    %c2_222 = arith.constant 2 : index
    %c102_223 = arith.constant 102 : index
    %523 = vector.load %arg5[%c2_222, %c102_223] : memref<4x358xf32, #tpu.memory_space<vmem>>, vector<2x256xf32>
    %c48_224 = arith.constant 48 : index
    %524 = memref.load %arg1[%c48_224] : memref<98xf32, #tpu.memory_space<smem>>
    %c97_225 = arith.constant 97 : index
    %525 = memref.load %arg1[%c97_225] : memref<98xf32, #tpu.memory_space<smem>>
    %526 = vector.broadcast %524 : f32 to vector<2x256xf32>
    %527 = arith.mulf %526, %522 : vector<2x256xf32>
    %528 = vector.broadcast %525 : f32 to vector<2x256xf32>
    %529 = arith.mulf %528, %523 : vector<2x256xf32>
    %530 = arith.addf %527, %529 : vector<2x256xf32>
    %531 = arith.addf %521, %530 : vector<2x256xf32>
    %532 = vector.broadcast %460 : vector<1x256xf32> to vector<2x256xf32>
    %533 = arith.mulf %532, %531 : vector<2x256xf32>
    %534 = arith.addf %459, %533 : vector<2x256xf32>
    %535 = arith.negf %534 : vector<2x256xf32>
    %536 = math.exp %535 : vector<2x256xf32>
    %cst_226 = arith.constant 1.000000e+00 : f32
    %537 = vector.broadcast %cst_226 : f32 to vector<2x256xf32>
    %538 = arith.addf %537, %536 : vector<2x256xf32>
    %539 = arith.divf %537, %538 : vector<2x256xf32>
    %540 = vector.shape_cast %539 : vector<2x256xf32> to vector<2x1x256xf32>
    %541 = vector.broadcast %540 : vector<2x1x256xf32> to vector<2x4x256xf32>
    %542 = arith.mulf %0, %541 : vector<2x4x256xf32>
    %c0_227 = arith.constant 0 : index
    %c0_228 = arith.constant 0 : index
    %c0_229 = arith.constant 0 : index
    %543 = vector.load %arg4[%c0_227, %c0_228, %c0_229] : memref<2x4x256xf32, #tpu.memory_space<vmem>>, vector<2x4x256xf32>
    tpu.vector_store %arg4[%c0_227, %c0_228, %c0_229], %542 {strides = array<i32>} : memref<2x4x256xf32, #tpu.memory_space<vmem>>, vector<2x4x256xf32>,
    return
  }
  func.func @transform_0(%arg0: i32) -> i32 {
    %c0_i32 = arith.constant 0 : i32
    %c0_i32_0 = arith.constant 0 : i32
    return %c0_i32 : i32
  }
  func.func @transform_1(%arg0: i32) -> (i32, i32) {
    %c0_i32 = arith.constant 0 : i32
    %c0_i32_0 = arith.constant 0 : i32
    %c0_i32_1 = arith.constant 0 : i32
    return %c0_i32, %c0_i32_0 : i32, i32
  }
  func.func @transform_2(%arg0: i32) -> (i32, i32, i32) {
    %c0_i32 = arith.constant 0 : i32
    %c0_i32_0 = arith.constant 0 : i32
    %c0_i32_1 = arith.constant 0 : i32
    return %arg0, %c0_i32, %c0_i32_0 : i32, i32, i32
  }
  func.func @transform_3(%arg0: i32) -> (i32, i32, i32) {
    %c0_i32 = arith.constant 0 : i32
    %c0_i32_0 = arith.constant 0 : i32
    %c0_i32_1 = arith.constant 0 : i32
    return %arg0, %c0_i32, %c0_i32_0 : i32, i32, i32
  }
}

</mosaic_0001>

<bundles_post_ra>
// kernel: tpu_custom_call.1
= control target key start
LH: loop header
LB: loop body
LE: loop exit
PB: predicated region body
PF: predicated region fallthrough
CT: control target
= control target key end

     0   :  { %s3836_s0 = inlined_call_operand.hbm [shape: f32[98], index: 0, kind: input, shape index: {}]   ;;  %s3837_s1 = inlined_call_operand.hbm [shape: f32[8,256], index: 1, kind: input, shape index: {}]   ;;  %s3838_s2 = inlined_call_operand.hbm [shape: f32[2,4,256], index: 2, kind: input, shape index: {}]   ;;  %s3839_s3 = inlined_call_operand.hbm [shape: f32[2,4,256], index: 3, kind: output, shape index: {}]  }
   0x1   :  { %3990 = sst [smem:[#allocation83_spill]] %s3839_s3 }
   0x2   :  { %8 = vsyncpa [#allocation6], 0 }
   0x3   :  { %9 = vsyncpa [#allocation4], 0 }
   0x4   :  { %10 = vsyncpa [#allocation9], 0 }
   0x5   :  { %11 = vsyncpa [#allocation5], 0  ;;  %s17_s14 = sshll.u32 %s3836_s0, 4  ;;  %s26_s17 = sshll.u32 %s3837_s1, 4  ;;  %s18_s14 = int_to_ptr.hbm [resolvable:$true] %s17_s14  ;;  %s27_s17 = int_to_ptr.hbm [resolvable:$true] %s26_s17 }
   0x6   :  { %s2290_s18 = smov [#allocation3]   ;;  %s2291_s19 = smov [#allocation7]  }
   0x7   :  { %20 = dma.hbm_to_smem %s18_s14, 16, %s2290_s18, [#allocation6]  }
   0x8   :  { %s28_s20 = sshll.u32 %s2291_s19, 4  ;;  %s36_s23 = sshll.u32 %s3838_s2, 4  ;;  %s29_s20 = int_to_ptr.vmem [resolvable:$true] %s28_s20  ;;  %s37_s23 = int_to_ptr.hbm [resolvable:$true] %s36_s23 }
   0x9   :  { %31 = dma.hbm_to_vmem [thread:$0]  %s27_s17, 256, %s29_s20, [#allocation4]  }
   0xa   :  { %s2292_s24 = smov [#allocation8]   ;;  %s3840_s0 = smov 128  }
   0xb   :  { %s38_s25 = sshll.u32 %s2292_s24, 4  ;;  %s3841_s26 = smov 8   ;;  %s39_s25 = int_to_ptr.vmem [resolvable:$true] %s38_s25 }
   0xc   :  { %44 = dma.hbm_to_vmem [thread:$0]  %s37_s23, 256, %s39_s25, [#allocation9], %s3840_s0, %s3840_s0, %s3841_s26  }
   0xd   :  { %2282 = dma.done.wait [#allocation6], 16  }
   0xe   :  { %2283 = vsyncadd [#allocation6], 4294967280 }
   0xf   :  { %2284 = dma.done.wait [#allocation4], 256  }
  0x10   :  { %2285 = vsyncadd [#allocation4], 4294967040 }
  0x11   :  { %2286 = dma.done.wait [#allocation9], 256  }
  0x12   :  { %2287 = vsyncadd [#allocation9], 4294967040 }
  0x13   :  { %57 = sfence }
  0x14   :  { %v2342_v0 = vld [vmem:[#allocation8] sm:$0xff]  ;;  %v2344_v1 = vld [vmem:[#allocation8 + $0x8] sm:$0xff]  ;;  %vm73_vm0 = vcmask 1043456   ;;  %vm141_vm1 = vcmask 412672   ;;  %vm143_vm2 = vcmask 830872   ;;  %v2295_v18 = vmov 0.0  }
  0x15   :  { %3991 = vst [vmem:[#allocation15_spill] sm:$0xff] %v2342_v0  ;;  %vm154_vm3 = vcmask 1041409   ;;  %vm156_vm4 = vcmask 1045509   ;;  %s2296_s1 = smov 51   ;;  %vm181_vm5 = vcmask 1043459   ;;  %vm183_vm6 = vcmask 1047559  }
  0x16   :  { %3992 = vst [vmem:[#allocation16_spill] sm:$0xff] %v2344_v1  ;;  %s2363_s2 = sld [smem:[#allocation3 + $0x1c]]  ;;  %vm165_vm7 = vcmask 1041816   ;;  %vm166_vm8 = vcmask 1045508   ;;  %vm161_vm9 = vcmask 416768   ;;  %vm169_vm10 = vcmask 410624  }
  0x17   :  { %62 = vst [vmem:[#allocation1] ss:$2 sm:$0xff] %v2342_v0  ;;  %s2365_s27 = sld [smem:[#allocation3 + $0xe]]  ;;  %vm167_vm11 = vmor %vm166_vm8, %vm165_vm7  ;;  %vm191_vm12 = vcmask 1043866   ;;  %vm192_vm13 = vcmask 1047558   ;;  %vm195_vm14 = vcmask 412674  }
  0x18   :  { %66 = vst [vmem:[#allocation1 + $0x10] ss:$2 sm:$0xff] %v2344_v1  ;;  %s2367_s28 = sld [smem:[#allocation3 + $0x7]]  ;;  %vm2503_vm15 = vmor %vm192_vm13, %vm191_vm12  ;;  %vm398_vm7 = vcmask 261120   ;;  %vm654_vm8 = vcmask 1039360   ;;  %vm1638_vm12 = vcmask 1006592  }
  0x19   :  { %142 = vst.msk [vmem:[#allocation2] sm:$0xf] %vm141_vm1, %v2295_v18  ;;  %s2369_s29 = sld [smem:[#allocation3 + $0x8]]  ;;  %vm243_vm1 = vcmask 916480   ;;  %vm1884_vm13 = vcmask 998400  }
  0x1a   :  { %144 = vst.msk [vmem:[#allocation2 + $0x8] sm:$0xf] %vm143_vm2, %v2295_v18  ;;  %s2371_s30 = sld [smem:[#allocation3 + $0x23]]  ;;  %vm274_vm2 = vcmask 785408  }
  0x1b   :  { %s2373_s4 = sld [smem:[#allocation3 + $0x15]] }
  0x1c   :  { %3993 = sst [smem:[#allocation17_spill]] %s2363_s2 }
  0x1d   :  { %3994 = sst [smem:[#allocation18_spill]] %s2365_s27 }
  0x1e   :  { %v63_v2 = vld.sshfl [vmem:[#allocation1] sm:$0xff pattern:$0x75316420]  ;;  %v64_v3 = vld.sshfl [vmem:[#allocation1 + $0x8] sm:$0xff pattern:$0x75316420] }
  0x1f   :  { %v67_v4 = vld.sshfl [vmem:[#allocation1 + $0x10] sm:$0xff pattern:$0x75316420]  ;;  %v68_v5 = vld.sshfl [vmem:[#allocation1 + $0x18] sm:$0xff pattern:$0x75316420] }
  0x20   :  { %v74_v6 = vsel %vm73_vm0, %v63_v2, 0.0  ;;  %v81_v7 = vsel %vm73_vm0, %v64_v3, 0.0  ;;  %v88_v8 = vsel %vm73_vm0, %v67_v4, 0.0  ;;  %v95_v9 = vsel %vm73_vm0, %v68_v5, 0.0  ;;  %102 = vst [vmem:[#allocation1] ss:$2 sm:$0xff] %v2342_v0 }
  0x21   :  { %v75_v10 = vrot.slane %v74_v6, 4  ;;  %v82_v11 = vrot.slane %v81_v7, 4  ;;  %v89_v12 = vrot.slane %v88_v8, 4  ;;  %v96_v13 = vrot.slane %v95_v9, 4  ;;  %106 = vst [vmem:[#allocation1 + $0x10] ss:$2 sm:$0xff] %v2344_v1 }
  0x22   :  { %3995 = sst [smem:[#allocation19_spill]] %s2367_s28 }
  0x23   :  { %v76_v14 = vadd.f32 %v75_v10, %v74_v6  ;;  %v83_v15 = vadd.f32 %v82_v11, %v81_v7  ;;  %v90_v16 = vadd.f32 %v89_v12, %v88_v8  ;;  %v97_v17 = vadd.f32 %v96_v13, %v95_v9  ;;  %3996 = sst [smem:[#allocation20_spill]] %s2369_s29 }
  0x24   :  { %3997 = sst [smem:[#allocation21_spill]] %s2371_s30 }
  0x25   :  { %v77_v19 = vrot.slane %v76_v14, 2  ;;  %v84_v20 = vrot.slane %v83_v15, 2  ;;  %v91_v21 = vrot.slane %v90_v16, 2  ;;  %v98_v22 = vrot.slane %v97_v17, 2  ;;  %3998 = sst [smem:[#allocation22_spill]] %s2373_s4 }
  0x26   :  { %s2375_s5 = sld [smem:[#allocation3 + $0x1d]] }
  0x27   :  { %v78_v23 = vadd.f32 %v77_v19, %v76_v14  ;;  %v85_v24 = vadd.f32 %v84_v20, %v83_v15  ;;  %v92_v25 = vadd.f32 %v91_v21, %v90_v16  ;;  %v99_v26 = vadd.f32 %v98_v22, %v97_v17  ;;  %v103_v27 = vld.sshfl [vmem:[#allocation1] sm:$0xff pattern:$0x75316420]  ;;  %v104_v28 = vld.sshfl [vmem:[#allocation1 + $0x8] sm:$0xff pattern:$0x75316420] }
  0x28   :  { %v107_v29 = vld.sshfl [vmem:[#allocation1 + $0x10] sm:$0xff pattern:$0x75316420]  ;;  %v108_v30 = vld.sshfl [vmem:[#allocation1 + $0x18] sm:$0xff pattern:$0x75316420] }
  0x29   :  { %v79_v31 = vrot.slane %v78_v23, 1  ;;  %v86_v32 = vrot.slane %v85_v24, 1  ;;  %v93_v33 = vrot.slane %v92_v25, 1  ;;  %v100_v34 = vrot.slane %v99_v26, 1  ;;  %s2377_s6 = sld [smem:[#allocation3 + $0xf]] }
  0x2a   :  { %v113_v35 = vsel %vm73_vm0, %v103_v27, -inf  ;;  %v120_v36 = vsel %vm73_vm0, %v104_v28, -inf  ;;  %v127_v37 = vsel %vm73_vm0, %v107_v29, -inf  ;;  %v134_v38 = vsel %vm73_vm0, %v108_v30, -inf  ;;  %s2379_s7 = sld [smem:[#allocation3 + $0x4d]] }
  0x2b   :  { %v80_v39 = vadd.f32 %v79_v31, %v78_v23  ;;  %v87_v40 = vadd.f32 %v86_v32, %v85_v24  ;;  %v94_v41 = vadd.f32 %v93_v33, %v92_v25  ;;  %v101_v42 = vadd.f32 %v100_v34, %v99_v26  ;;  %s2381_s8 = sld [smem:[#allocation3 + $0x3f]] }
  0x2c   :  { %v114_v43 = vrot.slane %v113_v35, 4  ;;  %v121_v44 = vrot.slane %v120_v36, 4  ;;  %v128_v45 = vrot.slane %v127_v37, 4  ;;  %v135_v46 = vrot.slane %v134_v38, 4  ;;  %3999 = sst [smem:[#allocation23_spill]] %s2375_s5 }
  0x2d   :  { %v149_v47 = vrot.slane %v87_v40, 4  ;;  %v150_v48 = vrot.slane %v101_v42, 4  ;;  %s2383_s9 = sld [smem:[#allocation3 + $0x38]]  ;;  %v311_v23 = vstv %s2363_s2  ;;  %v249_v24 = vstv %s2365_s27 }
  0x2e   :  { %v115_v49 = vmax.f32 %v113_v35, %v114_v43  ;;  %v122_v50 = vmax.f32 %v120_v36, %v121_v44  ;;  %v129_v51 = vmax.f32 %v127_v37, %v128_v45  ;;  %v136_v52 = vmax.f32 %v134_v38, %v135_v46  ;;  %s2385_s10 = sld [smem:[#allocation3 + $0x39]] }
  0x2f   :  { %v151_v53 = vsel %vm73_vm0, %v80_v39, %v149_v47  ;;  %v152_v54 = vsel %vm73_vm0, %v94_v41, %v150_v48  ;;  %4000 = sst [smem:[#allocation24_spill]] %s2377_s6  ;;  %v218_v25 = vstv %s2367_s28  ;;  %v445_v26 = vstv %s2369_s29 }
  0x30   :  { %v153_v55 = vrot.slane %v152_v54, 7  ;;  %v116_v56 = vrot.slane %v115_v49, 2  ;;  %v123_v57 = vrot.slane %v122_v50, 2  ;;  %v130_v58 = vrot.slane %v129_v51, 2  ;;  %4001 = sst [smem:[#allocation25_spill]] %s2379_s7 }
  0x31   :  { %v137_v59 = vrot.slane %v136_v52, 2  ;;  %s2387_s11 = sld [smem:[#allocation3 + $0x54]]  ;;  %v342_v27 = vstv %s2371_s30  ;;  %v280_v28 = vstv %s2373_s4  ;;  %v541_v29 = vstv %s2375_s5 }
  0x32   :  { %v155_v60 = vsel %vm154_vm3, %v153_v55, %v151_v53  ;;  %v117_v61 = vmax.f32 %v115_v49, %v116_v56  ;;  %v124_v62 = vmax.f32 %v122_v50, %v123_v57  ;;  %v131_v63 = vmax.f32 %v129_v51, %v130_v58  ;;  %s2389_s12 = sld [smem:[#allocation3 + $0x46]] }
  0x33   :  { %v157_v2 = vsel %vm156_vm4, %v153_v55, %v155_v60  ;;  %v138_v3 = vmax.f32 %v136_v52, %v137_v59  ;;  %s2391_s13 = sld [smem:[#allocation3 + $0x4e]]  ;;  %v477_v30 = vstv %s2377_s6  ;;  %v3927_v34 = vstv %s2379_s7  ;;  %s3932_s7 = smov 64  }
  0x34   :  { %158 = vrot.lane.b32.xlu0 %v157_v2, %s2296_s1  ;;  %v118_v4 = vrot.slane %v117_v61, 1  ;;  %v125_v5 = vrot.slane %v124_v62, 1  ;;  %v132_v6 = vrot.slane %v131_v63, 1  ;;  %4002 = sst [smem:[#allocation26_spill]] %s2385_s10  ;;  %v252_v38 = vstv %s2381_s8 }
  0x35   :  { %v139_v7 = vrot.slane %v138_v3, 1  ;;  %s2393_s14 = sld [smem:[#allocation3 + $0x40]]  ;;  %v3929_v39 = vstv %s2383_s9  ;;  %v3928_v40 = vstv %s2385_s10  ;;  %vm305_vm4 = vcmask 654336  }
  0x36   :  { %v119_v8 = vmax.f32 %v117_v61, %v118_v4  ;;  %v126_v9 = vmax.f32 %v124_v62, %v125_v5  ;;  %v133_v10 = vmax.f32 %v131_v63, %v132_v6  ;;  %s2395_s15 = sld [smem:[#allocation3 + $0x2a]] }
  0x37   :  { %v140_v11 = vmax.f32 %v138_v3, %v139_v7  ;;  %4003 = sst [smem:[#allocation27_spill]] %s2387_s11  ;;  %v3948_v43 = vstv %s2387_s11 }
  0x38   :  { %v175_v12 = vrot.slane %v126_v9, 4  ;;  %4004 = sst [smem:[#allocation28_spill]] %s2389_s12 }
  0x39   :  { %v176_v13 = vrot.slane %v140_v11, 4  ;;  %4005 = sst [smem:[#allocation29_spill]] %s2391_s13 }
  0x3a   :  { %v177_v14 = vsel %vm73_vm0, %v119_v8, %v175_v12  ;;  %s2397_s16 = sld [smem:[#allocation3 + $0x5b]] }
  0x3b   :  { %v178_v15 = vsel %vm73_vm0, %v133_v10, %v176_v13  ;;  %v179_v16 = vrot.slane %v177_v14, 6  ;;  %4006 = sst [smem:[#allocation30_spill]] %s2393_s14 }
  0x3c   :  { %v180_v17 = vrot.slane %v178_v15, 5  ;;  %4007 = sst [smem:[#allocation31_spill]] %s2395_s15  ;;  %v373_v31 = vstv %s2395_s15 }
  0x3d   :  { %s2399_s17 = sld [smem:[#allocation3 + $0x9]] }
  0x3e   :  { %v182_v18 = vsel %vm181_vm5, %v180_v17, %v179_v16  ;;  %s2401_s18 = sld [smem:[#allocation3 + $0x3a]]  ;;  %vm336_vm5 = vcmask 523264  }
  0x3f   :  { %v184_v19 = vsel %vm183_vm6, %v180_v17, %v182_v18  ;;  %s2403_s19 = sld [smem:[#allocation3 + $0x24]]  ;;  %vm367_vm6 = vcmask 392192  }
  0x40   :  { %185 = vrot.lane.b32.xlu0 %v184_v19, %s2296_s1  ;;  %4008 = sst [smem:[#allocation32_spill]] %s2397_s16 }
  0x41   :  { %s2405_s20 = sld [smem:[#allocation3 + $0x55]] }
  0x42   :  { %s2407_s21 = sld [smem:[#allocation3 + $0x16]] }
  0x43   :  { %4009 = sst [smem:[#allocation33_spill]] %s2399_s17  ;;  %v3944_v32 = vstv %s2399_s17 }
  0x44   :  { %4010 = sst [smem:[#allocation34_spill]] %s2401_s18 }
  0x45   :  { %4011 = sst [smem:[#allocation35_spill]] %s2403_s19  ;;  %v3952_v33 = vstv %s2403_s19 }
  0x46   :  { %s2409_s22 = sld [smem:[#allocation3 + $0x47]] }
  0x47   :  { %4012 = sst [smem:[#allocation36_spill]] %s2405_s20 }
  0x48   :  { %4013 = sst [smem:[#allocation37_spill]] %s2407_s21  ;;  %v509_v35 = vstv %s2407_s21 }
  0x49   :  { %s2411_s23 = sld [smem:[#allocation3 + $0x1e]] }
  0x4a   :  { %s2413_s24 = sld [smem:[#allocation3 + $0x4f]] }
  0x4b   :  { %s2415_s25 = sld [smem:[#allocation3 + $0x10]] }
  0x4c   :  { %4014 = sst [smem:[#allocation38_spill]] %s2409_s22 }
  0x4d   :  { %s2417_s1 = sld [smem:[#allocation3 + $0x41]] }
  0x4e   :  { %s2419_s0 = sld [smem:[#allocation3 + $0x2b]] }
  0x4f   :  { %4015 = sst [smem:[#allocation39_spill]] %s2411_s23  ;;  %v3936_v36 = vstv %s2411_s23 }
  0x50   :  { %4016 = sst [smem:[#allocation40_spill]] %s2413_s24 }
  0x51   :  { %4017 = sst [smem:[#allocation41_spill]] %s2415_s25  ;;  %v3939_v37 = vstv %s2415_s25 }
  0x52   :  { %s2421_s26 = sld [smem:[#allocation3 + $0x5c]] }
  0x53   :  { %4018 = sst [smem:[#allocation42_spill]] %s2417_s1 }
  0x54   :  { %4019 = sst [smem:[#allocation43_spill]] %s2419_s0  ;;  %v605_v41 = vstv %s2419_s0 }
  0x55   :  { %s2423_s3 = sld [smem:[#allocation3 + $0xa]] }
  0x56   :  { %s2425_s18 = sld [smem:[#allocation3 + $0x3b]] }
  0x57   :  { %s2427_s20 = sld [smem:[#allocation3 + $0x25]] }
  0x58   :  { %4020 = sst [smem:[#allocation44_spill]] %s2421_s26 }
  0x59   :  { %s2429_s16 = sld [smem:[#allocation3 + $0x56]] }
  0x5a   :  { %s2431_s22 = sld [smem:[#allocation3 + $0x17]] }
  0x5b   :  { %4021 = sst [smem:[#allocation45_spill]] %s2423_s3 }
  0x5c   :  { %4022 = sst [smem:[#allocation46_spill]] %s2425_s18 }
  0x5d   :  { %s2433_s14 = sld [smem:[#allocation3 + $0x48]]  ;;  %v3943_v51 = vstv %s2427_s20 }
  0x5e   :  { %s2435_s24 = sld [smem:[#allocation3 + $0x1f]] }
  0x5f   :  { %4023 = sst [smem:[#allocation47_spill]] %s2429_s16 }
  0x60   :  { %4024 = sst [smem:[#allocation48_spill]] %s2431_s22  ;;  %v755_v52 = vstv %s2431_s22 }
  0x61   :  { %s2437_s13 = sld [smem:[#allocation3 + $0x50]] }
  0x62   :  { %s2439_s1 = sld [smem:[#allocation3 + $0x11]] }
  0x63   :  { %4025 = sst [smem:[#allocation49_spill]] %s2433_s14 }
  0x64   :  { %4026 = sst [smem:[#allocation50_spill]] %s2435_s24  ;;  %v3945_v53 = vstv %s2435_s24 }
  0x65   :  { %s2441_s12 = sld [smem:[#allocation3 + $0x42]] }
  0x66   :  { %s2443_s26 = sld [smem:[#allocation3 + $0x2c]] }
  0x67   :  { %4027 = sst [smem:[#allocation51_spill]] %s2437_s13 }
  0x68   :  { %4028 = sst [smem:[#allocation52_spill]] %s2439_s1  ;;  %v3946_v54 = vstv %s2439_s1 }
  0x69   :  { %s2445_s3 = sld [smem:[#allocation3 + $0x5d]] }
  0x6a   :  { %s2447_s18 = sld [smem:[#allocation3 + $0x2d]] }
  0x6b   :  { %4029 = sst [smem:[#allocation53_spill]] %s2441_s12 }
  0x6c   :  { %4030 = sst [smem:[#allocation54_spill]] %s2443_s26  ;;  %v3947_v55 = vstv %s2443_s26 }
  0x6d   :  { %s2449_s16 = sld [smem:[#allocation3 + $0x5e]] }
  0x6e   :  { %s2451_s14 = sld [smem:[#allocation3 + $0x26]] }
  0x6f   :  { %4031 = sst [smem:[#allocation55_spill]] %s2445_s3 }
  0x70   :  { %4032 = sst [smem:[#allocation56_spill]] %s2447_s18  ;;  %s4112_s18 = smov 96  }
  0x71   :  { %s2453_s12 = sld [smem:[#allocation3 + $0x57]] }
  0x72   :  { %s2455_s3 = sld [smem:[#allocation3 + $0x18]] }
  0x73   :  { %4033 = sst [smem:[#allocation57_spill]] %s2449_s16 }
  0x74   :  { %4034 = sst [smem:[#allocation58_spill]] %s2451_s14 }
  0x75   :  { %s2458_s16 = sld [smem:[#allocation3 + $0x49]] }
  0x76   :  { %s2460_s13 = sld [smem:[#allocation3 + $0x20]] }
  0x77   :  { %4035 = sst [smem:[#allocation59_spill]] %s2453_s12 }
  0x78   :  { %4036 = sst [smem:[#allocation60_spill]] %s2455_s3 }
  0x79   :  { %s2462_s14 = sld [smem:[#allocation3 + $0x51]] }
  0x7a   :  { %s2464_s12 = sld [smem:[#allocation3 + $0x12]] }
  0x7b   :  { %4037 = sst [smem:[#allocation61_spill]] %s2458_s16 }
  0x7c   :  { %4038 = sst [smem:[#allocation62_spill]] %s2460_s13 }
  0x7d   :  { %s2469_s16 = sld [smem:[#allocation3 + $0x43]] }
  0x7e   :  { %s4043_s2 = sld [smem:[#allocation28_spill]] }
  0x7f   :  { %4039 = sst [smem:[#allocation63_spill]] %s2462_s14 }
  0x80   :  { %4040 = sst [smem:[#allocation64_spill]] %s2464_s12 }
  0x81   :  { %s2475_s14 = sld [smem:[#allocation3 + $0xb]] }
  0x82   :  { %s4044_s27 = sld [smem:[#allocation29_spill]] }
  0x83   :  { %4041 = sst [smem:[#allocation65_spill]] %s2469_s16 }
  0x84   :  { %s4045_s28 = sld [smem:[#allocation45_spill]]  ;;  %v3949_v44 = vstv %s4043_s2 }
  0x85   :  { %s2481_s12 = sld [smem:[#allocation3 + $0x2e]] }
  0x86   :  { %s4047_s30 = sld [smem:[#allocation30_spill]] }
  0x87   :  { %4042 = sst [smem:[#allocation66_spill]] %s2475_s14 }
  0x88   :  { %s4048_s4 = sld [smem:[#allocation32_spill]]  ;;  %v3950_v45 = vstv %s4044_s27 }
  0x89   :  { %s2487_s29 = sld [smem:[#allocation3 + $0x27]] }
  0x8a   :  { %s2493_s19 = sld [smem:[#allocation3 + $0x19]]  ;;  %v3942_v46 = vstv %s4045_s28 }
  0x8b   :  { %4046 = sst [smem:[#allocation67_spill]] %s2481_s12  ;;  %s3967_s12 = smov 48  }
  0x8c   :  { %s4051_s23 = sld [smem:[#allocation34_spill]]  ;;  %v3951_v49 = vstv %s4047_s30 }
  0x8d   :  { %s4052_s25 = sld [smem:[#allocation36_spill]] }
  0x8e   :  { %s2499_s21 = sld [smem:[#allocation3 + $0x13]]  ;;  %v3960_v50 = vstv %s4048_s4 }
  0x8f   :  { %4049 = sst [smem:[#allocation68_spill]] %s2487_s29  ;;  %s4104_s29 = smov 112  }
  0x90   :  { %4050 = sst [smem:[#allocation69_spill]] %s2493_s19 }
  0x91   :  { %s4056_s0 = sld [smem:[#allocation38_spill]] }
  0x92   :  { %s4057_s17 = sld [smem:[#allocation40_spill]]  ;;  %v3956_v57 = vstv %s4051_s23 }
  0x93   :  { %s4058_s11 = sld [smem:[#allocation42_spill]]  ;;  %v3957_v58 = vstv %s4052_s25  ;;  %s3934_s25 = smov 96  }
  0x94   :  { %4053 = sst [smem:[#allocation70_spill]] %s2499_s21  ;;  %s3965_s21 = smov 32  }
  0x95   :  { %s2510_s2 = sld [smem:[#allocation3 + $0xc]] }
  0x96   :  { %s4061_s28 = sld [smem:[#allocation44_spill]] }
  0x97   :  { %s4062_s15 = sld [smem:[#allocation46_spill]]  ;;  %v3959_v60 = vstv %s4056_s0 }
  0x98   :  { %s4063_s6 = sld [smem:[#allocation47_spill]]  ;;  %v3953_v61 = vstv %s4057_s17  ;;  %s3963_s17 = smov 80  }
  0x99   :  { %s2516_s5 = sld [smem:[#allocation3 + $0x3c]]  ;;  %v3954_v62 = vstv %s4058_s11 }
  0x9a   :  { %s4066_s4 = sld [smem:[#allocation49_spill]] }
  0x9b   :  { %4060 = sst [smem:[#allocation38_spill]] %s2510_s2 }
  0x9c   :  { %s4067_s24 = sld [smem:[#allocation51_spill]]  ;;  %v3958_v2 = vstv %s4061_s28 }
  0x9d   :  { %s4068_s26 = sld [smem:[#allocation53_spill]]  ;;  %v3955_v3 = vstv %s4062_s15 }
  0x9e   :  { %s4069_s1 = sld [smem:[#allocation55_spill]]  ;;  %v3962_v6 = vstv %s4063_s6 }
  0x9f   :  { %4064 = sst [smem:[#allocation44_spill]] %s2516_s5 }
  0xa0   :  { %v758_v11 = vstv %s4066_s4  ;;  %s2552_s30 = sld [smem:[#allocation3 + $0x58]] }
  0xa1   :  { %s4087_s5 = sld [smem:[#allocation35_spill]] }
  0xa2   :  { %s4089_s11 = sld [smem:[#allocation39_spill]] }
  0xa3   :  { %s4090_s13 = sld [smem:[#allocation41_spill]] }
  0xa4   :  { %s4096_s22 = sld [smem:[#allocation54_spill]] }
  0xa5   :  { %s4099_s10 = sld [smem:[#allocation32_spill]] }
  0xa6   :  { %v159_v20 = vpop.permute.xlu0 %158  ;;  %4079 = sst [smem:[#allocation46_spill]] %s2552_s30 }
  0xa7   :  { %v160_v21 = vrot.slane %v159_v20, 4  ;;  %s4097_s30 = sld [smem:[#allocation29_spill]] }
  0xa8   :  { %s4100_s19 = sld [smem:[#allocation34_spill]] }
  0xa9   :  { %v162_v22 = vsel %vm161_vm9, %v160_v21, %v159_v20  ;;  %170 = vst.msk [vmem:[#allocation2 + $0x8] sm:$0x3] %vm169_vm10, %v160_v21  ;;  %s4101_s14 = sld [smem:[#allocation36_spill]]  ;;  %vm1146_vm10 = vcmask 1022976  }
  0xaa   :  { %168 = vst.msk [vmem:[#allocation2] sm:$0x33] %vm167_vm11, %v162_v22  ;;  %s4102_s2 = sld [smem:[#allocation40_spill]]  ;;  %vm1392_vm11 = vcmask 1014784  }
  0xab   :  { %s4103_s3 = sld [smem:[#allocation42_spill]] }
  0xac   :  { %s2774_s16 = sld [smem:[#allocation3 + $0x3d]] }
  0xad   :  { %s4108_s27 = sld [smem:[#allocation57_spill]] }
  0xae   :  { %s4110_s8 = sld [smem:[#allocation28_spill]] }
  0xaf   :  { %s4114_s23 = sld [smem:[#allocation25_spill]] }
  0xb0   :  { %v213_v10 = vld [vmem:[#allocation2 + $0x8] sm:$0x3]  ;;  %s2929_s4 = sld [smem:[#allocation3 + $0x2]] }
  0xb1   :  { %v2545_v19 = vld [vmem:[#allocation2] sm:$0x33]  ;;  %v2547_v20 = vld [vmem:[#allocation2 + $0x8] sm:$0x3]  ;;  %v251_v18 = vmul.f32 %v249_v24, %v213_v10  ;;  %v220_v7 = vmul.f32 %v218_v25, %v213_v10  ;;  %v344_v8 = vmul.f32 %v342_v27, %v213_v10 }
  0xb2   :  { %v186_v42 = vpop.permute.xlu0 %185  ;;  %v2579_v9 = vmul.f32 %v249_v24, %v2545_v19  ;;  %v2584_v63 = vmul.f32 %v218_v25, %v2545_v19  ;;  %v447_v14 = vmul.f32 %v445_v26, %v2547_v20  ;;  %v282_v24 = vmul.f32 %v280_v28, %v213_v10  ;;  %v2615_v15 = vld [vmem:[#allocation2 + $0x8] sm:$0x3] }
  0xb3   :  { %v187_v48 = vrot.slane %v186_v42, 4  ;;  %v2601_v21 = vmul.f32 %v541_v29, %v2547_v20  ;;  %v2606_v17 = vmul.f32 %v477_v30, %v2547_v20 }
  0xb5   :  { %v188_v56 = vsel %vm161_vm9, %v187_v48, %v186_v42  ;;  %196 = vst.msk [vmem:[#allocation2 + $0x8] sm:$0xc] %vm195_vm14, %v187_v48  ;;  %vm900_vm9 = vcmask 1031168  }
  0xb6   :  { %194 = vst.msk [vmem:[#allocation2] sm:$0xcc] %vm2503_vm15, %v188_v56  ;;  %v313_v56 = vmul.f32 %v311_v23, %v213_v10 }
  0xbc   :  { %v2555_v48 = vld [vmem:[#allocation2 + $0x8] sm:$0xc] }
  0xbd   :  { %v316_v5 = vmul.f32 %v3927_v34, %v2555_v48  ;;  %v254_v42 = vmul.f32 %v252_v38, %v2555_v48  ;;  %v223_v59 = vmul.f32 %v3929_v39, %v2555_v48  ;;  %v2574_v47 = vld [vmem:[#allocation2 + $0x8] sm:$0xc]  ;;  %v2593_v34 = vld [vmem:[#allocation2 + $0x8] sm:$0x3]  ;;  %v285_v39 = vmul.f32 %v3949_v44, %v2555_v48 }
  0xbe   :  { %v450_v25 = vmul.f32 %v3928_v40, %v2574_v47  ;;  %v347_v40 = vmul.f32 %v3948_v43, %v2555_v48  ;;  %v2623_v12 = vmul.f32 %v3944_v32, %v2593_v34  ;;  %v2688_v32 = vld [vmem:[#allocation2 + $0x8] sm:$0xc] }
  0xbf   :  { %v1990_v13 = vrot.slane %v316_v5, 10  ;;  %v1982_v4 = vrot.slane %v254_v42, 10  ;;  %v1978_v22 = vrot.slane %v223_v59, 10  ;;  %v2610_v5 = vmul.f32 %v373_v31, %v213_v10 }
  0xc0   :  { %v2628_v10 = vmul.f32 %v3952_v33, %v2547_v20  ;;  %v514_v33 = vmul.f32 %v3959_v60, %v2574_v47 }
  0xc1   :  { %v326_v59 = vadd.f32 %v1990_v13, %v313_v56  ;;  %v264_v42 = vadd.f32 %v1982_v4, %v251_v18  ;;  %v233_v16 = vadd.f32 %v1978_v22, %v220_v7  ;;  %v2633_v4 = vmul.f32 %v509_v35, %v2547_v20  ;;  %v2655_v56 = vld [vmem:[#allocation2] sm:$0x33] }
  0xc2   :  { %v2640_v7 = vmul.f32 %v3936_v36, %v2593_v34  ;;  %v2645_v13 = vmul.f32 %v3939_v37, %v2593_v34  ;;  %v2650_v18 = vmul.f32 %v605_v41, %v2547_v20  ;;  %v2666_v22 = vmul.f32 %v3943_v51, %v2593_v34 }
  0xc3   :  { %331 = vrot.lane.b32.xlu0 %v326_v59, %s3932_s7  ;;  %269 = vrot.lane.b32.xlu2 %v264_v42, %s3934_s25  ;;  %s2653_s7 = sld [smem:[#allocation3 + $0x4a]]  ;;  %s3940_s25 = smov 112   ;;  %v2006_v59 = vrot.slane %v450_v25, 10  ;;  %v2661_v42 = vmul.f32 %v3942_v46, %v2615_v15  ;;  %v2671_v36 = vmul.f32 %v755_v52, %v2593_v34  ;;  %v1994_v37 = vrot.slane %v347_v40, 10 }
  0xc4   :  { %238 = vrot.lane.b32.xlu1 %v233_v16, %s3940_s25  ;;  %s4098_s25 = sld [smem:[#allocation30_spill]]  ;;  %v2676_v16 = vmul.f32 %v3945_v53, %v2615_v15  ;;  %v2681_v25 = vmul.f32 %v3946_v54, %v2615_v15  ;;  %v2686_v46 = vmul.f32 %v3947_v55, %v2593_v34  ;;  %v1986_v51 = vrot.slane %v285_v39, 10 }
  0xc5   :  { %v2693_v40 = vmul.f32 %v280_v28, %v2545_v19  ;;  %v2698_v53 = vmul.f32 %v373_v31, %v2545_v19  ;;  %v2703_v54 = vmul.f32 %v509_v35, %v2655_v56  ;;  %v2708_v39 = vmul.f32 %v311_v23, %v2545_v19  ;;  %v2725_v35 = vld [vmem:[#allocation2] sm:$0x33] }
  0xc6   :  { %v2713_v55 = vmul.f32 %v342_v27, %v2545_v19  ;;  %v2718_v28 = vmul.f32 %v605_v41, %v2655_v56  ;;  %v2723_v31 = vmul.f32 %v445_v26, %v2655_v56  ;;  %v460_v43 = vadd.f32 %v2006_v59, %v447_v14  ;;  %v2733_v19 = vld [vmem:[#allocation2 + $0x8] sm:$0xc]  ;;  %v2740_v26 = vld [vmem:[#allocation2] sm:$0xcc] }
  0xc7   :  { %v546_v23 = vmul.f32 %v3950_v45, %v2574_v47  ;;  %v482_v27 = vmul.f32 %v3951_v49, %v2574_v47  ;;  %v2738_v41 = vmul.f32 %v477_v30, %v2655_v56  ;;  %v357_v44 = vadd.f32 %v1994_v37, %v344_v8 }
  0xc8   :  { %v378_v14 = vmul.f32 %v3960_v50, %v2555_v48  ;;  %v696_v59 = vmul.f32 %v3956_v57, %v2688_v32  ;;  %v578_v45 = vmul.f32 %v3957_v58, %v2574_v47  ;;  %v295_v49 = vadd.f32 %v1986_v51, %v282_v24 }
  0xc9   :  { %v792_v30 = vmul.f32 %v3953_v61, %v2688_v32  ;;  %v2760_v37 = vmul.f32 %v755_v52, %v2725_v35  ;;  %v728_v51 = vmul.f32 %v3954_v62, %v2688_v32  ;;  %v610_v8 = vmul.f32 %v3958_v2, %v2574_v47 }
  0xca   :  { %v942_v48 = vmul.f32 %v3955_v3, %v2733_v19  ;;  %v2010_v52 = vrot.slane %v482_v27, 10  ;;  %v2783_v61 = vmul.f32 %v541_v29, %v2655_v56  ;;  %v1998_v62 = vrot.slane %v378_v14, 10 }
  0xcb   :  { %465 = vrot.lane.b32.xlu0 %v460_v43, %s4104_s29  ;;  %362 = vrot.lane.b32.xlu2 %v357_v44, %s3967_s12  ;;  %v253_v43 = vmul.f32 %v252_v38, %v2740_v26  ;;  %v2018_v44 = vrot.slane %v546_v23, 10  ;;  %v2034_v3 = vrot.slane %v696_v59, 10  ;;  %v2022_v57 = vrot.slane %v578_v45, 10  ;;  %s2858_s12 = sld [smem:[#allocation3 + $0x1]] }
  0xcc   :  { %300 = vrot.lane.b32.xlu1 %v295_v49, %s3963_s17  ;;  %v824_v24 = vmul.f32 %v3962_v6, %v2688_v32  ;;  %v2014_v58 = vrot.slane %v514_v33, 10  ;;  %v2046_v2 = vrot.slane %v792_v30, 10  ;;  %v760_v38 = vmul.f32 %v758_v11, %v2688_v32  ;;  %s4116_s17 = sld [smem:[#allocation27_spill]] }
  0xcd   :  { %v4105_v49 = vstv %s4067_s24  ;;  %v2038_v23 = vrot.slane %v728_v51, 10  ;;  %v2026_v27 = vrot.slane %v610_v8, 10  ;;  %v2062_v50 = vrot.slane %v942_v48, 10 }
  0xce   :  { %v1038_v60 = vmul.f32 %v4105_v49, %v2733_v19  ;;  %v4106_v29 = vstv %s4087_s5  ;;  %v4107_v45 = vstv %s2383_s9  ;;  %v556_v59 = vadd.f32 %v2018_v44, %v2601_v21  ;;  %s4109_s5 = sld [smem:[#allocation59_spill]]  ;;  %s4111_s9 = smov 64  }
  0xcf   :  { %v2797_v1 = vmul.f32 %v4106_v29, %v2655_v56  ;;  %v222_v14 = vmul.f32 %v4107_v45, %v2740_v26  ;;  %v492_v33 = vadd.f32 %v2010_v52, %v2606_v17  ;;  %v1981_v30 = vrot.slane %v253_v43, 10 }
  0xd0   :  { %v388_v6 = vadd.f32 %v1998_v62, %v2610_v5  ;;  %v706_v49 = vadd.f32 %v2034_v3, %v2623_v12  ;;  %v588_v51 = vadd.f32 %v2022_v57, %v2628_v10  ;;  %v2050_v8 = vrot.slane %v824_v24, 10 }
  0xd1   :  { %v524_v48 = vadd.f32 %v2014_v58, %v2633_v4  ;;  %v2809_v29 = vadd.f32 %v2046_v2, %v2640_v7  ;;  %v2042_v21 = vrot.slane %v760_v38, 10  ;;  %v2074_v17 = vrot.slane %v1038_v60, 10  ;;  %v2823_v2 = vld [vmem:[#allocation2] sm:$0xcc] }
  0xd2   :  { %v2814_v62 = vadd.f32 %v2038_v23, %v2645_v13  ;;  %v2817_v57 = vadd.f32 %v2026_v27, %v2650_v18  ;;  %v2820_v58 = vadd.f32 %v2062_v50, %v2661_v42  ;;  %v3971_v3 = vstv %s2774_s16 }
  0xd3   :  { %561 = vrot.lane.b32.xlu0 %v556_v59, %s4111_s9  ;;  %497 = vrot.lane.b32.xlu2 %v492_v33, %s4112_s18  ;;  %v4113_v60 = vstv %s4068_s26  ;;  %v4115_v5 = vstv %s4069_s1  ;;  %v2856_v44 = vadd.f32 %v1981_v30, %v2579_v9  ;;  %v2861_v52 = vadd.f32 %v2042_v21, %v2671_v36 }
  0xd4   :  { %393 = vrot.lane.b32.xlu1 %v388_v6, %s3965_s21  ;;  %v2829_v12 = vmul.f32 %v4113_v60, %v2733_v19  ;;  %v2834_v10 = vmul.f32 %v4115_v5, %v2688_v32  ;;  %v4117_v50 = vstv %s4108_s27  ;;  %v4118_v7 = vstv %s4109_s5  ;;  %s4120_s21 = sld [smem:[#allocation26_spill]]  ;;  %v2884_v5 = vld [vmem:[#allocation2] sm:$0xcc] }
  0xd5   :  { %v2839_v4 = vmul.f32 %v4117_v50, %v2733_v19  ;;  %v2844_v13 = vmul.f32 %v4118_v7, %v2733_v19  ;;  %v2847_v6 = vadd.f32 %v2050_v8, %v2666_v22  ;;  %v4119_v18 = vstv %s4110_s8  ;;  %4127 = vst [vmem:[#allocation71_spill] sm:$0xff] %v2884_v5  ;;  %s4165_s8 = sld [smem:[#allocation38_spill]] }
  0xd6   :  { %v284_v42 = vmul.f32 %v4119_v18, %v2740_v26  ;;  %v4121_v24 = vstv %s4099_s10  ;;  %v2864_v38 = vadd.f32 %v2074_v17, %v2676_v16  ;;  %v1977_v22 = vrot.slane %v222_v14, 10  ;;  %s4130_s10 = smov 80  }
  0xd7   :  { %v377_v43 = vmul.f32 %v4121_v24, %v2740_v26  ;;  %v4122_v23 = vstv %s4056_s0  ;;  %v4123_v33 = vstv %s4114_s23  ;;  %v4124_v9 = vstv %s4116_s17  ;;  %s2892_s0 = sld [smem:[#allocation3 + $0x32]] }
  0xd8   :  { %v513_v27 = vmul.f32 %v4122_v23, %v2823_v2  ;;  %v1985_v45 = vrot.slane %v284_v42, 10  ;;  %v315_v8 = vmul.f32 %v4123_v33, %v2740_v26  ;;  %v346_v30 = vmul.f32 %v4124_v9, %v2740_v26  ;;  %s4163_s17 = sld [smem:[#allocation58_spill]] }
  0xd9   :  { %v1997_v59 = vrot.slane %v377_v43, 10  ;;  %v2876_v60 = vadd.f32 %v1977_v22, %v2584_v63  ;;  %v4125_v16 = vstv %s4061_s28  ;;  %v4128_v43 = vstv %s4098_s25  ;;  %s4129_s28 = smov 48   ;;  %s4131_s25 = sld [smem:[#allocation33_spill]] }
  0xda   :  { %v2013_v36 = vrot.slane %v513_v27, 10  ;;  %v609_v21 = vmul.f32 %v4125_v16, %v2823_v2  ;;  %v4126_v14 = vstv %s4120_s21  ;;  %v2887_v50 = vadd.f32 %v1985_v45, %v2693_v40  ;;  %s3074_s21 = sld [smem:[#allocation3 + $0x44]] }
  0xdb   :  { %v449_v17 = vmul.f32 %v4126_v14, %v2823_v2  ;;  %v2890_v7 = vadd.f32 %v1997_v59, %v2698_v53  ;;  %v1989_v26 = vrot.slane %v315_v8, 10  ;;  %v1993_v18 = vrot.slane %v346_v30, 10  ;;  %711 = vrot.lane.b32.xlu0 %v706_v49, %s4104_s29  ;;  %593 = vrot.lane.b32.xlu2 %v588_v51, %s4129_s28  ;;  %s4168_s23 = sld [smem:[#allocation65_spill]] }
  0xdc   :  { %v2895_v63 = vadd.f32 %v2013_v36, %v2703_v54  ;;  %v2025_v42 = vrot.slane %v609_v21, 10  ;;  %v481_v40 = vmul.f32 %v4128_v43, %v2823_v2  ;;  %v2066_v53 = vrot.slane %v2829_v12, 10  ;;  %529 = vrot.lane.b32.xlu1 %v524_v48, %s4130_s10 }
  0xdd   :  { %v2005_v24 = vrot.slane %v449_v17, 10  ;;  %v2904_v22 = vadd.f32 %v1989_v26, %v2708_v39  ;;  %v2907_v54 = vadd.f32 %v1993_v18, %v2713_v55  ;;  %v759_v23 = vmul.f32 %v758_v11, %v2884_v5  ;;  %v2946_v18 = vld [vmem:[#allocation2] sm:$0xcc] }
  0xde   :  { %v2914_v27 = vadd.f32 %v2025_v42, %v2718_v28  ;;  %v2009_v51 = vrot.slane %v481_v40, 10  ;;  %v4132_v39 = vstv %s4097_s30  ;;  %v4133_v55 = vstv %s4101_s14  ;;  %s4138_s30 = sld [smem:[#allocation61_spill]] }
  0xdf   :  { %v2917_v49 = vadd.f32 %v2005_v24, %v2723_v31  ;;  %v545_v45 = vmul.f32 %v4132_v39, %v2823_v2  ;;  %v2041_v59 = vrot.slane %v759_v23, 10  ;;  %v577_v33 = vmul.f32 %v4133_v55, %v2823_v2  ;;  %s4141_s14 = sld [smem:[#allocation60_spill]] }
  0xe0   :  { %v4134_v11 = vstv %s4069_s1  ;;  %v3972_v8 = vstv %s2858_s12  ;;  %v2932_v28 = vadd.f32 %v2009_v51, %v2738_v41  ;;  %v4135_v9 = vstv %s4096_s22  ;;  %v2957_v51 = vld [vmem:[#allocation2] sm:$0x33]  ;;  %s4143_s22 = sld [smem:[#allocation44_spill]]  ;;  %s4147_s1 = smov 32  }
  0xe1   :  { %v855_v48 = vmul.f32 %v4134_v11, %v2884_v5  ;;  %v2017_v31 = vrot.slane %v545_v45, 10  ;;  %v852_v30 = vmul.f32 %v4135_v9, %v2725_v35  ;;  %v4136_v36 = vstv %s4100_s19  ;;  %s2959_s19 = sld [smem:[#allocation3 + $0x33]] }
  0xe2   :  { %v695_v16 = vmul.f32 %v4136_v36, %v2884_v5  ;;  %v2941_v21 = vadd.f32 %v2041_v59, %v2760_v37  ;;  %v2021_v14 = vrot.slane %v577_v33, 10  ;;  %v4137_v26 = vstv %s4131_s25  ;;  %s4174_s25 = sld [smem:[#allocation63_spill]] }
  0xe3   :  { %v2053_v17 = vrot.slane %v855_v48, 10  ;;  %v692_v41 = vmul.f32 %v4137_v26, %v2725_v35  ;;  %v2949_v42 = vadd.f32 %v2017_v31, %v2783_v61  ;;  %v4139_v43 = vstv %s4090_s13  ;;  %807 = vrot.lane.b32.xlu0 %v2809_v29, %s4111_s9  ;;  %743 = vrot.lane.b32.xlu2 %v2814_v62, %s4112_s18  ;;  %s4148_s13 = sld [smem:[#allocation66_spill]] }
  0xe4   :  { %v2033_v24 = vrot.slane %v695_v16, 10  ;;  %v724_v40 = vmul.f32 %v4139_v43, %v2725_v35  ;;  %v4140_v23 = vstv %s4103_s3  ;;  %v2962_v39 = vadd.f32 %v2021_v14, %v2797_v1  ;;  %v2978_v1 = vld [vmem:[#allocation2] sm:$0xcc]  ;;  %625 = vrot.lane.b32.xlu1 %v2817_v57, %s4147_s1  ;;  %s4150_s3 = sld [smem:[#allocation45_spill]] }
  0xe5   :  { %v727_v37 = vmul.f32 %v4140_v23, %v2884_v5  ;;  %v2964_v45 = vadd.f32 %v2053_v17, %v852_v30  ;;  %v427_v61 = vmul.f32 %v3972_v8, %v2547_v20  ;;  %v3973_v59 = vstv %s2892_s0 }
  0xe6   :  { %v2970_v55 = vadd.f32 %v2033_v24, %v692_v41  ;;  %v430_v11 = vmul.f32 %v3973_v59, %v2574_v47  ;;  %v4142_v48 = vstv %s4138_s30  ;;  %v2054_v20 = vrot.slane %v2834_v10, 10  ;;  %v3001_v24 = vld [vmem:[#allocation2] sm:$0x33] }
  0xe7   :  { %v2037_v33 = vrot.slane %v727_v37, 10  ;;  %v1005_v31 = vmul.f32 %v4142_v48, %v2946_v18  ;;  %v4144_v9 = vstv %s4141_s14  ;;  %v4145_v47 = vstv %s4089_s11  ;;  %s4153_s11 = sld [smem:[#allocation52_spill]] }
  0xe8   :  { %v1002_v30 = vmul.f32 %v4144_v9, %v2957_v51  ;;  %v788_v36 = vmul.f32 %v4145_v47, %v2725_v35  ;;  %v4146_v16 = vstv %s4102_s2  ;;  %v2002_v62 = vrot.slane %v430_v11, 10  ;;  %s3045_s2 = sld [smem:[#allocation3 + $0x5f]] }
  0xe9   :  { %v791_v14 = vmul.f32 %v4146_v16, %v2884_v5  ;;  %v2996_v29 = vadd.f32 %v2037_v33, %v724_v40  ;;  %v2069_v17 = vrot.slane %v1005_v31, 10  ;;  %v4149_v26 = vstv %s4063_s6  ;;  %s3025_s6 = sld [smem:[#allocation3 + $0x3]] }
  0xea   :  { %v823_v41 = vmul.f32 %v4149_v26, %v2884_v5  ;;  %v4151_v23 = vstv %s2427_s20  ;;  %v4152_v48 = vstv %s4143_s22  ;;  %v3969_v57 = vstv %s2929_s4  ;;  %s3033_s20 = sld [smem:[#allocation3 + $0x34]] }
  0xeb   :  { %v2045_v43 = vrot.slane %v791_v14, 10  ;;  %v820_v37 = vmul.f32 %v4151_v23, %v2725_v35  ;;  %v1187_v9 = vmul.f32 %v4152_v48, %v2978_v1  ;;  %v3010_v40 = vadd.f32 %v2002_v62, %v427_v61  ;;  %957 = vrot.lane.b32.xlu0 %v2820_v58, %s4104_s29  ;;  %839 = vrot.lane.b32.xlu2 %v2847_v6, %s4129_s28 }
  0xec   :  { %v3012_v33 = vadd.f32 %v2069_v17, %v1002_v30  ;;  %v2049_v11 = vrot.slane %v823_v41, 10  ;;  %v4154_v31 = vstv %s4062_s15  ;;  %v4155_v14 = vstv %s4148_s13  ;;  %s4158_s15 = sld [smem:[#allocation69_spill]]  ;;  %775 = vrot.lane.b32.xlu1 %v2861_v52, %s4130_s10 }
  0xed   :  { %v941_v47 = vmul.f32 %v4154_v31, %v2946_v18  ;;  %v3017_v16 = vadd.f32 %v2045_v43, %v788_v36  ;;  %v1184_v26 = vmul.f32 %v4155_v14, %v3001_v24  ;;  %v2089_v35 = vrot.slane %v1187_v9, 10 }
  0xee   :  { %v4156_v23 = vstv %s4068_s26  ;;  %v3027_v61 = vadd.f32 %v2049_v11, %v820_v37  ;;  %v4157_v30 = vstv %s4150_s3  ;;  %v3970_v36 = vstv %s2959_s19  ;;  %v3043_v37 = vld [vmem:[#allocation2] sm:$0xcc]  ;;  %s4160_s26 = sld [smem:[#allocation50_spill]] }
  0xef   :  { %v973_v48 = vmul.f32 %v4156_v23, %v2946_v18  ;;  %v938_v62 = vmul.f32 %v4157_v30, %v2957_v51  ;;  %v2061_v17 = vrot.slane %v941_v47, 10  ;;  %v3035_v41 = vadd.f32 %v2089_v35, %v1184_v26  ;;  %s4179_s3 = sld [smem:[#allocation62_spill]] }
  0xf0   :  { %v4159_v43 = vstv %s4153_s11  ;;  %v676_v14 = vmul.f32 %v3970_v36, %v2688_v32  ;;  %v673_v47 = vmul.f32 %v3969_v57, %v2593_v34  ;;  %v4161_v26 = vstv %s2653_s7  ;;  %s4182_s11 = sld [smem:[#allocation68_spill]] }
  0xf1   :  { %v970_v9 = vmul.f32 %v4159_v43, %v2957_v51  ;;  %v2065_v31 = vrot.slane %v973_v48, 10  ;;  %v3047_v11 = vadd.f32 %v2061_v17, %v938_v62  ;;  %v1251_v35 = vmul.f32 %v4161_v26, %v2978_v1  ;;  %v3070_v26 = vld [vmem:[#allocation2] sm:$0x33] }
  0xf2   :  { %v4162_v23 = vstv %s4067_s24  ;;  %v2030_v30 = vrot.slane %v676_v14, 10  ;;  %v4164_v62 = vstv %s4158_s15  ;;  %v4166_v17 = vstv %s4109_s5  ;;  %s4167_s24 = sld [smem:[#allocation56_spill]] }
  0xf3   :  { %v1037_v48 = vmul.f32 %v4162_v23, %v2946_v18  ;;  %v3062_v32 = vadd.f32 %v2065_v31, %v970_v9  ;;  %v1248_v34 = vmul.f32 %v4164_v62, %v3001_v24  ;;  %v1069_v43 = vmul.f32 %v4166_v17, %v2946_v18  ;;  %s4171_s5 = sld [smem:[#allocation64_spill]]  ;;  %1053 = vrot.lane.b32.xlu0 %v2864_v38, %s4111_s9 }
  0xf4   :  { %v2097_v58 = vrot.slane %v1251_v35, 10  ;;  %v4169_v6 = vstv %s4160_s26  ;;  %v1433_v14 = vmul.f32 %v3971_v3, %v3043_v37  ;;  %v3082_v23 = vadd.f32 %v2030_v30, %v673_v47  ;;  %s4188_s26 = sld [smem:[#allocation70_spill]] }
  0xf5   :  { %v1034_v9 = vmul.f32 %v4169_v6, %v2957_v51  ;;  %v2073_v31 = vrot.slane %v1037_v48, 10  ;;  %v4170_v62 = vstv %s4163_s17  ;;  %v2077_v52 = vrot.slane %v1069_v43, 10 }
  0xf6   :  { %v1066_v17 = vmul.f32 %v4170_v62, %v2957_v51  ;;  %v4172_v57 = vstv %s4108_s27  ;;  %v3090_v35 = vadd.f32 %v2097_v58, %v1248_v34  ;;  %v4173_v48 = vstv %s4165_s8  ;;  %s4177_s27 = sld [smem:[#allocation46_spill]] }
  0xf7   :  { %v1101_v36 = vmul.f32 %v4172_v57, %v2946_v18  ;;  %v3092_v6 = vadd.f32 %v2073_v31, %v1034_v9  ;;  %v1430_v3 = vmul.f32 %v4173_v48, %v3070_v26  ;;  %v2117_v47 = vrot.slane %v1433_v14, 10 }
  0xf8   :  { %v3097_v30 = vadd.f32 %v2077_v52, %v1066_v17  ;;  %v4175_v62 = vstv %s4167_s24  ;;  %v4176_v57 = vstv %s4168_s23  ;;  %v984_v34 = vadd.f32 %v2066_v53, %v2681_v25 }
  0xf9   :  { %v1098_v43 = vmul.f32 %v4175_v62, %v2957_v51  ;;  %v2081_v8 = vrot.slane %v1101_v36, 10  ;;  %v1219_v59 = vmul.f32 %v4176_v57, %v2978_v1  ;;  %v3108_v58 = vadd.f32 %v2117_v47, %v1430_v3 }
  0xfa   :  { %v3974_v9 = vstv %s3025_s6  ;;  %v3975_v31 = vstv %s3033_s20  ;;  %v4178_v17 = vstv %s4171_s5  ;;  %v866_v25 = vadd.f32 %v2054_v20, %v2686_v46  ;;  %989 = vrot.lane.b32.xlu2 %v984_v34, %s4112_s18 }
  0xfb   :  { %v3112_v14 = vadd.f32 %v2081_v8, %v1098_v43  ;;  %v1216_v52 = vmul.f32 %v4178_v17, %v3001_v24  ;;  %v2093_v36 = vrot.slane %v1219_v59, 10  ;;  %v922_v48 = vmul.f32 %v3975_v31, %v2733_v19 }
  0xfc   :  { %v4180_v3 = vstv %s4138_s30  ;;  %v1346_v53 = vstv %s3045_s2  ;;  %v4181_v8 = vstv %s4174_s25  ;;  %v919_v10 = vmul.f32 %v3974_v9, %v2615_v15  ;;  %871 = vrot.lane.b32.xlu1 %v866_v25, %s4147_s1  ;;  %s4185_s30 = sld [smem:[#allocation67_spill]] }
  0xfd   :  { %v1006_v12 = vmul.f32 %v4180_v3, %v2733_v19  ;;  %v1283_v47 = vmul.f32 %v4181_v8, %v2978_v1  ;;  %v3133_v59 = vadd.f32 %v2093_v36, %v1216_v52  ;;  %v2058_v46 = vrot.slane %v922_v48, 10  ;;  %v3148_v52 = vld [vmem:[#allocation2 + $0x8] sm:$0xc]  ;;  %s3421_s2 = sld [smem:[#allocation3 + $0x3e]] }
  0xfe   :  { %v4183_v20 = vstv %s4177_s27  ;;  %v2082_v62 = vrot.slane %v2839_v4, 10  ;;  %v1464_v43 = vstv %s3074_s21  ;;  %v4184_v38 = vstv %s4179_s3  ;;  %s3446_s21 = sld [smem:[#allocation3 + $0x2f]] }
  0xff   :  { %v1315_v19 = vmul.f32 %v4183_v20, %v2978_v1  ;;  %v1280_v57 = vmul.f32 %v4184_v38, %v3001_v24  ;;  %v2101_v34 = vrot.slane %v1283_v47, 10  ;;  %v2078_v17 = vrot.slane %v2844_v13, 10 }
 0x100   :  { %v3150_v36 = vadd.f32 %v2058_v46, %v919_v10  ;;  %v4187_v48 = vstv %s4182_s11  ;;  %v4189_v4 = vstv %s4167_s24  ;;  %v2070_v20 = vrot.slane %v1006_v12, 10  ;;  %s2132_s24 = sld [smem:[#allocation3 + $0x59]] }
 0x101   :  { %v1312_v3 = vmul.f32 %v4187_v48, %v3001_v24  ;;  %v2105_v25 = vrot.slane %v1315_v19, 10  ;;  %v1099_v8 = vmul.f32 %v4189_v4, %v2615_v15  ;;  %v3158_v38 = vadd.f32 %v2101_v34, %v1280_v57 }
 0x102   :  { %4186 = vst [vmem:[#allocation72_spill] sm:$0xff] %v3150_v36  ;;  %v1347_v47 = vmul.f32 %v1346_v53, %v2978_v1  ;;  %v4190_v13 = vstv %s4163_s17  ;;  %v4191_v10 = vstv %s4141_s14  ;;  %v1465_v48 = vmul.f32 %v1464_v43, %v3043_v37  ;;  %s3252_s14 = sld [smem:[#allocation3 + $0x6]] }
 0x103   :  { %v1067_v9 = vmul.f32 %v4190_v13, %v2615_v15  ;;  %v1003_v46 = vmul.f32 %v4191_v10, %v2615_v15  ;;  %v3167_v31 = vadd.f32 %v2105_v25, %v1312_v3  ;;  %v1112_v19 = vadd.f32 %v2082_v62, %v1099_v8  ;;  %s3431_s17 = sld [smem:[#allocation3 + $0xd]] }
 0x104   :  { %v4192_v0 = vstv %s4174_s25  ;;  %v4193_v12 = vstv %s4185_s30  ;;  %v2109_v34 = vrot.slane %v1347_v47, 10  ;;  %v4194_v36 = vstv %s4168_s23  ;;  %s3451_s23 = sld [smem:[#allocation3 + $0x28]] }
 0x105   :  { %v1284_v4 = vmul.f32 %v4192_v0, %v3148_v52  ;;  %v1344_v57 = vmul.f32 %v4193_v12, %v3001_v24  ;;  %v1080_v5 = vadd.f32 %v2078_v17, %v1067_v9  ;;  %v1220_v13 = vmul.f32 %v4194_v36, %v3148_v52  ;;  %1117 = vrot.lane.b32.xlu0 %v1112_v19, %s4147_s1  ;;  %v3192_v17 = vld [vmem:[#allocation2 + $0x8] sm:$0x3]  ;;  %s3472_s25 = sld [smem:[#allocation3 + $0x53]] }
 0x106   :  { %v4195_v15 = vstv %s4188_s26  ;;  %v2121_v25 = vrot.slane %v1465_v48, 10  ;;  %v1016_v10 = vadd.f32 %v2070_v20, %v1003_v46  ;;  %v4196_v62 = vstv %s4143_s22  ;;  %s2140_s22 = sld [smem:[#allocation3 + $0x37]] }
 0x107   :  { %v1462_v3 = vmul.f32 %v4195_v15, %v3070_v26  ;;  %v1188_v8 = vmul.f32 %v4196_v62, %v3148_v52  ;;  %v3185_v0 = vadd.f32 %v2109_v34, %v1344_v57  ;;  %1085 = vrot.lane.b32.xlu2 %v1080_v5, %s4129_s28  ;;  %v2102_v36 = vrot.slane %v1284_v4, 10 }
 0x108   :  { %1021 = vrot.lane.b32.xlu1 %v1016_v10, %s4130_s10  ;;  %v2094_v47 = vrot.slane %v1220_v13, 10  ;;  %v4197_v46 = vstv %s4179_s3  ;;  %v4198_v12 = vstv %s4171_s5  ;;  %v4199_v19 = vstv %s4148_s13  ;;  %s3381_s13 = sld [smem:[#allocation3 + $0x4b]] }
 0x109   :  { %v3189_v9 = vadd.f32 %v2121_v25, %v1462_v3  ;;  %v2090_v20 = vrot.slane %v1188_v8, 10  ;;  %v1281_v48 = vmul.f32 %v4197_v46, %v3192_v17  ;;  %v1217_v57 = vmul.f32 %v4198_v12, %v3192_v17  ;;  %s3456_s5 = sld [smem:[#allocation3 + $0x4c]] }
 0x10a   :  { %v1185_v5 = vmul.f32 %v4199_v19, %v3192_v17  ;;  %v1348_v3 = vmul.f32 %v1346_v53, %v3148_v52  ;;  %v4200_v4 = vstv %s4177_s27  ;;  %v4201_v10 = vstv %s2653_s7  ;;  %s3236_s7 = sld [smem:[#allocation3 + $0x35]] }
 0x10b   :  { %v1294_v34 = vadd.f32 %v2102_v36, %v1281_v48  ;;  %v1230_v15 = vadd.f32 %v2094_v47, %v1217_v57  ;;  %v1316_v13 = vmul.f32 %v4200_v4, %v3148_v52  ;;  %v1252_v62 = vmul.f32 %v4201_v10, %v3148_v52  ;;  %v3216_v48 = vld [vmem:[#allocation2 + $0x8] sm:$0xc]  ;;  %s3475_s27 = sld [smem:[#allocation3 + $0x1b]] }
 0x10c   :  { %v1198_v25 = vadd.f32 %v2090_v20, %v1185_v5  ;;  %v2110_v8 = vrot.slane %v1348_v3, 10  ;;  %v4202_v47 = vstv %s2892_s0  ;;  %v4203_v20 = vstv %s4185_s30  ;;  %s3245_s0 = sld [smem:[#allocation3 + $0x4]] }
 0x10d   :  { %1299 = vrot.lane.b32.xlu0 %v1294_v34, %s4111_s9  ;;  %v2106_v36 = vrot.slane %v1316_v13, 10  ;;  %v429_v53 = vmul.f32 %v4202_v47, %v2823_v2  ;;  %v2098_v46 = vrot.slane %v1252_v62, 10  ;;  %v1345_v12 = vmul.f32 %v4203_v20, %v3192_v17  ;;  %s3483_s3 = sld [smem:[#allocation3 + $0x22]] }
 0x10e   :  { %v4204_v57 = vstv %s4182_s11  ;;  %v4205_v5 = vstv %s2858_s12  ;;  %v4206_v4 = vstv %s4158_s15  ;;  %v1466_v2 = vmul.f32 %v1464_v43, %v3216_v48  ;;  %s3240_s12 = sld [smem:[#allocation3 + $0x36]] }
 0x10f   :  { %1235 = vrot.lane.b32.xlu2 %v1230_v15, %s4112_s18  ;;  %v1313_v19 = vmul.f32 %v4204_v57, %v3192_v17  ;;  %v426_v34 = vmul.f32 %v4205_v5, %v2655_v56  ;;  %v2001_v15 = vrot.slane %v429_v53, 10  ;;  %v1249_v3 = vmul.f32 %v4206_v4, %v3192_v17  ;;  %v3243_v56 = vld [vmem:[#allocation2 + $0x8] sm:$0x3]  ;;  %s3401_s15 = sld [smem:[#allocation3 + $0x52]] }
 0x110   :  { %1203 = vrot.lane.b32.xlu1 %v1198_v25, %s4104_s29  ;;  %v1358_v13 = vadd.f32 %v2110_v8, %v1345_v12  ;;  %v4207_v47 = vstv %s2774_s16  ;;  %v2122_v43 = vrot.slane %v1466_v2, 10  ;;  %s3247_s16 = sld [smem:[#allocation3 + $0x5]]  ;;  %v1166_v5 = vstv %s3236_s7  ;;  %v3271_v2 = vld [vmem:[#allocation2] sm:$0xcc] }
 0x111   :  { %v1326_v25 = vadd.f32 %v2106_v36, %v1313_v19  ;;  %v3231_v10 = vadd.f32 %v2001_v15, %v426_v34  ;;  %v1262_v62 = vadd.f32 %v2098_v46, %v1249_v3  ;;  %v1434_v20 = vmul.f32 %v4207_v47, %v3216_v48  ;;  %s3489_s11 = sld [smem:[#allocation3 + $0x45]] }
 0x112   :  { %v4208_v36 = vstv %s4188_s26  ;;  %v4209_v46 = vstv %s4165_s8  ;;  %v3979_v15 = vstv %s3245_s0  ;;  %v4210_v3 = vstv %s3033_s20  ;;  %s3412_s20 = sld [smem:[#allocation3 + $0x21]] }
 0x113   :  { %v2118_v8 = vrot.slane %v1434_v20, 10  ;;  %v1463_v53 = vmul.f32 %v4208_v36, %v3243_v56  ;;  %v1431_v12 = vmul.f32 %v4209_v46, %v3243_v56  ;;  %v4211_v47 = vstv %s3025_s6  ;;  %s3391_s6 = sld [smem:[#allocation3 + $0x1a]] }
 0x114   :  { %v3981_v34 = vstv %s3240_s12  ;;  %v918_v20 = vmul.f32 %v4211_v47, %v2957_v51  ;;  %s3437_s8 = sld [smem:[#allocation3 + $0x60]] }
 0x115   :  { %1363 = vrot.lane.b32.xlu0 %v1358_v13, %s4147_s1  ;;  %v1476_v57 = vadd.f32 %v2122_v43, %v1463_v53  ;;  %v1444_v19 = vadd.f32 %v2118_v8, %v1431_v12  ;;  %v921_v13 = vmul.f32 %v4210_v3, %v2946_v18  ;;  %v1164_v8 = vmul.f32 %v3979_v15, %v3001_v24  ;;  %v3284_v53 = vld [vmem:[#allocation2] sm:$0x33]  ;;  %v3286_v18 = vld [vmem:[#allocation2 + $0x8] sm:$0x3]  ;;  %s3496_s30 = sld [smem:[#allocation3 + $0x14]] }
 0x116   :  { %v3978_v4 = vstv %s3247_s16  ;;  %v1655_v12 = vstv %s3252_s14  ;;  %s3507_s26 = sld [smem:[#allocation3 + $0x31]] }
 0x117   :  { %1331 = vrot.lane.b32.xlu2 %v1326_v25, %s4129_s28  ;;  %v1167_v25 = vmul.f32 %v1166_v5, %v2978_v1  ;;  %v2057_v43 = vrot.slane %v921_v13, 10  ;;  %v1410_v1 = vmul.f32 %v3978_v4, %v3070_v26  ;;  %s3510_s7 = sld [smem:[#allocation3 + $0x61]] }
 0x118   :  { %1267 = vrot.lane.b32.xlu1 %v1262_v62, %s4130_s10  ;;  %v3273_v62 = vld [vmem:[#allocation2 + $0x8] sm:$0xc]  ;;  %s3524_s14 = sld [smem:[#allocation3]] }
 0x119   :  { %v2085_v36 = vrot.slane %v1167_v25, 10  ;;  %v1656_v25 = vmul.f32 %v1655_v12, %v3284_v53 }
 0x11b   :  { %v3294_v3 = vadd.f32 %v2085_v36, %v1164_v8 }
 0x11d   :  { %298 = vrot.lane.b32.xlu0 %v2887_v50, %s4130_s10  ;;  %v1413_v50 = vmul.f32 %v3981_v34, %v3043_v37  ;;  %4213 = vst [vmem:[#allocation74_spill] sm:$0xff] %v3294_v3 }
 0x11f   :  { %1481 = vrot.lane.b32.xlu2 %v1476_v57, %s4112_s18  ;;  %v2113_v46 = vrot.slane %v1413_v50, 10  ;;  %v1658_v57 = vstv %s2140_s22  ;;  %v1657_v50 = vmul.f32 %v1655_v12, %v3286_v18 }
 0x120   :  { %1449 = vrot.lane.b32.xlu1 %v1444_v19, %s4104_s29  ;;  %v3292_v19 = vadd.f32 %v2057_v43, %v918_v20  ;;  %v1659_v51 = vmul.f32 %v1658_v57, %v3271_v2  ;;  %v1660_v13 = vmul.f32 %v1658_v57, %v3273_v62  ;;  %v3308_v43 = vpop.permute.xlu2 %269 }
 0x121   :  { %v3298_v24 = vadd.f32 %v2113_v46, %v1410_v1  ;;  %v1496_v1 = vstv %s3381_s13 }
 0x122   :  { %4212 = vst [vmem:[#allocation73_spill] sm:$0xff] %v3292_v19  ;;  %v2142_v47 = vrot.slane %v1660_v13, 10  ;;  %v2141_v20 = vrot.slane %v1659_v51, 10  ;;  %v1528_v13 = vstv %s3401_s15 }
 0x123   :  { %4214 = vst [vmem:[#allocation75_spill] sm:$0xff] %v3298_v24 }
 0x124   :  { %v3310_v8 = vadd.f32 %v2142_v47, %v1657_v50  ;;  %v3312_v36 = vadd.f32 %v2141_v20, %v1656_v25  ;;  %v1525_v25 = vstv %s3412_s20  ;;  %s4250_s20 = smov 8  }
 0x125   :  { %391 = vrot.lane.b32.xlu0 %v2890_v7, %s4147_s1 }
 0x126   :  { %4215 = vst [vmem:[#allocation76_spill] sm:$0xff] %v3310_v8 }
 0x127   :  { %267 = vrot.lane.b32.xlu2 %v2856_v44, %s4112_s18  ;;  %4216 = vst [vmem:[#allocation77_spill] sm:$0xff] %v3312_v36 }
 0x128   :  { %236 = vrot.lane.b32.xlu1 %v2876_v60, %s4104_s29  ;;  %v3320_v44 = vpop.permute.xlu2 %362 }
 0x12d   :  { %527 = vrot.lane.b32.xlu0 %v2895_v63, %s4130_s10 }
 0x12f   :  { %329 = vrot.lane.b32.xlu2 %v2904_v22, %s4111_s9 }
 0x130   :  { %360 = vrot.lane.b32.xlu1 %v2907_v54, %s4129_s28  ;;  %v3328_v60 = vpop.permute.xlu2 %497 }
 0x135   :  { %623 = vrot.lane.b32.xlu0 %v2914_v27, %s4147_s1  ;;  %v3336_v7 = vpop.permute.xlu0 %331 }
 0x136   :  { %v3340_v22 = vpop.permute.xlu1 %238 }
 0x137   :  { %463 = vrot.lane.b32.xlu2 %v2917_v49, %s4104_s29 }
 0x138   :  { %495 = vrot.lane.b32.xlu1 %v2932_v28, %s4112_s18  ;;  %v3338_v63 = vpop.permute.xlu2 %593 }
 0x13d   :  { %773 = vrot.lane.b32.xlu0 %v2941_v21, %s4130_s10  ;;  %v3348_v54 = vpop.permute.xlu0 %465 }
 0x13e   :  { %v3352_v49 = vpop.permute.xlu1 %300 }
 0x13f   :  { %559 = vrot.lane.b32.xlu2 %v2949_v42, %s4111_s9 }
 0x140   :  { %591 = vrot.lane.b32.xlu1 %v2962_v39, %s4129_s28  ;;  %v3350_v27 = vpop.permute.xlu2 %743  ;;  %v474_v39 = vadd.f32 %v3348_v54, %v3010_v40 }
 0x141   :  { %4217 = vst [vmem:[#allocation78_spill] sm:$0xff] %v3350_v27 }
 0x145   :  { %869 = vrot.lane.b32.xlu0 %v2964_v45, %s4147_s1  ;;  %v3360_v28 = vpop.permute.xlu0 %561 }
 0x146   :  { %v3364_v42 = vpop.permute.xlu1 %393 }
 0x147   :  { %709 = vrot.lane.b32.xlu2 %v2970_v55, %s4104_s29 }
 0x148   :  { %741 = vrot.lane.b32.xlu1 %v2996_v29, %s4112_s18  ;;  %v3362_v21 = vpop.permute.xlu2 %839  ;;  %v506_v29 = vadd.f32 %v3328_v60, %v474_v39 }
 0x14d   :  { %1019 = vrot.lane.b32.xlu0 %v3012_v33, %s4130_s10  ;;  %v3374_v45 = vpop.permute.xlu0 %711 }
 0x14e   :  { %v3379_v33 = vpop.permute.xlu1 %529 }
 0x14f   :  { %805 = vrot.lane.b32.xlu2 %v3017_v16, %s4111_s9  ;;  %v538_v40 = vadd.f32 %v3379_v33, %v506_v29  ;;  %v1678_v29 = vstv %s3421_s2  ;;  %s4251_s2 = smov 128  }
 0x150   :  { %837 = vrot.lane.b32.xlu1 %v3027_v61, %s4129_s28  ;;  %v1680_v34 = vmul.f32 %v1678_v29, %v3273_v62 }
 0x151   :  { %v570_v16 = vadd.f32 %v3360_v28, %v538_v40 }
 0x154   :  { %v3376_v55 = vpop.permute.xlu2 %989 }
 0x155   :  { %1201 = vrot.lane.b32.xlu0 %v3035_v41, %s4104_s29  ;;  %4218 = vst [vmem:[#allocation79_spill] sm:$0xff] %v3376_v55  ;;  %v3393_v61 = vpop.permute.xlu0 %807 }
 0x156   :  { %4219 = vst [vmem:[#allocation80_spill] sm:$0xff] %v3393_v61 }
 0x157   :  { %955 = vrot.lane.b32.xlu2 %v3047_v11, %s4104_s29  ;;  %v602_v11 = vadd.f32 %v3338_v63, %v570_v16  ;;  %v1529_v16 = vmul.f32 %v1528_v13, %v3043_v37 }
 0x158   :  { %987 = vrot.lane.b32.xlu1 %v3062_v32, %s4112_s18  ;;  %v3398_v32 = vpop.permute.xlu1 %625 }
 0x15d   :  { %1265 = vrot.lane.b32.xlu0 %v3090_v35, %s4130_s10  ;;  %v634_v35 = vadd.f32 %v3398_v32, %v602_v11  ;;  %v3414_v46 = vpop.permute.xlu0 %957  ;;  %v1498_v11 = vmul.f32 %v1496_v1, %v3216_v48 }
 0x15f   :  { %1051 = vrot.lane.b32.xlu2 %v3092_v6, %s4111_s9  ;;  %644 = vst [vmem:[#allocation1 + $0x10] ss:$2 sm:$0xff] %v634_v35  ;;  %v1497_v6 = vmul.f32 %v1496_v1, %v3043_v37  ;;  %v3980_v35 = vstv %s3431_s17 }
 0x160   :  { %1083 = vrot.lane.b32.xlu1 %v3097_v30, %s4129_s28  ;;  %v1493_v30 = vstv %s3391_s6  ;;  %v3418_v51 = vpop.permute.xlu1 %775  ;;  %s4247_s6 = sld [smem:[#allocation83_spill]] }
 0x161   :  { %v3395_v41 = vpop.permute.xlu2 %1085  ;;  %v2125_v57 = vrot.slane %v1497_v6, 10  ;;  %4220 = vst [vmem:[#allocation81_spill] sm:$0xff] %v3418_v51 }
 0x165   :  { %1447 = vrot.lane.b32.xlu0 %v3108_v58, %s4104_s29  ;;  %v1494_v58 = vmul.f32 %v1493_v30, %v3070_v26  ;;  %v3433_v50 = vpop.permute.xlu0 %1053 }
 0x166   :  { %s1958_s15 = sshll.u32 %s4247_s6, 4  ;;  %s1959_s15 = int_to_ptr.hbm [resolvable:$true] %s1958_s15 }
 0x167   :  { %1115 = vrot.lane.b32.xlu2 %v3112_v14, %s4147_s1  ;;  %v1507_v14 = vadd.f32 %v2125_v57, %v1494_v58 }
 0x168   :  { %1233 = vrot.lane.b32.xlu1 %v3133_v59, %s4112_s18  ;;  %v1530_v59 = vmul.f32 %v1528_v13, %v3216_v48  ;;  %v2129_v13 = vrot.slane %v1529_v16, 10 }
 0x169   :  { %v3416_v12 = vpop.permute.xlu2 %1235 }
 0x16a   :  { %v2130_v20 = vrot.slane %v1530_v59, 10  ;;  %v1592_v59 = vstv %s3437_s8 }
 0x16d   :  { %1511 = vrot.lane.b32.xlu0 %v1507_v14, %s4130_s10  ;;  %v2126_v14 = vrot.slane %v1498_v11, 10 }
 0x16e   :  { %v3439_v39 = vpop.permute.xlu1 %871 }
 0x16f   :  { %1297 = vrot.lane.b32.xlu2 %v3158_v38, %s4111_s9  ;;  %v1527_v38 = vmul.f32 %v1525_v25, %v3243_v56 }
 0x170   :  { %1329 = vrot.lane.b32.xlu1 %v3167_v31, %s4129_s28  ;;  %v1679_v31 = vmul.f32 %v1678_v29, %v3271_v2  ;;  %v720_v29 = vadd.f32 %v3374_v45, %v3082_v23  ;;  %v2146_v23 = vrot.slane %v1680_v34, 10 }
 0x171   :  { %v3435_v47 = vpop.permute.xlu2 %1331  ;;  %v1540_v40 = vadd.f32 %v2130_v20, %v1527_v38  ;;  %v1676_v20 = vmul.f32 %v3980_v35, %v3284_v53  ;;  %v1495_v38 = vmul.f32 %v1493_v30, %v3243_v56  ;;  %v1589_v30 = vstv %s3446_s21 }
 0x172   :  { %v2145_v1 = vrot.slane %v1679_v31, 10  ;;  %v1594_v31 = vmul.f32 %v1592_v59, %v3216_v48  ;;  %v1593_v35 = vmul.f32 %v1592_v59, %v3043_v37  ;;  %v752_v34 = vadd.f32 %v3350_v27, %v720_v29 }
 0x173   :  { %v1508_v11 = vadd.f32 %v2126_v14, %v1495_v38  ;;  %v3986_v29 = vstv %s3510_s7 }
 0x174   :  { %v2138_v14 = vrot.slane %v1594_v31, 10 }
 0x175   :  { %1545 = vrot.lane.b32.xlu0 %v1540_v40, %s4111_s9  ;;  %v1689_v40 = vadd.f32 %v2145_v1, %v1676_v20  ;;  %v3983_v1 = vstv %s3456_s5 }
 0x176   :  { %v1743_v31 = vmul.f32 %v3983_v1, %v3271_v2  ;;  %v4225_v1 = vstv %s3247_s16  ;;  %s3565_s16 = sld [smem:[#allocation3 + $0x5a]] }
 0x177   :  { %1361 = vrot.lane.b32.xlu2 %v3185_v0, %s4147_s1  ;;  %v3458_v6 = vpop.permute.xlu0 %1117  ;;  %v1560_v0 = vstv %s2132_s24  ;;  %v1411_v24 = vmul.f32 %v4225_v1, %v3243_v56  ;;  %v204_v1 = vstv %s3507_s26 }
 0x178   :  { %1479 = vrot.lane.b32.xlu1 %v3189_v9, %s4112_s18  ;;  %v1526_v9 = vmul.f32 %v1525_v25, %v3070_v26  ;;  %v1562_v16 = vmul.f32 %v1560_v0, %v3216_v48  ;;  %v1561_v15 = vmul.f32 %v1560_v0, %v3043_v37  ;;  %v1557_v25 = vstv %s3451_s23 }
 0x179   :  { %v3460_v57 = vpop.permute.xlu2 %1481  ;;  %v4222_v37 = vstv %s3240_s12  ;;  %s3547_s12 = sld [smem:[#allocation3 + $0x30]] }
 0x17a   :  { %4221 = vst [vmem:[#allocation82_spill] sm:$0xff] %v3460_v57  ;;  %v3462_v58 = vpop.permute.xlu1 %1021  ;;  %v1539_v4 = vadd.f32 %v2129_v13, %v1526_v9  ;;  %v2134_v0 = vrot.slane %v1562_v16, 10  ;;  %v2133_v38 = vrot.slane %v1561_v15, 10  ;;  %v1558_v16 = vmul.f32 %v1557_v25, %v3070_v26 }
 0x17b   :  { %v1774_v15 = vstv %s3472_s25  ;;  %v3984_v57 = vstv %s3475_s27  ;;  %v1414_v59 = vmul.f32 %v4222_v37, %v3216_v48  ;;  %v4224_v37 = vstv %s3431_s17 }
 0x17c   :  { %v1571_v8 = vadd.f32 %v2133_v38, %v1558_v16  ;;  %v1776_v38 = vmul.f32 %v1774_v15, %v3273_v62  ;;  %v1740_v48 = vmul.f32 %v3984_v57, %v3284_v53 }
 0x17d   :  { %1693 = vrot.lane.b32.xlu0 %v1689_v40, %s4104_s29  ;;  %v1591_v40 = vmul.f32 %v1589_v30, %v3243_v56  ;;  %v2114_v57 = vrot.slane %v1414_v59, 10  ;;  %v199_v59 = vld [vmem:[#allocation2] sm:$0xcc] }
 0x17f   :  { %1543 = vrot.lane.b32.xlu2 %v1539_v4, %s4111_s9  ;;  %v3485_v13 = vpop.permute.xlu0 %1299  ;;  %v1168_v4 = vmul.f32 %v1166_v5, %v3148_v52  ;;  %v1604_v52 = vadd.f32 %v2138_v14, %v1591_v40  ;;  %v4223_v14 = vstv %s3245_s0  ;;  %s3559_s0 = sld [smem:[#allocation3 + $0x29]] }
 0x180   :  { %1513 = vrot.lane.b32.xlu1 %v1508_v11, %s4130_s10  ;;  %v1559_v11 = vmul.f32 %v1557_v25, %v3243_v56  ;;  %v2153_v25 = vrot.slane %v1743_v31, 10  ;;  %v1710_v31 = vstv %s3489_s11  ;;  %v784_v56 = vadd.f32 %v3418_v51, %v752_v34 }
 0x181   :  { %v3487_v20 = vpop.permute.xlu2 %267  ;;  %v2086_v36 = vrot.slane %v1168_v4, 10  ;;  %v2137_v4 = vrot.slane %v1593_v35, 10  ;;  %v1771_v35 = vstv %s3483_s3  ;;  %v202_v34 = vstv %s3524_s14 }
 0x182   :  { %v3494_v9 = vpop.permute.xlu1 %1203  ;;  %v1572_v5 = vadd.f32 %v2134_v0, %v1559_v11  ;;  %v1165_v0 = vmul.f32 %v4223_v14, %v3192_v17  ;;  %v1677_v14 = vmul.f32 %v4224_v37, %v3286_v18  ;;  %v1773_v3 = vmul.f32 %v1771_v35, %v3286_v18  ;;  %v4226_v37 = vld [vmem:[#allocation72_spill] sm:$0xff] }
 0x183   :  { %v966_v19 = vadd.f32 %v3414_v46, %v4226_v37  ;;  %v1772_v37 = vmul.f32 %v1771_v35, %v3284_v53 }
 0x184   :  { %v3534_v16 = vadd.f32 %v2086_v36, %v1165_v0  ;;  %v2158_v0 = vrot.slane %v1776_v38, 10 }
 0x185   :  { %1609 = vrot.lane.b32.xlu0 %v1604_v52, %s4147_s1  ;;  %v1707_v52 = vstv %s3496_s30 }
 0x186   :  { %v1708_v38 = vmul.f32 %v1707_v52, %v3284_v53 }
 0x187   :  { %1577 = vrot.lane.b32.xlu2 %v1572_v5, %s4129_s28  ;;  %v3526_v40 = vpop.permute.xlu0 %1363  ;;  %v1753_v5 = vadd.f32 %v2153_v25, %v1740_v48  ;;  %v1709_v25 = vmul.f32 %v1707_v52, %v3286_v18  ;;  %v1711_v48 = vmul.f32 %v1710_v31, %v3271_v2  ;;  %v205_v52 = vmul.f32 %v204_v1, %v199_v59 }
 0x188   :  { %1575 = vrot.lane.b32.xlu1 %v1571_v8, %s4129_s28  ;;  %v1590_v8 = vmul.f32 %v1589_v30, %v3070_v26  ;;  %v1712_v26 = vmul.f32 %v1710_v31, %v3273_v62  ;;  %v1690_v30 = vadd.f32 %v2146_v23, %v1677_v14  ;;  %v1775_v23 = vmul.f32 %v1774_v15, %v3271_v2  ;;  %v198_v14 = vld [vmem:[#allocation2] sm:$0x33] }
 0x189   :  { %v3528_v11 = vpop.permute.xlu2 %329  ;;  %v1786_v31 = vadd.f32 %v2158_v0, %v1773_v3  ;;  %v1839_v15 = vmul.f32 %v3986_v29, %v3271_v2  ;;  %v998_v3 = vadd.f32 %v3376_v55, %v966_v19  ;;  %v4228_v59 = vstv %s3456_s5 }
 0x18a   :  { %v3536_v17 = vpop.permute.xlu1 %1267  ;;  %v1603_v36 = vadd.f32 %v2137_v4, %v1590_v8  ;;  %v1424_v4 = vadd.f32 %v2114_v57, %v1411_v24  ;;  %v2150_v8 = vrot.slane %v1712_v26, 10  ;;  %v2149_v57 = vrot.slane %v1711_v48, 10 }
 0x18b   :  { %v203_v26 = vmul.f32 %v202_v34, %v198_v14  ;;  %v2157_v48 = vrot.slane %v1775_v23, 10  ;;  %v1030_v1 = vadd.f32 %v3462_v58, %v998_v3  ;;  %v1744_v29 = vmul.f32 %v4228_v59, %v3273_v62  ;;  %v4229_v34 = vld [vmem:[#allocation71_spill] sm:$0xff] }
 0x18c   :  { %v1722_v19 = vadd.f32 %v2150_v8, %v1709_v25  ;;  %v1974_v27 = vrot.slane %v205_v52, 10  ;;  %v4230_v3 = vstv %s2959_s19  ;;  %v4231_v25 = vstv %s3547_s12  ;;  %s2309_s19 = smov [#allocation10]  }
 0x18d   :  { %1757 = vrot.lane.b32.xlu0 %v1753_v5, %s4130_s10  ;;  %v468_v5 = vrot.slane %v3348_v54, 4  ;;  %v675_v51 = vmul.f32 %v4230_v3, %v4229_v34  ;;  %v1836_v8 = vmul.f32 %v4231_v25, %v3284_v53  ;;  %v1806_v52 = vstv %s3565_s16 }
 0x18e   :  { %v241_v25 = vrot.slane %v3340_v22, 4  ;;  %v333_v22 = vrot.slane %v3528_v11, 4 }
 0x18f   :  { %1607 = vrot.lane.b32.xlu2 %v1603_v36, %s4147_s1  ;;  %v3571_v36 = vpop.permute.xlu0 %298 }
 0x190   :  { %1695 = vrot.lane.b32.xlu1 %v1690_v30, %s4104_s29  ;;  %v816_v30 = vadd.f32 %v3393_v61, %v784_v56  ;;  %v1721_v61 = vadd.f32 %v2149_v57, %v1708_v38  ;;  %v1785_v38 = vadd.f32 %v2157_v48, %v1772_v37  ;;  %v210_v37 = vadd.f32 %v1974_v27, %v203_v26  ;;  %s2303_s29 = smov 127  }
 0x191   :  { %v464_v24 = vpop.permute.xlu2 %463  ;;  %v303_v27 = vrot.slane %v3352_v49, 4  ;;  %v334_v49 = vrot.slane %v3336_v7, 4 }
 0x192   :  { %v3578_v0 = vpop.permute.xlu1 %1449  ;;  %v467_v35 = vrot.slane %v464_v24, 4  ;;  %v848_v14 = vadd.f32 %v3362_v21, %v816_v30  ;;  %v2197_v30 = vld [vmem:[#allocation2] sm:$0x33] }
 0x193   :  { %v3581_v54 = vadd.f32 %v3578_v0, %v1424_v4  ;;  %v2165_v4 = vrot.slane %v1839_v15, 10 }
 0x194   :  { %v469_v56 = vsel %vm73_vm0, %v467_v35, %v468_v5  ;;  %v1803_v5 = vstv %s3559_s0  ;;  %v880_v15 = vadd.f32 %v3439_v39, %v848_v14  ;;  %v4233_v35 = vstv %s2929_s4  ;;  %s2308_s4 = smov 122  }
 0x195   :  { %4227 = vst [vmem:[#allocation72_spill] sm:$0xff] %v3581_v54  ;;  %v470_v55 = vsel %vm243_vm1, %v464_v24, %v469_v56  ;;  %1791 = vrot.lane.b32.xlu0 %v1786_v31, %s4111_s9  ;;  %v4232_v24 = vstv %s3475_s27  ;;  %v672_v31 = vmul.f32 %v2197_v30, %v4233_v35  ;;  %v271_v56 = vrot.slane %v3487_v20, 4  ;;  %v3624_v54 = vld.sshfl [vmem:[#allocation1 + $0x10] sm:$0xff pattern:$0x75316420] }
 0x196   :  { %v3592_v23 = vadd.f32 %v470_v55, %v3231_v10  ;;  %v1741_v57 = vmul.f32 %v4232_v24, %v3286_v18  ;;  %v1062_v10 = vadd.f32 %v3433_v50, %v1030_v1  ;;  %v2154_v55 = vrot.slane %v1744_v29, 10  ;;  %890 = vst [vmem:[#allocation1 + $0x10] ss:$2 sm:$0xff] %v880_v15 }
 0x197   :  { %1727 = vrot.lane.b32.xlu2 %v1722_v19, %s4112_s18  ;;  %v3613_v19 = vpop.permute.xlu0 %391  ;;  %v1849_v48 = vadd.f32 %v2165_v4, %v1836_v8  ;;  %v1805_v34 = vmul.f32 %v1803_v5, %v3286_v18  ;;  %v272_v14 = vrot.slane %v3308_v43, 4  ;;  %v2029_v1 = vrot.slane %v675_v51, 10 }
 0x198   :  { %1725 = vrot.lane.b32.xlu1 %v1721_v61, %s4112_s18  ;;  %v1808_v61 = vmul.f32 %v1806_v52, %v3273_v62  ;;  %v1807_v29 = vmul.f32 %v1806_v52, %v3271_v2  ;;  %v302_v24 = vrot.slane %v3571_v36, 4  ;;  %v1804_v35 = vmul.f32 %v1803_v5, %v3284_v53  ;;  %s2305_s18 = smov 125  }
 0x199   :  { %v3615_v59 = vpop.permute.xlu2 %559  ;;  %v1094_v26 = vadd.f32 %v3395_v41, %v1062_v10  ;;  %v1754_v43 = vadd.f32 %v2154_v55, %v1741_v57  ;;  %v1212_v51 = vadd.f32 %v3494_v9, %v3534_v16  ;;  %v273_v2 = vsel %vm73_vm0, %v271_v56, %v272_v14 }
 0x19a   :  { %v237_v3 = vpop.permute.xlu1 %236  ;;  %v685_v5 = vadd.f32 %v2029_v1, %v672_v31  ;;  %v2162_v8 = vrot.slane %v1808_v61, 10  ;;  %v2161_v52 = vrot.slane %v1807_v29, 10  ;;  %v304_v57 = vsel %vm73_vm0, %v302_v24, %v303_v27 }
 0x19b   :  { %v240_v30 = vrot.slane %v237_v3, 4  ;;  %v365_v16 = vrot.slane %v3320_v44, 4  ;;  %v1126_v10 = vadd.f32 %v3458_v6, %v1094_v26  ;;  %v275_v55 = vsel %vm274_vm2, %v3487_v20, %v273_v2 }
 0x19c   :  { %v1244_v7 = vadd.f32 %v3416_v12, %v1212_v51  ;;  %v335_v31 = vsel %vm73_vm0, %v333_v22, %v334_v49  ;;  %v395_v56 = vrot.slane %v3613_v19, 4  ;;  %v714_v44 = vrot.slane %v3374_v45, 4 }
 0x19d   :  { %v242_v4 = vsel %vm73_vm0, %v240_v30, %v241_v25  ;;  %1853 = vrot.lane.b32.xlu0 %v1849_v48, %s4147_s1  ;;  %v3651_v24 = vld.sshfl [vmem:[#allocation1 + $0x10] sm:$0xff pattern:$0x75316420]  ;;  %v337_v30 = vsel %vm336_vm5, %v3528_v11, %v335_v31  ;;  %v1818_v45 = vadd.f32 %v2162_v8, %v1805_v34  ;;  %v1817_v22 = vadd.f32 %v2161_v52, %v1804_v35 }
 0x19e   :  { %v244_v53 = vsel %vm243_vm1, %v237_v3, %v242_v4  ;;  %v306_v3 = vsel %vm305_vm4, %v3571_v36, %v304_v57  ;;  %v1276_v61 = vadd.f32 %v3536_v17, %v1244_v7  ;;  %1136 = vst [vmem:[#allocation1 + $0x10] ss:$2 sm:$0xff] %v1126_v10  ;;  %v4234_v4 = vstv %s3510_s7 }
 0x19f   :  { %v246_v15 = vadd.f32 %v244_v53, %v210_v37  ;;  %1789 = vrot.lane.b32.xlu2 %v1785_v38, %s4111_s9  ;;  %v528_v48 = vpop.permute.xlu0 %527  ;;  %v396_v38 = vrot.slane %v3364_v42, 4  ;;  %v1840_v11 = vmul.f32 %v4234_v4, %v3273_v62  ;;  %v500_v35 = vrot.slane %v3328_v60, 4  ;;  %s2304_s9 = smov 126  }
 0x1a0   :  { %1759 = vrot.lane.b32.xlu1 %v1754_v43, %s4130_s10  ;;  %v1308_v53 = vadd.f32 %v3485_v13, %v1276_v61  ;;  %v531_v8 = vrot.slane %v528_v48, 4  ;;  %s2307_s10 = smov 123  }
 0x1a1   :  { %v277_v37 = vadd.f32 %v275_v55, %v246_v15  ;;  %v710_v14 = vpop.permute.xlu2 %709  ;;  %v397_v36 = vsel %vm73_vm0, %v395_v56, %v396_v38  ;;  %v2166_v62 = vrot.slane %v1840_v11, 10  ;;  %v563_v55 = vrot.slane %v3615_v59, 4 }
 0x1a2   :  { %v713_v20 = vrot.slane %v710_v14, 4  ;;  %v361_v1 = vpop.permute.xlu1 %360  ;;  %v399_v34 = vsel %vm398_vm7, %v3613_v19, %v397_v36  ;;  %v1340_v10 = vadd.f32 %v3435_v47, %v1308_v53  ;;  %v4235_v19 = vstv %s3547_s12 }
 0x1a3   :  { %v308_v29 = vadd.f32 %v306_v3, %v277_v37  ;;  %v364_v25 = vrot.slane %v361_v1, 4  ;;  %v1837_v31 = vmul.f32 %v4235_v19, %v3286_v18  ;;  %v564_v56 = vrot.slane %v3360_v28, 4 }
 0x1a4   :  { %v715_v42 = vsel %vm73_vm0, %v713_v20, %v714_v44  ;;  %v596_v36 = vrot.slane %v3338_v63, 4 }
 0x1a5   :  { %v716_v27 = vsel %vm243_vm1, %v710_v14, %v715_v42  ;;  %v339_v26 = vadd.f32 %v337_v30, %v308_v29  ;;  %v366_v43 = vsel %vm73_vm0, %v364_v25, %v365_v16  ;;  %v532_v16 = vrot.slane %v3379_v33, 4 }
 0x1a6   :  { %v3659_v51 = vadd.f32 %v716_v27, %v685_v5  ;;  %v368_v2 = vsel %vm367_vm6, %v361_v1, %v366_v43  ;;  %v1850_v38 = vadd.f32 %v2166_v62, %v1837_v31  ;;  %v1372_v33 = vadd.f32 %v3526_v40, %v1340_v10  ;;  %v4238_v62 = vld [vmem:[#allocation81_spill] sm:$0xff] }
 0x1a7   :  { %v370_v49 = vadd.f32 %v368_v2, %v339_v26  ;;  %1823 = vrot.lane.b32.xlu2 %v1818_v45, %s4129_s28  ;;  %v624_v57 = vpop.permute.xlu0 %623  ;;  %v533_v37 = vsel %vm73_vm0, %v531_v8, %v532_v16  ;;  %v565_v44 = vsel %vm73_vm0, %v563_v55, %v564_v56  ;;  %v960_v29 = vrot.slane %v3414_v46, 4  ;;  %v3691_v45 = vld.sshfl [vmem:[#allocation1 + $0x10] sm:$0xff pattern:$0x75316420] }
 0x1a8   :  { %1821 = vrot.lane.b32.xlu1 %v1817_v22, %s4129_s28  ;;  %v534_v20 = vsel %vm305_vm4, %v528_v48, %v533_v37  ;;  %v627_v18 = vrot.slane %v624_v57, 4  ;;  %v566_v25 = vsel %vm336_vm5, %v3615_v59, %v565_v44  ;;  %1382 = vst [vmem:[#allocation1 + $0x10] ss:$2 sm:$0xff] %v1372_v33  ;;  %v4236_v59 = vld [vmem:[#allocation73_spill] sm:$0xff]  ;;  %v778_v16 = vrot.slane %v4238_v62, 4  ;;  %s2306_s28 = smov 124  }
 0x1a9   :  { %v401_v5 = vadd.f32 %v399_v34, %v370_v49  ;;  %v3670_v15 = vpop.permute.xlu2 %805 }
 0x1aa   :  { %v496_v52 = vpop.permute.xlu1 %495  ;;  %v809_v10 = vrot.slane %v3670_v15, 4 }
 0x1ab   :  { %408 = vst [vmem:[#allocation1] ss:$2 sm:$0xff] %v401_v5  ;;  %v499_v7 = vrot.slane %v496_v52, 4 }
 0x1ad   :  { %v501_v14 = vsel %vm73_vm0, %v499_v7, %v500_v35  ;;  %v4237_v35 = vld [vmem:[#allocation78_spill] sm:$0xff]  ;;  %v4239_v7 = vld [vmem:[#allocation80_spill] sm:$0xff] }
 0x1ae   :  { %v502_v60 = vsel %vm274_vm2, %v496_v52, %v501_v14  ;;  %v746_v52 = vrot.slane %v4237_v35, 4  ;;  %v810_v19 = vrot.slane %v4239_v7, 4 }
 0x1af   :  { %v505_v3 = vadd.f32 %v502_v60, %v3592_v23  ;;  %v774_v28 = vpop.permute.xlu0 %773  ;;  %v628_v23 = vrot.slane %v3398_v32, 4 }
 0x1b0   :  { %1855 = vrot.lane.b32.xlu1 %v1850_v38, %s4147_s1  ;;  %v777_v32 = vrot.slane %v774_v28, 4  ;;  %v811_v37 = vsel %vm73_vm0, %v809_v10, %v810_v19  ;;  %s1956_s1 = sshll.u32 %s2309_s19, 4  ;;  %s1957_s1 = int_to_ptr.vmem [resolvable:$true] %s1956_s1 }
 0x1b1   :  { %v537_v1 = vadd.f32 %v534_v20, %v505_v3  ;;  %v956_v61 = vpop.permute.xlu2 %955  ;;  %v629_v43 = vsel %vm73_vm0, %v627_v18, %v628_v23  ;;  %v812_v3 = vsel %vm336_vm5, %v3670_v15, %v811_v37 }
 0x1b2   :  { %v959_v30 = vrot.slane %v956_v61, 4  ;;  %v592_v42 = vpop.permute.xlu1 %591  ;;  %v630_v63 = vsel %vm398_vm7, %v624_v57, %v629_v43  ;;  %v3706_v34 = vld.sshfl [vmem:[#allocation1] sm:$0xff pattern:$0x75316420]  ;;  %v4240_v43 = vld [vmem:[#allocation79_spill] sm:$0xff] }
 0x1b3   :  { %v569_v48 = vadd.f32 %v566_v25, %v537_v1  ;;  %v595_v27 = vrot.slane %v592_v42, 4  ;;  %v3708_v8 = vld.sshfl [vmem:[#allocation1 + $0x8] sm:$0xff pattern:$0x75316420]  ;;  %v842_v1 = vrot.slane %v3362_v21, 4 }
 0x1b4   :  { %v961_v26 = vsel %vm73_vm0, %v959_v30, %v960_v29 }
 0x1b5   :  { %v962_v46 = vsel %vm243_vm1, %v956_v61, %v961_v26  ;;  %v597_v2 = vsel %vm73_vm0, %v595_v27, %v596_v36  ;;  %v874_v61 = vrot.slane %v3439_v39, 4 }
 0x1b6   :  { %v3700_v22 = vadd.f32 %v962_v46, %v4236_v59  ;;  %v598_v4 = vsel %vm367_vm6, %v592_v42, %v597_v2  ;;  %v992_v46 = vrot.slane %v4240_v43, 4  ;;  %v1024_v2 = vrot.slane %v3462_v58, 4 }
 0x1b7   :  { %v601_v11 = vadd.f32 %v598_v4, %v569_v48  ;;  %v870_v49 = vpop.permute.xlu0 %869  ;;  %v1206_v48 = vrot.slane %v3494_v9, 4 }
 0x1b8   :  { %652 = vrot.lane.b32.xlu1 %v3624_v54, %s2303_s29  ;;  %v779_v54 = vsel %vm73_vm0, %v777_v32, %v778_v16  ;;  %v873_v38 = vrot.slane %v870_v49, 4 }
 0x1b9   :  { %v633_v53 = vadd.f32 %v630_v63, %v601_v11  ;;  %v1052_v55 = vpop.permute.xlu2 %1051  ;;  %v780_v60 = vsel %vm305_vm4, %v774_v28, %v779_v54  ;;  %v1056_v63 = vrot.slane %v3433_v50, 4  ;;  %v1088_v54 = vrot.slane %v3395_v41, 4 }
 0x1ba   :  { %v742_v5 = vpop.permute.xlu1 %741  ;;  %v1055_v59 = vrot.slane %v1052_v55, 4 }
 0x1bb   :  { %642 = vst [vmem:[#allocation1] ss:$2 sm:$0xff] %v633_v53  ;;  %v745_v57 = vrot.slane %v742_v5, 4 }
 0x1bc   :  { %v1057_v35 = vsel %vm73_vm0, %v1055_v59, %v1056_v63  ;;  %v1366_v59 = vrot.slane %v3526_v40, 4 }
 0x1bd   :  { %v747_v31 = vsel %vm73_vm0, %v745_v57, %v746_v52  ;;  %v1058_v57 = vsel %vm336_vm5, %v1052_v55, %v1057_v35 }
 0x1be   :  { %v748_v56 = vsel %vm274_vm2, %v742_v5, %v747_v31  ;;  %v1120_v31 = vrot.slane %v3458_v6, 4  ;;  %v1452_v6 = vrot.slane %v3578_v0, 4 }
 0x1bf   :  { %v751_v14 = vadd.f32 %v748_v56, %v3659_v51  ;;  %v1020_v44 = vpop.permute.xlu0 %1019 }
 0x1c0   :  { %898 = vrot.lane.b32.xlu1 %v3651_v24, %s2304_s9  ;;  %v875_v24 = vsel %vm73_vm0, %v873_v38, %v874_v61  ;;  %v1023_v21 = vrot.slane %v1020_v44, 4  ;;  %v1385_v61 = vld.sshfl [vmem:[#allocation1 + $0x10] sm:$0xff pattern:$0x75316420] }
 0x1c1   :  { %v783_v33 = vadd.f32 %v780_v60, %v751_v14  ;;  %v1116_v30 = vpop.permute.xlu2 %1115  ;;  %v876_v36 = vsel %vm398_vm7, %v870_v49, %v875_v24  ;;  %v4241_v49 = vld [vmem:[#allocation74_spill] sm:$0xff] }
 0x1c2   :  { %v838_v20 = vpop.permute.xlu1 %837  ;;  %v646_v18 = vld.sshfl [vmem:[#allocation1 + $0x8] sm:$0xff pattern:$0x75316420]  ;;  %v645_v28 = vld.sshfl [vmem:[#allocation1] sm:$0xff pattern:$0x75316420]  ;;  %v1025_v32 = vsel %vm73_vm0, %v1023_v21, %v1024_v2 }
 0x1c3   :  { %v815_v29 = vadd.f32 %v812_v3, %v783_v33  ;;  %v841_v51 = vrot.slane %v838_v20, 4  ;;  %650 = vrot.lane.b32.xlu0 %v646_v18, %s2303_s29  ;;  %648 = vrot.lane.b32.xlu2 %v645_v28, %s2303_s29  ;;  %v1119_v16 = vrot.slane %v1116_v30, 4  ;;  %v1334_v2 = vrot.slane %v3435_v47, 4 }
 0x1c5   :  { %v843_v25 = vsel %vm73_vm0, %v841_v51, %v842_v1  ;;  %v1270_v51 = vrot.slane %v3536_v17, 4 }
 0x1c6   :  { %v844_v15 = vsel %vm367_vm6, %v838_v20, %v843_v25 }
 0x1c7   :  { %v847_v42 = vadd.f32 %v844_v15, %v815_v29  ;;  %v1202_v39 = vpop.permute.xlu0 %1201  ;;  %v1238_v29 = vrot.slane %v3416_v12, 4 }
 0x1c8   :  { %v1205_v27 = vrot.slane %v1202_v39, 4 }
 0x1c9   :  { %v879_v23 = vadd.f32 %v876_v36, %v847_v42  ;;  %v1298_v62 = vpop.permute.xlu2 %1297  ;;  %v4242_v36 = vld [vmem:[#allocation75_spill] sm:$0xff] }
 0x1ca   :  { %v988_v26 = vpop.permute.xlu1 %987  ;;  %v1207_v11 = vsel %vm73_vm0, %v1205_v27, %v1206_v48  ;;  %v1301_v28 = vrot.slane %v1298_v62, 4 }
 0x1cb   :  { %888 = vst [vmem:[#allocation1] ss:$2 sm:$0xff] %v879_v23  ;;  %v991_v4 = vrot.slane %v988_v26, 4  ;;  %1144 = vrot.lane.b32.xlu0 %v3691_v45, %s2305_s18  ;;  %v1208_v9 = vsel %vm243_vm1, %v1202_v39, %v1207_v11  ;;  %v1026_v45 = vsel %vm305_vm4, %v1020_v44, %v1025_v32 }
 0x1cc   :  { %v1211_v5 = vadd.f32 %v1208_v9, %v4241_v49 }
 0x1cd   :  { %v993_v53 = vsel %vm73_vm0, %v991_v4, %v992_v46 }
 0x1ce   :  { %v994_v58 = vsel %vm274_vm2, %v988_v26, %v993_v53 }
 0x1cf   :  { %v997_v52 = vadd.f32 %v994_v58, %v3700_v22  ;;  %v1266_v50 = vpop.permute.xlu0 %1265  ;;  %v1121_v22 = vsel %vm73_vm0, %v1119_v16, %v1120_v31 }
 0x1d0   :  { %v1122_v33 = vsel %vm398_vm7, %v1116_v30, %v1121_v22  ;;  %v1269_v44 = vrot.slane %v1266_v50, 4  ;;  %v1302_v30 = vrot.slane %v3485_v13, 4 }
 0x1d1   :  { %v1029_v10 = vadd.f32 %v1026_v45, %v997_v52  ;;  %v1362_v20 = vpop.permute.xlu2 %1361 }
 0x1d2   :  { %v1084_v7 = vpop.permute.xlu1 %1083  ;;  %v892_v19 = vld.sshfl [vmem:[#allocation1 + $0x8] sm:$0xff pattern:$0x75316420]  ;;  %v891_v14 = vld.sshfl [vmem:[#allocation1] sm:$0xff pattern:$0x75316420]  ;;  %v1271_v0 = vsel %vm73_vm0, %v1269_v44, %v1270_v51  ;;  %v1303_v21 = vsel %vm73_vm0, %v1301_v28, %v1302_v30 }
 0x1d3   :  { %v1061_v56 = vadd.f32 %v1058_v57, %v1029_v10  ;;  %v1087_v37 = vrot.slane %v1084_v7, 4  ;;  %896 = vrot.lane.b32.xlu0 %v892_v19, %s2304_s9  ;;  %894 = vrot.lane.b32.xlu2 %v891_v14, %s2304_s9  ;;  %v1272_v39 = vsel %vm305_vm4, %v1266_v50, %v1271_v0  ;;  %v1365_v48 = vrot.slane %v1362_v20, 4  ;;  %v4244_v57 = vld [vmem:[#allocation72_spill] sm:$0xff] }
 0x1d4   :  { %v1304_v13 = vsel %vm336_vm5, %v1298_v62, %v1303_v21  ;;  %v4243_v62 = vld [vmem:[#allocation82_spill] sm:$0xff] }
 0x1d5   :  { %v1089_v60 = vsel %vm73_vm0, %v1087_v37, %v1088_v54  ;;  %v1367_v9 = vsel %vm73_vm0, %v1365_v48, %v1366_v59  ;;  %v1484_v16 = vrot.slane %v4243_v62, 4 }
 0x1d6   :  { %v1090_v38 = vsel %vm367_vm6, %v1084_v7, %v1089_v60  ;;  %v1368_v58 = vsel %vm398_vm7, %v1362_v20, %v1367_v9  ;;  %v1490_v7 = vadd.f32 %v4243_v62, %v4244_v57 }
 0x1d7   :  { %v1093_v55 = vadd.f32 %v1090_v38, %v1061_v56  ;;  %v1448_v3 = vpop.permute.xlu0 %1447 }
 0x1d8   :  { %v1451_v18 = vrot.slane %v1448_v3, 4 }
 0x1d9   :  { %v1125_v41 = vadd.f32 %v1122_v33, %v1093_v55  ;;  %v1544_v32 = vpop.permute.xlu2 %1543 }
 0x1da   :  { %v1234_v1 = vpop.permute.xlu1 %1233  ;;  %v1453_v25 = vsel %vm73_vm0, %v1451_v18, %v1452_v6  ;;  %v1547_v44 = vrot.slane %v1544_v32, 4 }
 0x1db   :  { %1134 = vst [vmem:[#allocation1] ss:$2 sm:$0xff] %v1125_v41  ;;  %v1237_v24 = vrot.slane %v1234_v1, 4  ;;  %1390 = vrot.lane.b32.xlu0 %v1385_v61, %s2306_s28  ;;  %v1454_v15 = vsel %vm243_vm1, %v1448_v3, %v1453_v25 }
 0x1dc   :  { %v1457_v12 = vadd.f32 %v1454_v15, %v4242_v36 }
 0x1dd   :  { %v1239_v42 = vsel %vm73_vm0, %v1237_v24, %v1238_v29 }
 0x1de   :  { %v1240_v17 = vsel %vm274_vm2, %v1234_v1, %v1239_v42 }
 0x1df   :  { %v1243_v23 = vadd.f32 %v1240_v17, %v1211_v5  ;;  %v1512_v26 = vpop.permute.xlu0 %1511 }
 0x1e0   :  { %v1515_v31 = vrot.slane %v1512_v26, 4 }
 0x1e1   :  { %v1275_v27 = vadd.f32 %v1272_v39, %v1243_v23  ;;  %v1578_v45 = vpop.permute.xlu2 %1577 }
 0x1e2   :  { %v1330_v43 = vpop.permute.xlu1 %1329  ;;  %v1138_v46 = vld.sshfl [vmem:[#allocation1 + $0x8] sm:$0xff pattern:$0x75316420]  ;;  %v1137_v63 = vld.sshfl [vmem:[#allocation1] sm:$0xff pattern:$0x75316420] }
 0x1e3   :  { %v1307_v4 = vadd.f32 %v1304_v13, %v1275_v27  ;;  %v1333_v11 = vrot.slane %v1330_v43, 4  ;;  %1142 = vrot.lane.b32.xlu2 %v1138_v46, %s2305_s18  ;;  %1140 = vrot.lane.b32.xlu1 %v1137_v63, %s2305_s18  ;;  %v1580_v28 = vrot.slane %v1578_v45, 4 }
 0x1e5   :  { %v1335_v53 = vsel %vm73_vm0, %v1333_v11, %v1334_v2  ;;  %v4245_v11 = vld [vmem:[#allocation76_spill] sm:$0xff] }
 0x1e6   :  { %v1336_v49 = vsel %vm367_vm6, %v1330_v43, %v1335_v53 }
 0x1e7   :  { %v1339_v5 = vadd.f32 %v1336_v49, %v1307_v4  ;;  %v1546_v35 = vpop.permute.xlu0 %1545 }
 0x1e8   :  { %v1548_v60 = vrot.slane %v1546_v35, 4 }
 0x1e9   :  { %v1371_v47 = vadd.f32 %v1368_v58, %v1339_v5  ;;  %v1608_v3 = vpop.permute.xlu2 %1607 }
 0x1ea   :  { %v1480_v40 = vpop.permute.xlu1 %1479  ;;  %v1549_v20 = vsel %vm73_vm0, %v1547_v44, %v1548_v60  ;;  %v1611_v24 = vrot.slane %v1608_v3, 4 }
 0x1eb   :  { %1380 = vst [vmem:[#allocation1] ss:$2 sm:$0xff] %v1371_v47  ;;  %v1483_v52 = vrot.slane %v1480_v40, 4  ;;  %v1550_v30 = vsel %vm336_vm5, %v1544_v32, %v1549_v20 }
 0x1ed   :  { %v1485_v10 = vsel %vm73_vm0, %v1483_v52, %v1484_v16 }
 0x1ee   :  { %v1486_v22 = vsel %vm274_vm2, %v1480_v40, %v1485_v10 }
 0x1ef   :  { %v3780_v50 = vpop.permute.xlu0 %1693  ;;  %v1489_v41 = vadd.f32 %v1486_v22, %v1457_v12 }
 0x1f0   :  { %v1697_v4 = vrot.slane %v3780_v50, 4 }
 0x1f1   :  { %v1728_v48 = vpop.permute.xlu2 %1727 }
 0x1f2   :  { %v1514_v19 = vpop.permute.xlu1 %1513  ;;  %v1384_v54 = vld.sshfl [vmem:[#allocation1 + $0x8] sm:$0xff pattern:$0x75316420]  ;;  %v1383_v14 = vld.sshfl [vmem:[#allocation1] sm:$0xff pattern:$0x75316420] }
 0x1f3   :  { %v1516_v56 = vrot.slane %v1514_v19, 4  ;;  %v1522_v37 = vadd.f32 %v1514_v19, %v1490_v7  ;;  %1388 = vrot.lane.b32.xlu2 %v1384_v54, %s2306_s28  ;;  %1386 = vrot.lane.b32.xlu1 %v1383_v14, %s2306_s28  ;;  %v1730_v9 = vrot.slane %v1728_v48, 4  ;;  %v4246_v7 = vld [vmem:[#allocation77_spill] sm:$0xff] }
 0x1f5   :  { %v1517_v38 = vsel %vm73_vm0, %v1515_v31, %v1516_v56  ;;  %v1554_v55 = vadd.f32 %v1546_v35, %v1522_v37 }
 0x1f6   :  { %v1518_v33 = vsel %vm305_vm4, %v1512_v26, %v1517_v38 }
 0x1f7   :  { %v1586_v6 = vadd.f32 %v1578_v45, %v1554_v55  ;;  %v1610_v18 = vpop.permute.xlu0 %1609  ;;  %v1521_v1 = vadd.f32 %v1518_v33, %v1489_v41 }
 0x1f8   :  { %v1612_v61 = vrot.slane %v1610_v18, 4 }
 0x1f9   :  { %v1618_v29 = vadd.f32 %v1610_v18, %v1586_v6  ;;  %v1553_v15 = vadd.f32 %v1550_v30, %v1521_v1  ;;  %v1790_v46 = vpop.permute.xlu2 %1789 }
 0x1fa   :  { %v1576_v51 = vpop.permute.xlu1 %1575  ;;  %v1613_v0 = vsel %vm73_vm0, %v1611_v24, %v1612_v61  ;;  %v1793_v56 = vrot.slane %v1790_v46, 4 }
 0x1fb   :  { %v1579_v25 = vrot.slane %v1576_v51, 4  ;;  %1628 = vst [vmem:[#allocation1 + $0x10] ss:$2 sm:$0xff] %v1618_v29  ;;  %v1614_v17 = vsel %vm398_vm7, %v1608_v3, %v1613_v0 }
 0x1fd   :  { %v1581_v42 = vsel %vm73_vm0, %v1579_v25, %v1580_v28 }
 0x1fe   :  { %v1582_v36 = vsel %vm367_vm6, %v1576_v51, %v1581_v42 }
 0x1ff   :  { %v1585_v12 = vadd.f32 %v1582_v36, %v1553_v15  ;;  %v1758_v43 = vpop.permute.xlu0 %1757 }
 0x200   :  { %v1761_v58 = vrot.slane %v1758_v43, 4 }
 0x201   :  { %v1617_v21 = vadd.f32 %v1614_v17, %v1585_v12  ;;  %v1824_v62 = vpop.permute.xlu2 %1823 }
 0x202   :  { %v1696_v23 = vpop.permute.xlu1 %1695  ;;  %v1631_v39 = vld.sshfl [vmem:[#allocation1 + $0x10] sm:$0xff pattern:$0x75316420]  ;;  %v1826_v37 = vrot.slane %v1824_v62, 4 }
 0x203   :  { %1626 = vst [vmem:[#allocation1] ss:$2 sm:$0xff] %v1617_v21  ;;  %1636 = vrot.lane.b32.xlu0 %v1631_v39, %s2307_s10  ;;  %v1698_v2 = vrot.slane %v1696_v23, 4  ;;  %v1704_v63 = vadd.f32 %v1696_v23, %v4245_v11  ;;  %v418_v39 = vld [vmem:[#allocation7 + $0x1] ss:$8 sm:$0x3] }
 0x205   :  { %v1699_v53 = vsel %vm73_vm0, %v1697_v4, %v1698_v2  ;;  %v1736_v35 = vadd.f32 %v1728_v48, %v1704_v63 }
 0x206   :  { %v1700_v40 = vsel %vm243_vm1, %v3780_v50, %v1699_v53 }
 0x207   :  { %v1792_v5 = vpop.permute.xlu0 %1791  ;;  %v1703_v19 = vadd.f32 %v1700_v40, %v4246_v7 }
 0x208   :  { %v1794_v57 = vrot.slane %v1792_v5, 4 }
 0x20a   :  { %v1726_v27 = vpop.permute.xlu1 %1725  ;;  %v1630_v26 = vld.sshfl [vmem:[#allocation1 + $0x8] sm:$0xff pattern:$0x75316420]  ;;  %v1629_v13 = vld.sshfl [vmem:[#allocation1] sm:$0xff pattern:$0x75316420]  ;;  %v1795_v60 = vsel %vm73_vm0, %v1793_v56, %v1794_v57 }
 0x20b   :  { %1634 = vrot.lane.b32.xlu2 %v1630_v26, %s2307_s10  ;;  %1632 = vrot.lane.b32.xlu1 %v1629_v13, %s2307_s10  ;;  %v1729_v32 = vrot.slane %v1726_v27, 4  ;;  %v1796_v44 = vsel %vm336_vm5, %v1790_v46, %v1795_v60  ;;  %v664_v26 = vld [vmem:[#allocation7 + $0x2] ss:$8 sm:$0x3]  ;;  %v637_v13 = vperm.slane %v418_v39, 1 }
 0x20c   :  { %v883_v4 = vperm.slane %v664_v26, 1 }
 0x20d   :  { %v1731_v47 = vsel %vm73_vm0, %v1729_v32, %v1730_v9  ;;  %v910_v32 = vld [vmem:[#allocation7 + $0x3] ss:$8 sm:$0x3] }
 0x20e   :  { %v1732_v16 = vsel %vm274_vm2, %v1726_v27, %v1731_v47  ;;  %v197_v27 = vld [vmem:[#allocation7] ss:$8 sm:$0x3]  ;;  %v1128_v56 = vperm.slane %v910_v32, 0 }
 0x20f   :  { %v1735_v14 = vadd.f32 %v1732_v16, %v1703_v19  ;;  %v1854_v55 = vpop.permute.xlu0 %1853 }
 0x210   :  { %v1857_v6 = vrot.slane %v1854_v55, 4 }
 0x212   :  { %v1760_v59 = vpop.permute.xlu1 %1759 }
 0x213   :  { %v1762_v49 = vrot.slane %v1760_v59, 4  ;;  %v1768_v45 = vadd.f32 %v1760_v59, %v1736_v35  ;;  %v404_v59 = vperm.slane %v197_v27, 1  ;;  %v403_v35 = vperm.slane %v197_v27, 0 }
 0x215   :  { %v1763_v52 = vsel %vm73_vm0, %v1761_v58, %v1762_v49  ;;  %v1800_v22 = vadd.f32 %v1792_v5, %v1768_v45  ;;  %v414_v53 = vmul.f32 %v3708_v8, %v404_v59  ;;  %v636_v49 = vperm.slane %v418_v39, 0  ;;  %v1156_v58 = vld [vmem:[#allocation7 + $0x4] ss:$8 sm:$0x3] }
 0x216   :  { %v1764_v31 = vsel %vm305_vm4, %v1758_v43, %v1763_v52  ;;  %v1129_v52 = vperm.slane %v910_v32, 1  ;;  %v882_v45 = vperm.slane %v664_v26, 0  ;;  %v1375_v57 = vperm.slane %v1156_v58, 1 }
 0x217   :  { %v1767_v50 = vadd.f32 %v1764_v31, %v1735_v14  ;;  %v1832_v33 = vadd.f32 %v1824_v62, %v1800_v22  ;;  %v1402_v62 = vld [vmem:[#allocation7 + $0x5] ss:$8 sm:$0x3]  ;;  %v413_v22 = vmul.f32 %v3706_v34, %v403_v35 }
 0x218   :  { %v1621_v14 = vperm.slane %v1402_v62, 1 }
 0x219   :  { %v1799_v20 = vadd.f32 %v1796_v44, %v1767_v50  ;;  %v1374_v44 = vperm.slane %v1156_v58, 0 }
 0x21a   :  { %v1822_v10 = vpop.permute.xlu1 %1821 }
 0x21b   :  { %v1825_v54 = vrot.slane %v1822_v10, 4 }
 0x21d   :  { %v1827_v38 = vsel %vm73_vm0, %v1825_v54, %v1826_v37  ;;  %v649_v15 = vpop.permute.xlu2 %648 }
 0x21e   :  { %v1828_v41 = vsel %vm367_vm6, %v1822_v10, %v1827_v38 }
 0x21f   :  { %v1831_v61 = vadd.f32 %v1828_v41, %v1799_v20 }
 0x222   :  { %v1856_v3 = vpop.permute.xlu1 %1855 }
 0x223   :  { %v1858_v18 = vrot.slane %v1856_v3, 4  ;;  %v1864_v1 = vadd.f32 %v1856_v3, %v1832_v33 }
 0x225   :  { %v1859_v29 = vsel %vm73_vm0, %v1857_v6, %v1858_v18  ;;  %1874 = vst [vmem:[#allocation1 + $0x10] ss:$2 sm:$0xff] %v1864_v1 }
 0x226   :  { %v1860_v51 = vsel %vm398_vm7, %v1854_v55, %v1859_v29  ;;  %v1648_v55 = vld [vmem:[#allocation7 + $0x6] ss:$8 sm:$0x3]  ;;  %vm1934_vm7 = vcmask 1040384  }
 0x227   :  { %v1863_v28 = vadd.f32 %v1860_v51, %v1831_v61  ;;  %v1620_v61 = vperm.slane %v1402_v62, 0  ;;  %v1867_v29 = vperm.slane %v1648_v55, 1 }
 0x229   :  { %1872 = vst [vmem:[#allocation1] ss:$2 sm:$0xff] %v1863_v28 }
 0x22a   :  { %v653_v42 = vpop.permute.xlu1 %652 }
 0x22c   :  { %v1877_v24 = vld.sshfl [vmem:[#allocation1 + $0x10] sm:$0xff pattern:$0x75316420] }
 0x22d   :  { %1882 = vrot.lane.b32.xlu0 %v1877_v24, %s2308_s4  ;;  %v895_v12 = vpop.permute.xlu2 %894 }
 0x230   :  { %v1876_v25 = vld.sshfl [vmem:[#allocation1 + $0x8] sm:$0xff pattern:$0x75316420]  ;;  %v1875_v30 = vld.sshfl [vmem:[#allocation1] sm:$0xff pattern:$0x75316420] }
 0x231   :  { %1880 = vrot.lane.b32.xlu2 %v1876_v25, %s2308_s4  ;;  %1878 = vrot.lane.b32.xlu1 %v1875_v30, %s2308_s4 }
 0x232   :  { %v899_v17 = vpop.permute.xlu1 %898 }
 0x235   :  { %v651_v0 = vpop.permute.xlu0 %650 }
 0x236   :  { %v656_v43 = vsel %vm654_vm8, %v651_v0, %v653_v42  ;;  %v655_v47 = vsel %vm654_vm8, %v649_v15, %v651_v0 }
 0x237   :  { %v660_v63 = vmul.f32 %v656_v43, %v637_v13  ;;  %v659_v19 = vmul.f32 %v655_v47, %v636_v49 }
 0x239   :  { %v662_v40 = vadd.f32 %v660_v63, %v414_v53  ;;  %v661_v3 = vadd.f32 %v659_v19, %v413_v22 }
 0x23d   :  { %v1145_v36 = vpop.permute.xlu0 %1144  ;;  %v1143_v23 = vpop.permute.xlu2 %1142 }
 0x23e   :  { %v1148_v16 = vsel %vm1146_vm10, %v1143_v23, %v1145_v36 }
 0x23f   :  { %v1152_v60 = vmul.f32 %v1148_v16, %v1129_v52 }
 0x245   :  { %v897_v21 = vpop.permute.xlu0 %896 }
 0x246   :  { %v902_v11 = vsel %vm900_vm9, %v897_v21, %v899_v17  ;;  %v901_v10 = vsel %vm900_vm9, %v895_v12, %v897_v21  ;;  %v1866_v17 = vperm.slane %v1648_v55, 0 }
 0x247   :  { %v906_v5 = vmul.f32 %v902_v11, %v883_v4  ;;  %v905_v50 = vmul.f32 %v901_v10, %v882_v45 }
 0x249   :  { %v908_v54 = vadd.f32 %v906_v5, %v662_v40  ;;  %v907_v51 = vadd.f32 %v905_v50, %v661_v3 }
 0x24b   :  { %v1154_v6 = vadd.f32 %v1152_v60, %v908_v54 }
 0x24d   :  { %v1391_v46 = vpop.permute.xlu0 %1390  ;;  %v1389_v2 = vpop.permute.xlu2 %1388 }
 0x24e   :  { %v1394_v31 = vsel %vm1392_vm11, %v1389_v2, %v1391_v46 }
 0x24f   :  { %v1398_v33 = vmul.f32 %v1394_v31, %v1375_v57 }
 0x251   :  { %v1400_v28 = vadd.f32 %v1398_v33, %v1154_v6 }
 0x255   :  { %v1141_v48 = vpop.permute.xlu1 %1140 }
 0x256   :  { %v1147_v37 = vsel %vm1146_vm10, %v1141_v48, %v1143_v23 }
 0x257   :  { %v1151_v20 = vmul.f32 %v1147_v37, %v1128_v56 }
 0x259   :  { %v1153_v0 = vadd.f32 %v1151_v20, %v907_v51  ;;  %v4249_v20 = vld [vmem:[#allocation16_spill] sm:$0xff] }
 0x265   :  { %v1387_v9 = vpop.permute.xlu1 %1386  ;;  %v1635_v7 = vpop.permute.xlu2 %1634 }
 0x266   :  { %v1393_v18 = vsel %vm1392_vm11, %v1387_v9, %v1389_v2 }
 0x267   :  { %v1397_v24 = vmul.f32 %v1393_v18, %v1374_v44 }
 0x269   :  { %v1399_v21 = vadd.f32 %v1397_v24, %v1153_v0 }
 0x275   :  { %v1637_v8 = vpop.permute.xlu0 %1636 }
 0x276   :  { %v1640_v38 = vsel %vm1638_vm12, %v1635_v7, %v1637_v8 }
 0x277   :  { %v1644_v1 = vmul.f32 %v1640_v38, %v1621_v14 }
 0x279   :  { %v1646_v42 = vadd.f32 %v1644_v1, %v1400_v28 }
 0x27d   :  { %v1633_v41 = vpop.permute.xlu1 %1632 }
 0x27e   :  { %v1639_v34 = vsel %vm1638_vm12, %v1633_v41, %v1635_v7  ;;  %v4248_v41 = vld [vmem:[#allocation15_spill] sm:$0xff] }
 0x27f   :  { %v1643_v36 = vmul.f32 %v1639_v34, %v1620_v61 }
 0x281   :  { %v1645_v27 = vadd.f32 %v1643_v36, %v1399_v21 }
 0x28b   :  { %v1881_v25 = vpop.permute.xlu2 %1880 }
 0x29f   :  { %v1883_v30 = vpop.permute.xlu0 %1882 }
 0x2a0   :  { %v1886_v15 = vsel %vm1884_vm13, %v1881_v25, %v1883_v30 }
 0x2a1   :  { %v1890_v12 = vmul.f32 %v1886_v15, %v1867_v29 }
 0x2a3   :  { %v1892_v23 = vadd.f32 %v1890_v12, %v1646_v42  ;;  %v1879_v39 = vpop.permute.xlu1 %1878 }
 0x2a4   :  { %v1885_v48 = vsel %vm1884_vm13, %v1879_v39, %v1881_v25 }
 0x2a5   :  { %v2168_v26 = vmul.f32 -1.442695, %v1892_v23  ;;  %v1889_v13 = vmul.f32 %v1885_v48, %v1866_v17 }
 0x2a7   :  { %2189 = vpow2.f32 %v2168_v26  ;;  %v1891_v43 = vadd.f32 %v1889_v13, %v1645_v27 }
 0x2a9   :  { %v2167_v46 = vmul.f32 -1.442695, %v1891_v43 }
 0x2ab   :  { %2191 = vpow2.f32 %v2167_v46 }
 0x2ad   :  { %v2190_v2 = vpop.eup %2189 }
 0x2ae   :  { %v1900_v59 = vadd.f32 1.0, %v2190_v2 }
 0x2b0   :  { %2193 = vrcp.f32 %v1900_v59  ;;  %v1927_v49 = vand.u32 2147483648, %v1900_v59  ;;  %v1925_v5 = vand.u32 2147483647, %v1900_v59  ;;  %vm1921_vm15 = vweird.f32 %v1900_v59 }
 0x2b1   :  { %v2192_v4 = vpop.eup %2191 }
 0x2b2   :  { %v1899_v11 = vadd.f32 1.0, %v2192_v4  ;;  %vm1926_vm2 = vcmp.eq.f32.partialorder %v1925_v5, 8.507059e+37  ;;  %v1928_v45 = vor.u32 1.1754944e-38, %v1927_v49 }
 0x2b4   :  { %2195 = vrcp.f32 %v1899_v11  ;;  %v1912_v52 = vand.u32 2147483648, %v1899_v11  ;;  %v1910_v16 = vand.u32 2147483647, %v1899_v11  ;;  %vm1906_vm5 = vweird.f32 %v1899_v11 }
 0x2b6   :  { %v2194_v63 = vpop.eup %2193  ;;  %v1913_v8 = vor.u32 1.1754944e-38, %v1912_v52  ;;  %vm1911_vm8 = vcmp.eq.f32.partialorder %v1910_v16, 8.507059e+37 }
 0x2b7   :  { %v1917_v32 = vmul.f32 %v2194_v63, %v1900_v59  ;;  %vm1922_vm14 = vweird.f32 %v2194_v63 }
 0x2b8   :  { %vm1923_vm1 = vmor %vm1921_vm15, %vm1922_vm14 }
 0x2b9   :  { %v1918_v9 = vsub.f32 1.0, %v1917_v32 }
 0x2ba   :  { %v2196_v53 = vpop.eup %2195 }
 0x2bb   :  { %v1919_v58 = vmul.f32 %v2194_v63, %v1918_v9  ;;  %v1902_v47 = vmul.f32 %v2196_v53, %v1899_v11  ;;  %vm1907_vm4 = vweird.f32 %v2196_v53 }
 0x2bc   :  { %vm1908_vm6 = vmor %vm1906_vm5, %vm1907_vm4 }
 0x2bd   :  { %v1903_v35 = vsub.f32 1.0, %v1902_v47  ;;  %v1920_v40 = vadd.f32 %v2194_v63, %v1919_v58 }
 0x2bf   :  { %v1904_v62 = vmul.f32 %v2196_v53, %v1903_v35  ;;  %v1924_v10 = vsel %vm1923_vm1, %v2194_v63, %v1920_v40 }
 0x2c0   :  { %v1929_v57 = vsel %vm1926_vm2, %v1928_v45, %v1924_v10 }
 0x2c1   :  { %v1905_v7 = vadd.f32 %v2196_v53, %v1904_v62  ;;  %v1933_v54 = vrot.slane %v1929_v57, 7 }
 0x2c3   :  { %v1909_v19 = vsel %vm1908_vm6, %v2196_v53, %v1905_v7 }
 0x2c4   :  { %v1914_v31 = vsel %vm1911_vm8, %v1913_v8, %v1909_v19 }
 0x2c5   :  { %v1935_v56 = vsel %vm1934_vm7, %v1914_v31, %v1933_v54  ;;  %v1936_v37 = vsel %vm154_vm3, %v1914_v31, %v1933_v54 }
 0x2c6   :  { %v1937_v14 = vrot.slane %v1936_v37, 1  ;;  %v1939_v22 = vperm.slane %v1935_v56, 1  ;;  %v1938_v60 = vperm.slane %v1935_v56, 0 }
 0x2c8   :  { %v1941_v50 = vperm.slane %v1937_v14, 1  ;;  %v1942_v38 = vrot.slane %v1939_v22, 4  ;;  %v1940_v55 = vperm.slane %v1937_v14, 0 }
 0x2ca   :  { %v1943_v33 = vrot.slane %v1941_v50, 4  ;;  %v1944_v44 = vsel %vm73_vm0, %v1938_v60, %v1942_v38 }
 0x2cb   :  { %v1948_v3 = vmul.f32 %v1944_v44, %v4248_v41 }
 0x2cc   :  { %v1945_v6 = vsel %vm73_vm0, %v1940_v55, %v1943_v33 }
 0x2cd   :  { %v1949_v18 = vmul.f32 %v1945_v6, %v4249_v20  ;;  %1950 = vst [vmem:[#allocation10] sm:$0xff] %v1948_v3 }
 0x2cf   :  { %1951 = vst [vmem:[#allocation10 + $0x8] sm:$0xff] %v1949_v18 }
 0x2d0   :  { %1964 = dma.vmem_to_hbm [thread:$0]  %s1957_s1, 256, %s1959_s15, [#allocation5], %s4251_s2, %s4251_s2, %s4250_s20  }
 0x2d1   :  { %2288 = dma.done.wait [#allocation5], 256  }
 0x2d2   :  { %2289 = vsyncadd [#allocation5], 4294967040 }
 0x2d3   :  { %1969 = vsyncpa [#allocation4], 1 }
 0x2d4   :  { %1970 = vsyncpa [#allocation9], 1 }
 0x2d5   :  { %1971 = vsyncpa [#allocation5], 1 }
 0x2d6   :  { %1972 = vsyncpa [#allocation6], 1 }

</bundles_post_ra>
